<compile_context>
chip_gen: v7x
topology: tpu7x:2x2x1
jax: 0.10.0
libtpu: 0.0.40
codegen_flags: <defaults>
</compile_context>

<pallas_src>
import functools
import numpy as np

import jax
import jax.numpy as jnp
from jax import lax
from jax.experimental import pallas as pl
from jax.experimental.pallas import tpu as pltpu

FIRST_LAYER_BIT_WIDTH = 8   # bit widths are carried through the config but not modeled
BN_EPS = 1e-5


# ----------------------------- Pallas kernels -----------------------------

def _init_conv_kernel(x_ref, wtap_ref, shift_ref, o_ref, *, stride, Hf, Wf, Ho, Cin):
    """Dense 3x3 conv (pad=0) + folded-BN + ReLU for one image.

    x_ref:(1, H, W*Cin)  wtap_ref:(9, Wf*Cin, Wo*Cout)  shift_ref:(1, Wo*Cout)
    o_ref:(1, Ho, Wo*Cout).  Column (W) stride selection is folded into wtap;
    row stride selection is a tiny constant matmul built from iota.
    """
    x = x_ref[0]                                          # (H, W*Cin)
    wcols = Wf * Cin
    acc = jnp.zeros((Hf, o_ref.shape[2]), jnp.float32)
    for t in range(9):                                    # 9 static taps, unrolled
        di, dj = t // 3, t % 3
        xs = x[di:di + Hf, dj * Cin:dj * Cin + wcols]
        acc = acc + jnp.dot(xs, wtap_ref[t], preferred_element_type=jnp.float32)
    if stride > 1:                                        # row subsample via MXU matmul
        ii = lax.broadcasted_iota(jnp.int32, (Ho, Hf), 0)
        uu = lax.broadcasted_iota(jnp.int32, (Ho, Hf), 1)
        rowsel = (uu == stride * ii).astype(jnp.float32)
        acc = jnp.dot(rowsel, acc, preferred_element_type=jnp.float32)
    o_ref[0] = jnp.maximum(acc + shift_ref[...], 0.0)


def _dws_block_kernel(x_ref, dww_ref, dwsh_ref, pww_ref, pwsh_ref, o_ref, xpad_ref,
                      *, stride, H, W, C, Ho):
    """Fused DwsConvBlock: dw 3x3 (pad=1) + BN + ReLU -> pw 1x1 + BN + ReLU.

    x_ref:(1, H, W*C)   dww_ref:(9, W*C)   dwsh_ref:(1, W*C)
    pww_ref:(W*C, Wo*Cout)  pwsh_ref:(1, Wo*Cout)  o_ref:(1, Ho, Wo*Cout)
    xpad_ref: VMEM scratch (H+2, (W+2)*C) holding the zero-padded image.
    """
    WC = W * C
    xpad_ref[...] = jnp.zeros_like(xpad_ref)              # conv padding done in VMEM
    xpad_ref[1:1 + H, C:C + WC] = x_ref[0]
    xp = xpad_ref[...]

    acc = jnp.zeros((H, WC), jnp.float32)
    for t in range(9):                                    # depthwise MAC on the VPU
        di, dj = t // 3, t % 3
        acc = acc + xp[di:di + H, dj * C:dj * C + WC] * dww_ref[t:t + 1, :]
    y = jnp.maximum(acc + dwsh_ref[...], 0.0)             # dw BN + ReLU, (H, W*C)

    if stride > 1:                                        # row subsample via MXU matmul
        ii = lax.broadcasted_iota(jnp.int32, (Ho, H), 0)
        uu = lax.broadcasted_iota(jnp.int32, (Ho, H), 1)
        rowsel = (uu == stride * ii).astype(jnp.float32)
        y = jnp.dot(rowsel, y, preferred_element_type=jnp.float32)

    # pointwise 1x1: block-diagonal weight keeps input/output lane-dense;
    # the stride-2 column selection is folded into pww by the wrapper.
    z = jnp.dot(y, pww_ref[...], preferred_element_type=jnp.float32)
    o_ref[0] = jnp.maximum(z + pwsh_ref[...], 0.0)


def _head_kernel(x_ref, w_ref, b_ref, o_ref, *, Ho):
    """Fused global HoxWo avg pool + linear head for one image.

    x_ref:(1, Ho, Wo*C)  w_ref:(Wo*C, K) with 1/(Ho*Wo) folded in  b_ref:(1, K)
    o_ref:(1, 1, K).  Pool is done as a tiny MXU matmul against a ones row.
    """
    pooled = jnp.dot(jnp.full((1, Ho), 1.0, jnp.float32), x_ref[0],
                     preferred_element_type=jnp.float32)          # (1, Wo*C)
    o_ref[0] = (jnp.dot(pooled, w_ref[...], preferred_element_type=jnp.float32)
                + b_ref[...])


# ----------------------------- pallas_call wrappers -----------------------------

def init_conv_block(x, wtaps, shift_t, *, stride, Cin, Cout, Hf, Wf, Ho, Wo):
    N, H, WCin = x.shape
    kern = functools.partial(_init_conv_kernel, stride=stride, Hf=Hf, Wf=Wf,
                             Ho=Ho, Cin=Cin)
    return pl.pallas_call(
        kern,
        out_shape=jax.ShapeDtypeStruct((N, Ho, Wo * Cout), jnp.float32),
        grid=(N,),
        in_specs=[
            pl.BlockSpec((1, H, WCin), lambda n: (n, 0, 0)),
            pl.BlockSpec((9, Wf * Cin, Wo * Cout), lambda n: (0, 0, 0)),
            pl.BlockSpec((1, Wo * Cout), lambda n: (0, 0)),
        ],
        out_specs=pl.BlockSpec((1, Ho, Wo * Cout), lambda n: (n, 0, 0)),
        compiler_params=pltpu.CompilerParams(dimension_semantics=("parallel",)),
    )(x, wtaps, shift_t)


def dws_block(x, dww_t, dwsh_t, pww_big, pwsh_t, *, stride, H, W, C, Cout, Ho, Wo):
    N = x.shape[0]
    kern = functools.partial(_dws_block_kernel, stride=stride, H=H, W=W, C=C, Ho=Ho)
    return pl.pallas_call(
        kern,
        out_shape=jax.ShapeDtypeStruct((N, Ho, Wo * Cout), jnp.float32),
        grid=(N,),
        in_specs=[
            pl.BlockSpec((1, H, W * C), lambda n: (n, 0, 0)),
            pl.BlockSpec((9, W * C), lambda n: (0, 0)),
            pl.BlockSpec((1, W * C), lambda n: (0, 0)),
            pl.BlockSpec((W * C, Wo * Cout), lambda n: (0, 0)),
            pl.BlockSpec((1, Wo * Cout), lambda n: (0, 0)),
        ],
        out_specs=pl.BlockSpec((1, Ho, Wo * Cout), lambda n: (n, 0, 0)),
        scratch_shapes=[pltpu.VMEM((H + 2, (W + 2) * C), jnp.float32)],
        compiler_params=pltpu.CompilerParams(dimension_semantics=("parallel",)),
    )(x, dww_t, dwsh_t, pww_big, pwsh_t)


def head_pool_fc(x, fcw_t, fcb, *, Ho):
    N, _, WC = x.shape
    K = fcw_t.shape[1]
    out = pl.pallas_call(
        functools.partial(_head_kernel, Ho=Ho),
        out_shape=jax.ShapeDtypeStruct((N, 1, K), jnp.float32),
        grid=(N,),
        in_specs=[
            pl.BlockSpec((1, Ho, WC), lambda n: (n, 0, 0)),
            pl.BlockSpec((WC, K), lambda n: (0, 0)),
            pl.BlockSpec((1, K), lambda n: (0, 0)),
        ],
        out_specs=pl.BlockSpec((1, 1, K), lambda n: (n, 0, 0)),
        compiler_params=pltpu.CompilerParams(dimension_semantics=("parallel",)),
    )(x, fcw_t, fcb)
    return out.reshape(N, K)


# ------------------------------- weight prep (wrapper, folded at compile) -------------

def bn_scale_shift(p):
    scale = p["gamma"] / jnp.sqrt(p["var"] + BN_EPS)
    shift = p["beta"] - p["mean"] * scale
    return scale, shift


def prep_init_params(p, H, W, Cin, Cout, stride):
    """Per-tap block-diagonal weights for the dense init conv (pad=0)."""
    scale, shift = bn_scale_shift(p)
    ws = p["w"] * scale                           # (3,3,Cin,Cout), BN scale folded
    Hf, Wf = H - 2, W - 2                         # full stride-1 output extent
    Ho = (H - 3) // stride + 1
    Wo = (W - 3) // stride + 1
    taps = []
    for di in range(3):
        for dj in range(3):
            wt = jnp.zeros((Wf * Cin, Wo * Cout), jnp.float32)
            for j in range(Wo):
                r0 = (stride * j) * Cin           # column-stride selection folded here
                wt = wt.at[r0:r0 + Cin, j * Cout:(j + 1) * Cout].set(ws[di, dj])
            taps.append(wt)
    wtaps = jnp.stack(taps, axis=0)               # (9, Wf*Cin, Wo*Cout)
    sh_t = jnp.tile(shift, (Wo,)).reshape(1, Wo * Cout)
    return wtaps, sh_t, Hf, Wf, Ho, Wo


def prep_dws_params(p_dw, p_pw, H, W, C, Cout, stride):
    """Folded weights for a fused DwsConvBlock (dw pad=1, pw 1x1)."""
    sc_dw, sh_dw = bn_scale_shift(p_dw)
    w_dw = p_dw["w"].reshape(9, C) * sc_dw[None, :]
    dww_t = jnp.tile(w_dw, (1, W))                            # (9, W*C)
    dwsh_t = jnp.tile(sh_dw, (W,)).reshape(1, W * C)

    sc_pw, sh_pw = bn_scale_shift(p_pw)
    w_pw = p_pw["w"].reshape(C, Cout) * sc_pw[None, :]
    Ho = (H + 2 - 3) // stride + 1
    Wo = (W + 2 - 3) // stride + 1
    pww_big = jnp.zeros((W * C, Wo * Cout), jnp.float32)      # block-diagonal pw weight
    for j in range(Wo):
        r0 = (stride * j) * C                                 # column-stride selection
        pww_big = pww_big.at[r0:r0 + C, j * Cout:(j + 1) * Cout].set(w_pw)
    pwsh_t = jnp.tile(sh_pw, (Wo,)).reshape(1, Wo * Cout)
    return dww_t, dwsh_t, pww_big, pwsh_t, Ho, Wo


# ------------------------------- model config / params -------------------------------

def build_config(channels, first_stage_stride, in_channels):
    """Mirror of MobileNet.__init__: list of (kind, cin, cout, k, stride, pad)."""
    cfg = []
    init_c = channels[0][0]
    cfg.append(("conv", in_channels, init_c, 3, 2, 0))       # init_block (padding=0)
    in_c = init_c
    for i, stage in enumerate(channels[1:]):
        for j, out_c in enumerate(stage):
            stride = 2 if (j == 0 and (i != 0 or first_stage_stride)) else 1
            cfg.append(("dw", in_c, in_c, 3, stride, 1))      # depthwise 3x3, pad 1
            cfg.append(("pw", in_c, out_c, 1, 1, 0))          # pointwise 1x1
            in_c = out_c
    return cfg, in_c


def init_params(cfg, key):
    params = []
    for idx, (kind, cin, cout, k, _stride, _pad) in enumerate(cfg):
        lk = jax.random.fold_in(key, idx)
        k1, k2, k3, k4, k5 = jax.random.split(lk, 5)
        if kind == "dw":
            w = jax.random.normal(k1, (k, k, cin), jnp.float32) * (1.0 / np.sqrt(k * k))
        else:
            w = jax.random.normal(k1, (k, k, cin, cout), jnp.float32) * (1.0 / np.sqrt(k * k * cin))
        params.append(dict(
            w=w,
            gamma=1.0 + 0.1 * jax.random.normal(k2, (cout,), jnp.float32),
            beta=0.1 * jax.random.normal(k3, (cout,), jnp.float32),
            mean=0.1 * jax.random.normal(k4, (cout,), jnp.float32),
            var=1.0 + 0.5 * jax.random.uniform(k5, (cout,), jnp.float32),
        ))
    return params


# ------------------------------- forward passes -------------------------------

def mobilenet_forward(x_nchw, cfg, params, fc_w, fc_b):
    x = jnp.transpose(x_nchw, (0, 2, 3, 1))       # NCHW -> NHWC (only boundary transpose)
    N, H, W, C = x.shape
    x = x.reshape(N, H, W * C)                    # lane-dense (N, H, W*C) activations

    # init block: dense 3x3 conv, stride 2, pad 0, + BN + ReLU
    _, cin, cout, _k, stride, _pad = cfg[0]
    wtaps, sh_t, Hf, Wf, Ho, Wo = prep_init_params(params[0], H, W, cin, cout, stride)
    x = init_conv_block(x, wtaps, sh_t, stride=stride, Cin=cin, Cout=cout,
                        Hf=Hf, Wf=Wf, Ho=Ho, Wo=Wo)
    H, W, C = Ho, Wo, cout

    # fused depthwise-separable blocks (dw + pw pairs in the flat cfg)
    li = 1
    while li < len(cfg):
        dw_cfg, pw_cfg = cfg[li], cfg[li + 1]
        stride = dw_cfg[4]
        cout = pw_cfg[2]
        dww_t, dwsh_t, pww_big, pwsh_t, Ho, Wo = prep_dws_params(
            params[li], params[li + 1], H, W, C, cout, stride)
        x = dws_block(x, dww_t, dwsh_t, pww_big, pwsh_t,
                      stride=stride, H=H, W=W, C=C, Cout=cout, Ho=Ho, Wo=Wo)
        H, W, C = Ho, Wo, cout
        li += 2

    # fused 7x7 avg pool + QuantLinear head (float); pool mean folded into fc weight
    fcw_t = jnp.tile(fc_w, (W, 1)) * (1.0 / (H * W))          # (W*C, K)
    return head_pool_fc(x, fcw_t, fc_b.reshape(1, -1), Ho=H)


def mobilenet_reference(x_nchw, cfg, params, fc_w, fc_b):
    """Pure-JAX reference (lax.conv) for correctness checking."""
    x = jnp.transpose(x_nchw, (0, 2, 3, 1))
    for layer, p in zip(cfg, params):
        kind, cin, cout, k, stride, pad = layer
        scale, shift = bn_scale_shift(p)
        if kind == "dw":
            w = p["w"].reshape(k, k, 1, cin)
            y = lax.conv_general_dilated(
                x, w, (stride, stride), [(pad, pad), (pad, pad)],
                dimension_numbers=("NHWC", "HWIO", "NHWC"),
                feature_group_count=cin)
        else:
            w = p["w"].reshape(k, k, cin, cout)
            y = lax.conv_general_dilated(
                x, w, (stride, stride), [(pad, pad), (pad, pad)],
                dimension_numbers=("NHWC", "HWIO", "NHWC"))
        x = jnp.maximum(y * scale + shift, 0.0)
    x = jnp.mean(x, axis=(1, 2))
    return x @ fc_w + fc_b


# ---------------------------------- main -----------------------------------

if __name__ == "__main__":
    # Small MobileNet config (same wiring as the PyTorch __init__, fewer/narrower stages).
    channels = [[8], [16], [32, 32]]
    first_stage_stride = False
    in_channels = 3
    num_classes = 16
    cfg, feat_c = build_config(channels, first_stage_stride, in_channels)

    key = jax.random.PRNGKey(0)
    kx, kp, kfc = jax.random.split(key, 3)
    params = init_params(cfg, kp)
    kfw, kfb = jax.random.split(kfc)
    fc_w = jax.random.normal(kfw, (feat_c, num_classes), jnp.float32) / np.sqrt(feat_c)
    fc_b = 0.1 * jax.random.normal(kfb, (num_classes,), jnp.float32)

    # Spatial 29 -> 14 (init, stride 2, pad 0) -> 14 -> 7 (stage2 stride 2) -> 7,
    # so the final 7x7 average pool reduces to 1x1 exactly like the original model.
    x = jax.random.normal(kx, (2, in_channels, 29, 29), jnp.float32)

    fwd = jax.jit(lambda xx: mobilenet_forward(xx, cfg, params, fc_w, fc_b))
    out = jax.block_until_ready(fwd(x))

    ref = jax.block_until_ready(mobilenet_reference(x, cfg, params, fc_w, fc_b))
    err = float(jnp.max(jnp.abs(out - ref)))
    denom = float(jnp.max(jnp.abs(ref))) + 1e-6
    assert out.shape == (2, num_classes), out.shape
    assert err / denom < 0.05, (err, denom)
    print("KERNEL_OK")
</pallas_src>

<mosaic_0001>
module attributes {stable_mosaic.version = 11 : i64} {
  func.func @_init_conv_kernel(%arg0: i32, %arg1: memref<1x29x87xf32, #tpu.memory_space<vmem>>, %arg2: memref<9x81x112xf32, #tpu.memory_space<vmem>>, %arg3: memref<1x112xf32, #tpu.memory_space<vmem>>, %arg4: memref<1x14x112xf32, #tpu.memory_space<vmem>>) attributes {dimension_semantics = [#tpu.dimension_semantics<parallel>], iteration_bounds = array<i64: 2>, scalar_prefetch = 0 : i64, scratch_operands = 0 : i64, tpu.core_type = #tpu.core_type<tc>, window_params = [{transform_indices = @transform_0, window_bounds = array<i64: 1, 29, 87>}, {pipeline_mode = #tpu.pipeline_mode<synchronous>, transform_indices = @transform_1, window_bounds = array<i64: 9, 81, 112>}, {pipeline_mode = #tpu.pipeline_mode<synchronous>, transform_indices = @transform_2, window_bounds = array<i64: 1, 112>}, {transform_indices = @transform_3, window_bounds = array<i64: 1, 14, 112>}]} {
    %c0 = arith.constant 0 : index
    %c0_0 = arith.constant 0 : index
    %c0_1 = arith.constant 0 : index
    %0 = vector.load %arg1[%c0, %c0_0, %c0_1] : memref<1x29x87xf32, #tpu.memory_space<vmem>>, vector<1x29x87xf32>
    %1 = vector.shape_cast %0 : vector<1x29x87xf32> to vector<29x87xf32>
    %cst = arith.constant 0.000000e+00 : f32
    %2 = vector.broadcast %cst : f32 to vector<27x112xf32>
    %3 = vector.extract_strided_slice %1 {offsets = [0, 0], sizes = [27, 81], strides = [1, 1]} : vector<29x87xf32> to vector<27x81xf32>
    %c0_2 = arith.constant 0 : index
    %c0_3 = arith.constant 0 : index
    %c0_4 = arith.constant 0 : index
    %4 = vector.load %arg2[%c0_2, %c0_3, %c0_4] : memref<9x81x112xf32, #tpu.memory_space<vmem>>, vector<1x81x112xf32>
    %5 = vector.shape_cast %4 : vector<1x81x112xf32> to vector<81x112xf32>
    %cst_5 = arith.constant dense<0.000000e+00> : vector<27x112xf32>
    %6 = tpu.matmul %3, %5, %cst_5 {dimension_numbers = #tpu.dot_dimension_numbers<[1], [0], [0], [1], [0, 0, 1, 1], [], []>} : vector<27x81xf32>, vector<81x112xf32>, vector<27x112xf32> -> vector<27x112xf32>
    %7 = arith.addf %2, %6 : vector<27x112xf32>
    %8 = vector.extract_strided_slice %1 {offsets = [0, 3], sizes = [27, 81], strides = [1, 1]} : vector<29x87xf32> to vector<27x81xf32>
    %c1 = arith.constant 1 : index
    %c0_6 = arith.constant 0 : index
    %c0_7 = arith.constant 0 : index
    %9 = vector.load %arg2[%c1, %c0_6, %c0_7] : memref<9x81x112xf32, #tpu.memory_space<vmem>>, vector<1x81x112xf32>
    %10 = vector.shape_cast %9 : vector<1x81x112xf32> to vector<81x112xf32>
    %cst_8 = arith.constant dense<0.000000e+00> : vector<27x112xf32>
    %11 = tpu.matmul %8, %10, %cst_8 {dimension_numbers = #tpu.dot_dimension_numbers<[1], [0], [0], [1], [0, 0, 1, 1], [], []>} : vector<27x81xf32>, vector<81x112xf32>, vector<27x112xf32> -> vector<27x112xf32>
    %12 = arith.addf %7, %11 : vector<27x112xf32>
    %13 = vector.extract_strided_slice %1 {offsets = [0, 6], sizes = [27, 81], strides = [1, 1]} : vector<29x87xf32> to vector<27x81xf32>
    %c2 = arith.constant 2 : index
    %c0_9 = arith.constant 0 : index
    %c0_10 = arith.constant 0 : index
    %14 = vector.load %arg2[%c2, %c0_9, %c0_10] : memref<9x81x112xf32, #tpu.memory_space<vmem>>, vector<1x81x112xf32>
    %15 = vector.shape_cast %14 : vector<1x81x112xf32> to vector<81x112xf32>
    %cst_11 = arith.constant dense<0.000000e+00> : vector<27x112xf32>
    %16 = tpu.matmul %13, %15, %cst_11 {dimension_numbers = #tpu.dot_dimension_numbers<[1], [0], [0], [1], [0, 0, 1, 1], [], []>} : vector<27x81xf32>, vector<81x112xf32>, vector<27x112xf32> -> vector<27x112xf32>
    %17 = arith.addf %12, %16 : vector<27x112xf32>
    %18 = vector.extract_strided_slice %1 {offsets = [1, 0], sizes = [27, 81], strides = [1, 1]} : vector<29x87xf32> to vector<27x81xf32>
    %c3 = arith.constant 3 : index
    %c0_12 = arith.constant 0 : index
    %c0_13 = arith.constant 0 : index
    %19 = vector.load %arg2[%c3, %c0_12, %c0_13] : memref<9x81x112xf32, #tpu.memory_space<vmem>>, vector<1x81x112xf32>
    %20 = vector.shape_cast %19 : vector<1x81x112xf32> to vector<81x112xf32>
    %cst_14 = arith.constant dense<0.000000e+00> : vector<27x112xf32>
    %21 = tpu.matmul %18, %20, %cst_14 {dimension_numbers = #tpu.dot_dimension_numbers<[1], [0], [0], [1], [0, 0, 1, 1], [], []>} : vector<27x81xf32>, vector<81x112xf32>, vector<27x112xf32> -> vector<27x112xf32>
    %22 = arith.addf %17, %21 : vector<27x112xf32>
    %23 = vector.extract_strided_slice %1 {offsets = [1, 3], sizes = [27, 81], strides = [1, 1]} : vector<29x87xf32> to vector<27x81xf32>
    %c4 = arith.constant 4 : index
    %c0_15 = arith.constant 0 : index
    %c0_16 = arith.constant 0 : index
    %24 = vector.load %arg2[%c4, %c0_15, %c0_16] : memref<9x81x112xf32, #tpu.memory_space<vmem>>, vector<1x81x112xf32>
    %25 = vector.shape_cast %24 : vector<1x81x112xf32> to vector<81x112xf32>
    %cst_17 = arith.constant dense<0.000000e+00> : vector<27x112xf32>
    %26 = tpu.matmul %23, %25, %cst_17 {dimension_numbers = #tpu.dot_dimension_numbers<[1], [0], [0], [1], [0, 0, 1, 1], [], []>} : vector<27x81xf32>, vector<81x112xf32>, vector<27x112xf32> -> vector<27x112xf32>
    %27 = arith.addf %22, %26 : vector<27x112xf32>
    %28 = vector.extract_strided_slice %1 {offsets = [1, 6], sizes = [27, 81], strides = [1, 1]} : vector<29x87xf32> to vector<27x81xf32>
    %c5 = arith.constant 5 : index
    %c0_18 = arith.constant 0 : index
    %c0_19 = arith.constant 0 : index
    %29 = vector.load %arg2[%c5, %c0_18, %c0_19] : memref<9x81x112xf32, #tpu.memory_space<vmem>>, vector<1x81x112xf32>
    %30 = vector.shape_cast %29 : vector<1x81x112xf32> to vector<81x112xf32>
    %cst_20 = arith.constant dense<0.000000e+00> : vector<27x112xf32>
    %31 = tpu.matmul %28, %30, %cst_20 {dimension_numbers = #tpu.dot_dimension_numbers<[1], [0], [0], [1], [0, 0, 1, 1], [], []>} : vector<27x81xf32>, vector<81x112xf32>, vector<27x112xf32> -> vector<27x112xf32>
    %32 = arith.addf %27, %31 : vector<27x112xf32>
    %33 = vector.extract_strided_slice %1 {offsets = [2, 0], sizes = [27, 81], strides = [1, 1]} : vector<29x87xf32> to vector<27x81xf32>
    %c6 = arith.constant 6 : index
    %c0_21 = arith.constant 0 : index
    %c0_22 = arith.constant 0 : index
    %34 = vector.load %arg2[%c6, %c0_21, %c0_22] : memref<9x81x112xf32, #tpu.memory_space<vmem>>, vector<1x81x112xf32>
    %35 = vector.shape_cast %34 : vector<1x81x112xf32> to vector<81x112xf32>
    %cst_23 = arith.constant dense<0.000000e+00> : vector<27x112xf32>
    %36 = tpu.matmul %33, %35, %cst_23 {dimension_numbers = #tpu.dot_dimension_numbers<[1], [0], [0], [1], [0, 0, 1, 1], [], []>} : vector<27x81xf32>, vector<81x112xf32>, vector<27x112xf32> -> vector<27x112xf32>
    %37 = arith.addf %32, %36 : vector<27x112xf32>
    %38 = vector.extract_strided_slice %1 {offsets = [2, 3], sizes = [27, 81], strides = [1, 1]} : vector<29x87xf32> to vector<27x81xf32>
    %c7 = arith.constant 7 : index
    %c0_24 = arith.constant 0 : index
    %c0_25 = arith.constant 0 : index
    %39 = vector.load %arg2[%c7, %c0_24, %c0_25] : memref<9x81x112xf32, #tpu.memory_space<vmem>>, vector<1x81x112xf32>
    %40 = vector.shape_cast %39 : vector<1x81x112xf32> to vector<81x112xf32>
    %cst_26 = arith.constant dense<0.000000e+00> : vector<27x112xf32>
    %41 = tpu.matmul %38, %40, %cst_26 {dimension_numbers = #tpu.dot_dimension_numbers<[1], [0], [0], [1], [0, 0, 1, 1], [], []>} : vector<27x81xf32>, vector<81x112xf32>, vector<27x112xf32> -> vector<27x112xf32>
    %42 = arith.addf %37, %41 : vector<27x112xf32>
    %43 = vector.extract_strided_slice %1 {offsets = [2, 6], sizes = [27, 81], strides = [1, 1]} : vector<29x87xf32> to vector<27x81xf32>
    %c8 = arith.constant 8 : index
    %c0_27 = arith.constant 0 : index
    %c0_28 = arith.constant 0 : index
    %44 = vector.load %arg2[%c8, %c0_27, %c0_28] : memref<9x81x112xf32, #tpu.memory_space<vmem>>, vector<1x81x112xf32>
    %45 = vector.shape_cast %44 : vector<1x81x112xf32> to vector<81x112xf32>
    %cst_29 = arith.constant dense<0.000000e+00> : vector<27x112xf32>
    %46 = tpu.matmul %43, %45, %cst_29 {dimension_numbers = #tpu.dot_dimension_numbers<[1], [0], [0], [1], [0, 0, 1, 1], [], []>} : vector<27x81xf32>, vector<81x112xf32>, vector<27x112xf32> -> vector<27x112xf32>
    %47 = arith.addf %42, %46 : vector<27x112xf32>
    %48 = tpu.iota {dimensions = array<i32: 0>} : vector<14x27xi32>
    %49 = tpu.iota {dimensions = array<i32: 1>} : vector<14x27xi32>
    %c2_i32 = arith.constant 2 : i32
    %50 = vector.broadcast %c2_i32 : i32 to vector<14x27xi32>
    %51 = arith.muli %50, %48 : vector<14x27xi32>
    %52 = arith.cmpi eq, %49, %51 : vector<14x27xi32>
    %53 = arith.extui %52 : vector<14x27xi1> to vector<14x27xi32>
    %54 = arith.sitofp %53 : vector<14x27xi32> to vector<14x27xf32>
    %cst_30 = arith.constant dense<0.000000e+00> : vector<14x112xf32>
    %55 = tpu.matmul %54, %47, %cst_30 {dimension_numbers = #tpu.dot_dimension_numbers<[1], [0], [0], [1], [0, 0, 1, 1], [], []>} : vector<14x27xf32>, vector<27x112xf32>, vector<14x112xf32> -> vector<14x112xf32>
    %c0_31 = arith.constant 0 : index
    %c0_32 = arith.constant 0 : index
    %56 = vector.load %arg3[%c0_31, %c0_32] : memref<1x112xf32, #tpu.memory_space<vmem>>, vector<1x112xf32>
    %57 = vector.broadcast %56 : vector<1x112xf32> to vector<14x112xf32>
    %58 = arith.addf %55, %57 : vector<14x112xf32>
    %cst_33 = arith.constant 0.000000e+00 : f32
    %59 = vector.broadcast %cst_33 : f32 to vector<14x112xf32>
    %60 = arith.maximumf %58, %59 : vector<14x112xf32>
    %c0_34 = arith.constant 0 : index
    %c0_35 = arith.constant 0 : index
    %c0_36 = arith.constant 0 : index
    %61 = vector.load %arg4[%c0_34, %c0_35, %c0_36] : memref<1x14x112xf32, #tpu.memory_space<vmem>>, vector<1x14x112xf32>
    %62 = vector.shape_cast %61 : vector<1x14x112xf32> to vector<14x112xf32>
    %63 = vector.shape_cast %60 : vector<14x112xf32> to vector<1x14x112xf32>
    tpu.vector_store %arg4[%c0_34, %c0_35, %c0_36], %63 {strides = array<i32>} : memref<1x14x112xf32, #tpu.memory_space<vmem>>, vector<1x14x112xf32>,
    return
  }
  func.func @transform_0(%arg0: i32) -> (i32, i32, i32) {
    %c0_i32 = arith.constant 0 : i32
    %c0_i32_0 = arith.constant 0 : i32
    %c0_i32_1 = arith.constant 0 : i32
    return %arg0, %c0_i32, %c0_i32_0 : i32, i32, i32
  }
  func.func @transform_1(%arg0: i32) -> (i32, i32, i32) {
    %c0_i32 = arith.constant 0 : i32
    %c0_i32_0 = arith.constant 0 : i32
    %c0_i32_1 = arith.constant 0 : i32
    %c0_i32_2 = arith.constant 0 : i32
    return %c0_i32, %c0_i32_0, %c0_i32_1 : i32, i32, i32
  }
  func.func @transform_2(%arg0: i32) -> (i32, i32) {
    %c0_i32 = arith.constant 0 : i32
    %c0_i32_0 = arith.constant 0 : i32
    %c0_i32_1 = arith.constant 0 : i32
    return %c0_i32, %c0_i32_0 : i32, i32
  }
  func.func @transform_3(%arg0: i32) -> (i32, i32, i32) {
    %c0_i32 = arith.constant 0 : i32
    %c0_i32_0 = arith.constant 0 : i32
    %c0_i32_1 = arith.constant 0 : i32
    return %arg0, %c0_i32, %c0_i32_0 : i32, i32, i32
  }
}

module attributes {stable_mosaic.version = 11 : i64} {
  func.func @_dws_block_kernel(%arg0: i32, %arg1: memref<1x14x112xf32, #tpu.memory_space<vmem>>, %arg2: memref<9x112xf32, #tpu.memory_space<vmem>>, %arg3: memref<1x112xf32, #tpu.memory_space<vmem>>, %arg4: memref<112x224xf32, #tpu.memory_space<vmem>>, %arg5: memref<1x224xf32, #tpu.memory_space<vmem>>, %arg6: memref<1x14x224xf32, #tpu.memory_space<vmem>>, %arg7: memref<16x128xf32, #tpu.memory_space<vmem>>) attributes {dimension_semantics = [#tpu.dimension_semantics<parallel>], iteration_bounds = array<i64: 2>, scalar_prefetch = 0 : i64, scratch_operands = 1 : i64, tpu.core_type = #tpu.core_type<tc>, window_params = [{transform_indices = @transform_0, window_bounds = array<i64: 1, 14, 112>}, {pipeline_mode = #tpu.pipeline_mode<synchronous>, transform_indices = @transform_1, window_bounds = array<i64: 9, 112>}, {pipeline_mode = #tpu.pipeline_mode<synchronous>, transform_indices = @transform_2, window_bounds = array<i64: 1, 112>}, {pipeline_mode = #tpu.pipeline_mode<synchronous>, transform_indices = @transform_3, window_bounds = array<i64: 112, 224>}, {pipeline_mode = #tpu.pipeline_mode<synchronous>, transform_indices = @transform_4, window_bounds = array<i64: 1, 224>}, {transform_indices = @transform_5, window_bounds = array<i64: 1, 14, 224>}]} {
    %cst = arith.constant 0.000000e+00 : f32
    %0 = vector.broadcast %cst : f32 to vector<16x128xf32>
    %c0 = arith.constant 0 : index
    %c0_0 = arith.constant 0 : index
    %1 = vector.load %arg7[%c0, %c0_0] : memref<16x128xf32, #tpu.memory_space<vmem>>, vector<16x128xf32>
    tpu.vector_store %arg7[%c0, %c0_0], %0 {strides = array<i32>} : memref<16x128xf32, #tpu.memory_space<vmem>>, vector<16x128xf32>,
    %c0_1 = arith.constant 0 : index
    %c0_2 = arith.constant 0 : index
    %c0_3 = arith.constant 0 : index
    %2 = vector.load %arg1[%c0_1, %c0_2, %c0_3] : memref<1x14x112xf32, #tpu.memory_space<vmem>>, vector<1x14x112xf32>
    %3 = vector.shape_cast %2 : vector<1x14x112xf32> to vector<14x112xf32>
    %c1 = arith.constant 1 : index
    %c8 = arith.constant 8 : index
    %4 = vector.load %arg7[%c1, %c8] : memref<16x128xf32, #tpu.memory_space<vmem>>, vector<14x112xf32>
    tpu.vector_store %arg7[%c1, %c8], %3 {strides = array<i32>} : memref<16x128xf32, #tpu.memory_space<vmem>>, vector<14x112xf32>,
    %c0_4 = arith.constant 0 : index
    %c0_5 = arith.constant 0 : index
    %5 = vector.load %arg7[%c0_4, %c0_5] : memref<16x128xf32, #tpu.memory_space<vmem>>, vector<16x128xf32>
    %cst_6 = arith.constant 0.000000e+00 : f32
    %6 = vector.broadcast %cst_6 : f32 to vector<14x112xf32>
    %7 = vector.extract_strided_slice %5 {offsets = [0, 0], sizes = [14, 112], strides = [1, 1]} : vector<16x128xf32> to vector<14x112xf32>
    %c0_7 = arith.constant 0 : index
    %c0_8 = arith.constant 0 : index
    %8 = vector.load %arg2[%c0_7, %c0_8] : memref<9x112xf32, #tpu.memory_space<vmem>>, vector<1x112xf32>
    %9 = vector.broadcast %8 : vector<1x112xf32> to vector<14x112xf32>
    %10 = arith.mulf %7, %9 : vector<14x112xf32>
    %11 = arith.addf %6, %10 : vector<14x112xf32>
    %12 = vector.extract_strided_slice %5 {offsets = [0, 8], sizes = [14, 112], strides = [1, 1]} : vector<16x128xf32> to vector<14x112xf32>
    %c1_9 = arith.constant 1 : index
    %c0_10 = arith.constant 0 : index
    %13 = vector.load %arg2[%c1_9, %c0_10] : memref<9x112xf32, #tpu.memory_space<vmem>>, vector<1x112xf32>
    %14 = vector.broadcast %13 : vector<1x112xf32> to vector<14x112xf32>
    %15 = arith.mulf %12, %14 : vector<14x112xf32>
    %16 = arith.addf %11, %15 : vector<14x112xf32>
    %17 = vector.extract_strided_slice %5 {offsets = [0, 16], sizes = [14, 112], strides = [1, 1]} : vector<16x128xf32> to vector<14x112xf32>
    %c2 = arith.constant 2 : index
    %c0_11 = arith.constant 0 : index
    %18 = vector.load %arg2[%c2, %c0_11] : memref<9x112xf32, #tpu.memory_space<vmem>>, vector<1x112xf32>
    %19 = vector.broadcast %18 : vector<1x112xf32> to vector<14x112xf32>
    %20 = arith.mulf %17, %19 : vector<14x112xf32>
    %21 = arith.addf %16, %20 : vector<14x112xf32>
    %22 = vector.extract_strided_slice %5 {offsets = [1, 0], sizes = [14, 112], strides = [1, 1]} : vector<16x128xf32> to vector<14x112xf32>
    %c3 = arith.constant 3 : index
    %c0_12 = arith.constant 0 : index
    %23 = vector.load %arg2[%c3, %c0_12] : memref<9x112xf32, #tpu.memory_space<vmem>>, vector<1x112xf32>
    %24 = vector.broadcast %23 : vector<1x112xf32> to vector<14x112xf32>
    %25 = arith.mulf %22, %24 : vector<14x112xf32>
    %26 = arith.addf %21, %25 : vector<14x112xf32>
    %27 = vector.extract_strided_slice %5 {offsets = [1, 8], sizes = [14, 112], strides = [1, 1]} : vector<16x128xf32> to vector<14x112xf32>
    %c4 = arith.constant 4 : index
    %c0_13 = arith.constant 0 : index
    %28 = vector.load %arg2[%c4, %c0_13] : memref<9x112xf32, #tpu.memory_space<vmem>>, vector<1x112xf32>
    %29 = vector.broadcast %28 : vector<1x112xf32> to vector<14x112xf32>
    %30 = arith.mulf %27, %29 : vector<14x112xf32>
    %31 = arith.addf %26, %30 : vector<14x112xf32>
    %32 = vector.extract_strided_slice %5 {offsets = [1, 16], sizes = [14, 112], strides = [1, 1]} : vector<16x128xf32> to vector<14x112xf32>
    %c5 = arith.constant 5 : index
    %c0_14 = arith.constant 0 : index
    %33 = vector.load %arg2[%c5, %c0_14] : memref<9x112xf32, #tpu.memory_space<vmem>>, vector<1x112xf32>
    %34 = vector.broadcast %33 : vector<1x112xf32> to vector<14x112xf32>
    %35 = arith.mulf %32, %34 : vector<14x112xf32>
    %36 = arith.addf %31, %35 : vector<14x112xf32>
    %37 = vector.extract_strided_slice %5 {offsets = [2, 0], sizes = [14, 112], strides = [1, 1]} : vector<16x128xf32> to vector<14x112xf32>
    %c6 = arith.constant 6 : index
    %c0_15 = arith.constant 0 : index
    %38 = vector.load %arg2[%c6, %c0_15] : memref<9x112xf32, #tpu.memory_space<vmem>>, vector<1x112xf32>
    %39 = vector.broadcast %38 : vector<1x112xf32> to vector<14x112xf32>
    %40 = arith.mulf %37, %39 : vector<14x112xf32>
    %41 = arith.addf %36, %40 : vector<14x112xf32>
    %42 = vector.extract_strided_slice %5 {offsets = [2, 8], sizes = [14, 112], strides = [1, 1]} : vector<16x128xf32> to vector<14x112xf32>
    %c7 = arith.constant 7 : index
    %c0_16 = arith.constant 0 : index
    %43 = vector.load %arg2[%c7, %c0_16] : memref<9x112xf32, #tpu.memory_space<vmem>>, vector<1x112xf32>
    %44 = vector.broadcast %43 : vector<1x112xf32> to vector<14x112xf32>
    %45 = arith.mulf %42, %44 : vector<14x112xf32>
    %46 = arith.addf %41, %45 : vector<14x112xf32>
    %47 = vector.extract_strided_slice %5 {offsets = [2, 16], sizes = [14, 112], strides = [1, 1]} : vector<16x128xf32> to vector<14x112xf32>
    %c8_17 = arith.constant 8 : index
    %c0_18 = arith.constant 0 : index
    %48 = vector.load %arg2[%c8_17, %c0_18] : memref<9x112xf32, #tpu.memory_space<vmem>>, vector<1x112xf32>
    %49 = vector.broadcast %48 : vector<1x112xf32> to vector<14x112xf32>
    %50 = arith.mulf %47, %49 : vector<14x112xf32>
    %51 = arith.addf %46, %50 : vector<14x112xf32>
    %c0_19 = arith.constant 0 : index
    %c0_20 = arith.constant 0 : index
    %52 = vector.load %arg3[%c0_19, %c0_20] : memref<1x112xf32, #tpu.memory_space<vmem>>, vector<1x112xf32>
    %53 = vector.broadcast %52 : vector<1x112xf32> to vector<14x112xf32>
    %54 = arith.addf %51, %53 : vector<14x112xf32>
    %cst_21 = arith.constant 0.000000e+00 : f32
    %55 = vector.broadcast %cst_21 : f32 to vector<14x112xf32>
    %56 = arith.maximumf %54, %55 : vector<14x112xf32>
    %c0_22 = arith.constant 0 : index
    %c0_23 = arith.constant 0 : index
    %57 = vector.load %arg4[%c0_22, %c0_23] : memref<112x224xf32, #tpu.memory_space<vmem>>, vector<112x224xf32>
    %cst_24 = arith.constant dense<0.000000e+00> : vector<14x224xf32>
    %58 = tpu.matmul %56, %57, %cst_24 {dimension_numbers = #tpu.dot_dimension_numbers<[1], [0], [0], [1], [0, 0, 1, 1], [], []>} : vector<14x112xf32>, vector<112x224xf32>, vector<14x224xf32> -> vector<14x224xf32>
    %c0_25 = arith.constant 0 : index
    %c0_26 = arith.constant 0 : index
    %59 = vector.load %arg5[%c0_25, %c0_26] : memref<1x224xf32, #tpu.memory_space<vmem>>, vector<1x224xf32>
    %60 = vector.broadcast %59 : vector<1x224xf32> to vector<14x224xf32>
    %61 = arith.addf %58, %60 : vector<14x224xf32>
    %cst_27 = arith.constant 0.000000e+00 : f32
    %62 = vector.broadcast %cst_27 : f32 to vector<14x224xf32>
    %63 = arith.maximumf %61, %62 : vector<14x224xf32>
    %c0_28 = arith.constant 0 : index
    %c0_29 = arith.constant 0 : index
    %c0_30 = arith.constant 0 : index
    %64 = vector.load %arg6[%c0_28, %c0_29, %c0_30] : memref<1x14x224xf32, #tpu.memory_space<vmem>>, vector<1x14x224xf32>
    %65 = vector.shape_cast %64 : vector<1x14x224xf32> to vector<14x224xf32>
    %66 = vector.shape_cast %63 : vector<14x224xf32> to vector<1x14x224xf32>
    tpu.vector_store %arg6[%c0_28, %c0_29, %c0_30], %66 {strides = array<i32>} : memref<1x14x224xf32, #tpu.memory_space<vmem>>, vector<1x14x224xf32>,
    return
  }
  func.func @transform_0(%arg0: i32) -> (i32, i32, i32) {
    %c0_i32 = arith.constant 0 : i32
    %c0_i32_0 = arith.constant 0 : i32
    %c0_i32_1 = arith.constant 0 : i32
    return %arg0, %c0_i32, %c0_i32_0 : i32, i32, i32
  }
  func.func @transform_1(%arg0: i32) -> (i32, i32) {
    %c0_i32 = arith.constant 0 : i32
    %c0_i32_0 = arith.constant 0 : i32
    %c0_i32_1 = arith.constant 0 : i32
    return %c0_i32, %c0_i32_0 : i32, i32
  }
  func.func @transform_2(%arg0: i32) -> (i32, i32) {
    %c0_i32 = arith.constant 0 : i32
    %c0_i32_0 = arith.constant 0 : i32
    %c0_i32_1 = arith.constant 0 : i32
    return %c0_i32, %c0_i32_0 : i32, i32
  }
  func.func @transform_3(%arg0: i32) -> (i32, i32) {
    %c0_i32 = arith.constant 0 : i32
    %c0_i32_0 = arith.constant 0 : i32
    %c0_i32_1 = arith.constant 0 : i32
    return %c0_i32, %c0_i32_0 : i32, i32
  }
  func.func @transform_4(%arg0: i32) -> (i32, i32) {
    %c0_i32 = arith.constant 0 : i32
    %c0_i32_0 = arith.constant 0 : i32
    %c0_i32_1 = arith.constant 0 : i32
    return %c0_i32, %c0_i32_0 : i32, i32
  }
  func.func @transform_5(%arg0: i32) -> (i32, i32, i32) {
    %c0_i32 = arith.constant 0 : i32
    %c0_i32_0 = arith.constant 0 : i32
    %c0_i32_1 = arith.constant 0 : i32
    return %arg0, %c0_i32, %c0_i32_0 : i32, i32, i32
  }
}

module attributes {stable_mosaic.version = 11 : i64} {
  func.func @_dws_block_kernel(%arg0: i32, %arg1: memref<1x14x224xf32, #tpu.memory_space<vmem>>, %arg2: memref<9x224xf32, #tpu.memory_space<vmem>>, %arg3: memref<1x224xf32, #tpu.memory_space<vmem>>, %arg4: memref<224x224xf32, #tpu.memory_space<vmem>>, %arg5: memref<1x224xf32, #tpu.memory_space<vmem>>, %arg6: memref<1x7x224xf32, #tpu.memory_space<vmem>>, %arg7: memref<16x256xf32, #tpu.memory_space<vmem>>) attributes {dimension_semantics = [#tpu.dimension_semantics<parallel>], iteration_bounds = array<i64: 2>, scalar_prefetch = 0 : i64, scratch_operands = 1 : i64, tpu.core_type = #tpu.core_type<tc>, window_params = [{transform_indices = @transform_0, window_bounds = array<i64: 1, 14, 224>}, {pipeline_mode = #tpu.pipeline_mode<synchronous>, transform_indices = @transform_1, window_bounds = array<i64: 9, 224>}, {pipeline_mode = #tpu.pipeline_mode<synchronous>, transform_indices = @transform_2, window_bounds = array<i64: 1, 224>}, {pipeline_mode = #tpu.pipeline_mode<synchronous>, transform_indices = @transform_3, window_bounds = array<i64: 224, 224>}, {pipeline_mode = #tpu.pipeline_mode<synchronous>, transform_indices = @transform_4, window_bounds = array<i64: 1, 224>}, {transform_indices = @transform_5, window_bounds = array<i64: 1, 7, 224>}]} {
    %cst = arith.constant 0.000000e+00 : f32
    %0 = vector.broadcast %cst : f32 to vector<16x256xf32>
    %c0 = arith.constant 0 : index
    %c0_0 = arith.constant 0 : index
    %1 = vector.load %arg7[%c0, %c0_0] : memref<16x256xf32, #tpu.memory_space<vmem>>, vector<16x256xf32>
    tpu.vector_store %arg7[%c0, %c0_0], %0 {strides = array<i32>} : memref<16x256xf32, #tpu.memory_space<vmem>>, vector<16x256xf32>,
    %c0_1 = arith.constant 0 : index
    %c0_2 = arith.constant 0 : index
    %c0_3 = arith.constant 0 : index
    %2 = vector.load %arg1[%c0_1, %c0_2, %c0_3] : memref<1x14x224xf32, #tpu.memory_space<vmem>>, vector<1x14x224xf32>
    %3 = vector.shape_cast %2 : vector<1x14x224xf32> to vector<14x224xf32>
    %c1 = arith.constant 1 : index
    %c16 = arith.constant 16 : index
    %4 = vector.load %arg7[%c1, %c16] : memref<16x256xf32, #tpu.memory_space<vmem>>, vector<14x224xf32>
    tpu.vector_store %arg7[%c1, %c16], %3 {strides = array<i32>} : memref<16x256xf32, #tpu.memory_space<vmem>>, vector<14x224xf32>,
    %c0_4 = arith.constant 0 : index
    %c0_5 = arith.constant 0 : index
    %5 = vector.load %arg7[%c0_4, %c0_5] : memref<16x256xf32, #tpu.memory_space<vmem>>, vector<16x256xf32>
    %cst_6 = arith.constant 0.000000e+00 : f32
    %6 = vector.broadcast %cst_6 : f32 to vector<14x224xf32>
    %7 = vector.extract_strided_slice %5 {offsets = [0, 0], sizes = [14, 224], strides = [1, 1]} : vector<16x256xf32> to vector<14x224xf32>
    %c0_7 = arith.constant 0 : index
    %c0_8 = arith.constant 0 : index
    %8 = vector.load %arg2[%c0_7, %c0_8] : memref<9x224xf32, #tpu.memory_space<vmem>>, vector<1x224xf32>
    %9 = vector.broadcast %8 : vector<1x224xf32> to vector<14x224xf32>
    %10 = arith.mulf %7, %9 : vector<14x224xf32>
    %11 = arith.addf %6, %10 : vector<14x224xf32>
    %12 = vector.extract_strided_slice %5 {offsets = [0, 16], sizes = [14, 224], strides = [1, 1]} : vector<16x256xf32> to vector<14x224xf32>
    %c1_9 = arith.constant 1 : index
    %c0_10 = arith.constant 0 : index
    %13 = vector.load %arg2[%c1_9, %c0_10] : memref<9x224xf32, #tpu.memory_space<vmem>>, vector<1x224xf32>
    %14 = vector.broadcast %13 : vector<1x224xf32> to vector<14x224xf32>
    %15 = arith.mulf %12, %14 : vector<14x224xf32>
    %16 = arith.addf %11, %15 : vector<14x224xf32>
    %17 = vector.extract_strided_slice %5 {offsets = [0, 32], sizes = [14, 224], strides = [1, 1]} : vector<16x256xf32> to vector<14x224xf32>
    %c2 = arith.constant 2 : index
    %c0_11 = arith.constant 0 : index
    %18 = vector.load %arg2[%c2, %c0_11] : memref<9x224xf32, #tpu.memory_space<vmem>>, vector<1x224xf32>
    %19 = vector.broadcast %18 : vector<1x224xf32> to vector<14x224xf32>
    %20 = arith.mulf %17, %19 : vector<14x224xf32>
    %21 = arith.addf %16, %20 : vector<14x224xf32>
    %22 = vector.extract_strided_slice %5 {offsets = [1, 0], sizes = [14, 224], strides = [1, 1]} : vector<16x256xf32> to vector<14x224xf32>
    %c3 = arith.constant 3 : index
    %c0_12 = arith.constant 0 : index
    %23 = vector.load %arg2[%c3, %c0_12] : memref<9x224xf32, #tpu.memory_space<vmem>>, vector<1x224xf32>
    %24 = vector.broadcast %23 : vector<1x224xf32> to vector<14x224xf32>
    %25 = arith.mulf %22, %24 : vector<14x224xf32>
    %26 = arith.addf %21, %25 : vector<14x224xf32>
    %27 = vector.extract_strided_slice %5 {offsets = [1, 16], sizes = [14, 224], strides = [1, 1]} : vector<16x256xf32> to vector<14x224xf32>
    %c4 = arith.constant 4 : index
    %c0_13 = arith.constant 0 : index
    %28 = vector.load %arg2[%c4, %c0_13] : memref<9x224xf32, #tpu.memory_space<vmem>>, vector<1x224xf32>
    %29 = vector.broadcast %28 : vector<1x224xf32> to vector<14x224xf32>
    %30 = arith.mulf %27, %29 : vector<14x224xf32>
    %31 = arith.addf %26, %30 : vector<14x224xf32>
    %32 = vector.extract_strided_slice %5 {offsets = [1, 32], sizes = [14, 224], strides = [1, 1]} : vector<16x256xf32> to vector<14x224xf32>
    %c5 = arith.constant 5 : index
    %c0_14 = arith.constant 0 : index
    %33 = vector.load %arg2[%c5, %c0_14] : memref<9x224xf32, #tpu.memory_space<vmem>>, vector<1x224xf32>
    %34 = vector.broadcast %33 : vector<1x224xf32> to vector<14x224xf32>
    %35 = arith.mulf %32, %34 : vector<14x224xf32>
    %36 = arith.addf %31, %35 : vector<14x224xf32>
    %37 = vector.extract_strided_slice %5 {offsets = [2, 0], sizes = [14, 224], strides = [1, 1]} : vector<16x256xf32> to vector<14x224xf32>
    %c6 = arith.constant 6 : index
    %c0_15 = arith.constant 0 : index
    %38 = vector.load %arg2[%c6, %c0_15] : memref<9x224xf32, #tpu.memory_space<vmem>>, vector<1x224xf32>
    %39 = vector.broadcast %38 : vector<1x224xf32> to vector<14x224xf32>
    %40 = arith.mulf %37, %39 : vector<14x224xf32>
    %41 = arith.addf %36, %40 : vector<14x224xf32>
    %42 = vector.extract_strided_slice %5 {offsets = [2, 16], sizes = [14, 224], strides = [1, 1]} : vector<16x256xf32> to vector<14x224xf32>
    %c7 = arith.constant 7 : index
    %c0_16 = arith.constant 0 : index
    %43 = vector.load %arg2[%c7, %c0_16] : memref<9x224xf32, #tpu.memory_space<vmem>>, vector<1x224xf32>
    %44 = vector.broadcast %43 : vector<1x224xf32> to vector<14x224xf32>
    %45 = arith.mulf %42, %44 : vector<14x224xf32>
    %46 = arith.addf %41, %45 : vector<14x224xf32>
    %47 = vector.extract_strided_slice %5 {offsets = [2, 32], sizes = [14, 224], strides = [1, 1]} : vector<16x256xf32> to vector<14x224xf32>
    %c8 = arith.constant 8 : index
    %c0_17 = arith.constant 0 : index
    %48 = vector.load %arg2[%c8, %c0_17] : memref<9x224xf32, #tpu.memory_space<vmem>>, vector<1x224xf32>
    %49 = vector.broadcast %48 : vector<1x224xf32> to vector<14x224xf32>
    %50 = arith.mulf %47, %49 : vector<14x224xf32>
    %51 = arith.addf %46, %50 : vector<14x224xf32>
    %c0_18 = arith.constant 0 : index
    %c0_19 = arith.constant 0 : index
    %52 = vector.load %arg3[%c0_18, %c0_19] : memref<1x224xf32, #tpu.memory_space<vmem>>, vector<1x224xf32>
    %53 = vector.broadcast %52 : vector<1x224xf32> to vector<14x224xf32>
    %54 = arith.addf %51, %53 : vector<14x224xf32>
    %cst_20 = arith.constant 0.000000e+00 : f32
    %55 = vector.broadcast %cst_20 : f32 to vector<14x224xf32>
    %56 = arith.maximumf %54, %55 : vector<14x224xf32>
    %57 = tpu.iota {dimensions = array<i32: 0>} : vector<7x14xi32>
    %58 = tpu.iota {dimensions = array<i32: 1>} : vector<7x14xi32>
    %c2_i32 = arith.constant 2 : i32
    %59 = vector.broadcast %c2_i32 : i32 to vector<7x14xi32>
    %60 = arith.muli %59, %57 : vector<7x14xi32>
    %61 = arith.cmpi eq, %58, %60 : vector<7x14xi32>
    %62 = arith.extui %61 : vector<7x14xi1> to vector<7x14xi32>
    %63 = arith.sitofp %62 : vector<7x14xi32> to vector<7x14xf32>
    %cst_21 = arith.constant dense<0.000000e+00> : vector<7x224xf32>
    %64 = tpu.matmul %63, %56, %cst_21 {dimension_numbers = #tpu.dot_dimension_numbers<[1], [0], [0], [1], [0, 0, 1, 1], [], []>} : vector<7x14xf32>, vector<14x224xf32>, vector<7x224xf32> -> vector<7x224xf32>
    %c0_22 = arith.constant 0 : index
    %c0_23 = arith.constant 0 : index
    %65 = vector.load %arg4[%c0_22, %c0_23] : memref<224x224xf32, #tpu.memory_space<vmem>>, vector<224x224xf32>
    %cst_24 = arith.constant dense<0.000000e+00> : vector<7x224xf32>
    %66 = tpu.matmul %64, %65, %cst_24 {dimension_numbers = #tpu.dot_dimension_numbers<[1], [0], [0], [1], [0, 0, 1, 1], [], []>} : vector<7x224xf32>, vector<224x224xf32>, vector<7x224xf32> -> vector<7x224xf32>
    %c0_25 = arith.constant 0 : index
    %c0_26 = arith.constant 0 : index
    %67 = vector.load %arg5[%c0_25, %c0_26] : memref<1x224xf32, #tpu.memory_space<vmem>>, vector<1x224xf32>
    %68 = vector.broadcast %67 : vector<1x224xf32> to vector<7x224xf32>
    %69 = arith.addf %66, %68 : vector<7x224xf32>
    %cst_27 = arith.constant 0.000000e+00 : f32
    %70 = vector.broadcast %cst_27 : f32 to vector<7x224xf32>
    %71 = arith.maximumf %69, %70 : vector<7x224xf32>
    %c0_28 = arith.constant 0 : index
    %c0_29 = arith.constant 0 : index
    %c0_30 = arith.constant 0 : index
    %72 = vector.load %arg6[%c0_28, %c0_29, %c0_30] : memref<1x7x224xf32, #tpu.memory_space<vmem>>, vector<1x7x224xf32>
    %73 = vector.shape_cast %72 : vector<1x7x224xf32> to vector<7x224xf32>
    %74 = vector.shape_cast %71 : vector<7x224xf32> to vector<1x7x224xf32>
    tpu.vector_store %arg6[%c0_28, %c0_29, %c0_30], %74 {strides = array<i32>} : memref<1x7x224xf32, #tpu.memory_space<vmem>>, vector<1x7x224xf32>,
    return
  }
  func.func @transform_0(%arg0: i32) -> (i32, i32, i32) {
    %c0_i32 = arith.constant 0 : i32
    %c0_i32_0 = arith.constant 0 : i32
    %c0_i32_1 = arith.constant 0 : i32
    return %arg0, %c0_i32, %c0_i32_0 : i32, i32, i32
  }
  func.func @transform_1(%arg0: i32) -> (i32, i32) {
    %c0_i32 = arith.constant 0 : i32
    %c0_i32_0 = arith.constant 0 : i32
    %c0_i32_1 = arith.constant 0 : i32
    return %c0_i32, %c0_i32_0 : i32, i32
  }
  func.func @transform_2(%arg0: i32) -> (i32, i32) {
    %c0_i32 = arith.constant 0 : i32
    %c0_i32_0 = arith.constant 0 : i32
    %c0_i32_1 = arith.constant 0 : i32
    return %c0_i32, %c0_i32_0 : i32, i32
  }
  func.func @transform_3(%arg0: i32) -> (i32, i32) {
    %c0_i32 = arith.constant 0 : i32
    %c0_i32_0 = arith.constant 0 : i32
    %c0_i32_1 = arith.constant 0 : i32
    return %c0_i32, %c0_i32_0 : i32, i32
  }
  func.func @transform_4(%arg0: i32) -> (i32, i32) {
    %c0_i32 = arith.constant 0 : i32
    %c0_i32_0 = arith.constant 0 : i32
    %c0_i32_1 = arith.constant 0 : i32
    return %c0_i32, %c0_i32_0 : i32, i32
  }
  func.func @transform_5(%arg0: i32) -> (i32, i32, i32) {
    %c0_i32 = arith.constant 0 : i32
    %c0_i32_0 = arith.constant 0 : i32
    %c0_i32_1 = arith.constant 0 : i32
    return %arg0, %c0_i32, %c0_i32_0 : i32, i32, i32
  }
}

module attributes {stable_mosaic.version = 11 : i64} {
  func.func @_dws_block_kernel(%arg0: i32, %arg1: memref<1x7x224xf32, #tpu.memory_space<vmem>>, %arg2: memref<9x224xf32, #tpu.memory_space<vmem>>, %arg3: memref<1x224xf32, #tpu.memory_space<vmem>>, %arg4: memref<224x224xf32, #tpu.memory_space<vmem>>, %arg5: memref<1x224xf32, #tpu.memory_space<vmem>>, %arg6: memref<1x7x224xf32, #tpu.memory_space<vmem>>, %arg7: memref<9x288xf32, #tpu.memory_space<vmem>>) attributes {dimension_semantics = [#tpu.dimension_semantics<parallel>], iteration_bounds = array<i64: 2>, scalar_prefetch = 0 : i64, scratch_operands = 1 : i64, tpu.core_type = #tpu.core_type<tc>, window_params = [{transform_indices = @transform_0, window_bounds = array<i64: 1, 7, 224>}, {pipeline_mode = #tpu.pipeline_mode<synchronous>, transform_indices = @transform_1, window_bounds = array<i64: 9, 224>}, {pipeline_mode = #tpu.pipeline_mode<synchronous>, transform_indices = @transform_2, window_bounds = array<i64: 1, 224>}, {pipeline_mode = #tpu.pipeline_mode<synchronous>, transform_indices = @transform_3, window_bounds = array<i64: 224, 224>}, {pipeline_mode = #tpu.pipeline_mode<synchronous>, transform_indices = @transform_4, window_bounds = array<i64: 1, 224>}, {transform_indices = @transform_5, window_bounds = array<i64: 1, 7, 224>}]} {
    %cst = arith.constant 0.000000e+00 : f32
    %0 = vector.broadcast %cst : f32 to vector<9x288xf32>
    %c0 = arith.constant 0 : index
    %c0_0 = arith.constant 0 : index
    %1 = vector.load %arg7[%c0, %c0_0] : memref<9x288xf32, #tpu.memory_space<vmem>>, vector<9x288xf32>
    tpu.vector_store %arg7[%c0, %c0_0], %0 {strides = array<i32>} : memref<9x288xf32, #tpu.memory_space<vmem>>, vector<9x288xf32>,
    %c0_1 = arith.constant 0 : index
    %c0_2 = arith.constant 0 : index
    %c0_3 = arith.constant 0 : index
    %2 = vector.load %arg1[%c0_1, %c0_2, %c0_3] : memref<1x7x224xf32, #tpu.memory_space<vmem>>, vector<1x7x224xf32>
    %3 = vector.shape_cast %2 : vector<1x7x224xf32> to vector<7x224xf32>
    %c1 = arith.constant 1 : index
    %c32 = arith.constant 32 : index
    %4 = vector.load %arg7[%c1, %c32] : memref<9x288xf32, #tpu.memory_space<vmem>>, vector<7x224xf32>
    tpu.vector_store %arg7[%c1, %c32], %3 {strides = array<i32>} : memref<9x288xf32, #tpu.memory_space<vmem>>, vector<7x224xf32>,
    %c0_4 = arith.constant 0 : index
    %c0_5 = arith.constant 0 : index
    %5 = vector.load %arg7[%c0_4, %c0_5] : memref<9x288xf32, #tpu.memory_space<vmem>>, vector<9x288xf32>
    %cst_6 = arith.constant 0.000000e+00 : f32
    %6 = vector.broadcast %cst_6 : f32 to vector<7x224xf32>
    %7 = vector.extract_strided_slice %5 {offsets = [0, 0], sizes = [7, 224], strides = [1, 1]} : vector<9x288xf32> to vector<7x224xf32>
    %c0_7 = arith.constant 0 : index
    %c0_8 = arith.constant 0 : index
    %8 = vector.load %arg2[%c0_7, %c0_8] : memref<9x224xf32, #tpu.memory_space<vmem>>, vector<1x224xf32>
    %9 = vector.broadcast %8 : vector<1x224xf32> to vector<7x224xf32>
    %10 = arith.mulf %7, %9 : vector<7x224xf32>
    %11 = arith.addf %6, %10 : vector<7x224xf32>
    %12 = vector.extract_strided_slice %5 {offsets = [0, 32], sizes = [7, 224], strides = [1, 1]} : vector<9x288xf32> to vector<7x224xf32>
    %c1_9 = arith.constant 1 : index
    %c0_10 = arith.constant 0 : index
    %13 = vector.load %arg2[%c1_9, %c0_10] : memref<9x224xf32, #tpu.memory_space<vmem>>, vector<1x224xf32>
    %14 = vector.broadcast %13 : vector<1x224xf32> to vector<7x224xf32>
    %15 = arith.mulf %12, %14 : vector<7x224xf32>
    %16 = arith.addf %11, %15 : vector<7x224xf32>
    %17 = vector.extract_strided_slice %5 {offsets = [0, 64], sizes = [7, 224], strides = [1, 1]} : vector<9x288xf32> to vector<7x224xf32>
    %c2 = arith.constant 2 : index
    %c0_11 = arith.constant 0 : index
    %18 = vector.load %arg2[%c2, %c0_11] : memref<9x224xf32, #tpu.memory_space<vmem>>, vector<1x224xf32>
    %19 = vector.broadcast %18 : vector<1x224xf32> to vector<7x224xf32>
    %20 = arith.mulf %17, %19 : vector<7x224xf32>
    %21 = arith.addf %16, %20 : vector<7x224xf32>
    %22 = vector.extract_strided_slice %5 {offsets = [1, 0], sizes = [7, 224], strides = [1, 1]} : vector<9x288xf32> to vector<7x224xf32>
    %c3 = arith.constant 3 : index
    %c0_12 = arith.constant 0 : index
    %23 = vector.load %arg2[%c3, %c0_12] : memref<9x224xf32, #tpu.memory_space<vmem>>, vector<1x224xf32>
    %24 = vector.broadcast %23 : vector<1x224xf32> to vector<7x224xf32>
    %25 = arith.mulf %22, %24 : vector<7x224xf32>
    %26 = arith.addf %21, %25 : vector<7x224xf32>
    %27 = vector.extract_strided_slice %5 {offsets = [1, 32], sizes = [7, 224], strides = [1, 1]} : vector<9x288xf32> to vector<7x224xf32>
    %c4 = arith.constant 4 : index
    %c0_13 = arith.constant 0 : index
    %28 = vector.load %arg2[%c4, %c0_13] : memref<9x224xf32, #tpu.memory_space<vmem>>, vector<1x224xf32>
    %29 = vector.broadcast %28 : vector<1x224xf32> to vector<7x224xf32>
    %30 = arith.mulf %27, %29 : vector<7x224xf32>
    %31 = arith.addf %26, %30 : vector<7x224xf32>
    %32 = vector.extract_strided_slice %5 {offsets = [1, 64], sizes = [7, 224], strides = [1, 1]} : vector<9x288xf32> to vector<7x224xf32>
    %c5 = arith.constant 5 : index
    %c0_14 = arith.constant 0 : index
    %33 = vector.load %arg2[%c5, %c0_14] : memref<9x224xf32, #tpu.memory_space<vmem>>, vector<1x224xf32>
    %34 = vector.broadcast %33 : vector<1x224xf32> to vector<7x224xf32>
    %35 = arith.mulf %32, %34 : vector<7x224xf32>
    %36 = arith.addf %31, %35 : vector<7x224xf32>
    %37 = vector.extract_strided_slice %5 {offsets = [2, 0], sizes = [7, 224], strides = [1, 1]} : vector<9x288xf32> to vector<7x224xf32>
    %c6 = arith.constant 6 : index
    %c0_15 = arith.constant 0 : index
    %38 = vector.load %arg2[%c6, %c0_15] : memref<9x224xf32, #tpu.memory_space<vmem>>, vector<1x224xf32>
    %39 = vector.broadcast %38 : vector<1x224xf32> to vector<7x224xf32>
    %40 = arith.mulf %37, %39 : vector<7x224xf32>
    %41 = arith.addf %36, %40 : vector<7x224xf32>
    %42 = vector.extract_strided_slice %5 {offsets = [2, 32], sizes = [7, 224], strides = [1, 1]} : vector<9x288xf32> to vector<7x224xf32>
    %c7 = arith.constant 7 : index
    %c0_16 = arith.constant 0 : index
    %43 = vector.load %arg2[%c7, %c0_16] : memref<9x224xf32, #tpu.memory_space<vmem>>, vector<1x224xf32>
    %44 = vector.broadcast %43 : vector<1x224xf32> to vector<7x224xf32>
    %45 = arith.mulf %42, %44 : vector<7x224xf32>
    %46 = arith.addf %41, %45 : vector<7x224xf32>
    %47 = vector.extract_strided_slice %5 {offsets = [2, 64], sizes = [7, 224], strides = [1, 1]} : vector<9x288xf32> to vector<7x224xf32>
    %c8 = arith.constant 8 : index
    %c0_17 = arith.constant 0 : index
    %48 = vector.load %arg2[%c8, %c0_17] : memref<9x224xf32, #tpu.memory_space<vmem>>, vector<1x224xf32>
    %49 = vector.broadcast %48 : vector<1x224xf32> to vector<7x224xf32>
    %50 = arith.mulf %47, %49 : vector<7x224xf32>
    %51 = arith.addf %46, %50 : vector<7x224xf32>
    %c0_18 = arith.constant 0 : index
    %c0_19 = arith.constant 0 : index
    %52 = vector.load %arg3[%c0_18, %c0_19] : memref<1x224xf32, #tpu.memory_space<vmem>>, vector<1x224xf32>
    %53 = vector.broadcast %52 : vector<1x224xf32> to vector<7x224xf32>
    %54 = arith.addf %51, %53 : vector<7x224xf32>
    %cst_20 = arith.constant 0.000000e+00 : f32
    %55 = vector.broadcast %cst_20 : f32 to vector<7x224xf32>
    %56 = arith.maximumf %54, %55 : vector<7x224xf32>
    %c0_21 = arith.constant 0 : index
    %c0_22 = arith.constant 0 : index
    %57 = vector.load %arg4[%c0_21, %c0_22] : memref<224x224xf32, #tpu.memory_space<vmem>>, vector<224x224xf32>
    %cst_23 = arith.constant dense<0.000000e+00> : vector<7x224xf32>
    %58 = tpu.matmul %56, %57, %cst_23 {dimension_numbers = #tpu.dot_dimension_numbers<[1], [0], [0], [1], [0, 0, 1, 1], [], []>} : vector<7x224xf32>, vector<224x224xf32>, vector<7x224xf32> -> vector<7x224xf32>
    %c0_24 = arith.constant 0 : index
    %c0_25 = arith.constant 0 : index
    %59 = vector.load %arg5[%c0_24, %c0_25] : memref<1x224xf32, #tpu.memory_space<vmem>>, vector<1x224xf32>
    %60 = vector.broadcast %59 : vector<1x224xf32> to vector<7x224xf32>
    %61 = arith.addf %58, %60 : vector<7x224xf32>
    %cst_26 = arith.constant 0.000000e+00 : f32
    %62 = vector.broadcast %cst_26 : f32 to vector<7x224xf32>
    %63 = arith.maximumf %61, %62 : vector<7x224xf32>
    %c0_27 = arith.constant 0 : index
    %c0_28 = arith.constant 0 : index
    %c0_29 = arith.constant 0 : index
    %64 = vector.load %arg6[%c0_27, %c0_28, %c0_29] : memref<1x7x224xf32, #tpu.memory_space<vmem>>, vector<1x7x224xf32>
    %65 = vector.shape_cast %64 : vector<1x7x224xf32> to vector<7x224xf32>
    %66 = vector.shape_cast %63 : vector<7x224xf32> to vector<1x7x224xf32>
    tpu.vector_store %arg6[%c0_27, %c0_28, %c0_29], %66 {strides = array<i32>} : memref<1x7x224xf32, #tpu.memory_space<vmem>>, vector<1x7x224xf32>,
    return
  }
  func.func @transform_0(%arg0: i32) -> (i32, i32, i32) {
    %c0_i32 = arith.constant 0 : i32
    %c0_i32_0 = arith.constant 0 : i32
    %c0_i32_1 = arith.constant 0 : i32
    return %arg0, %c0_i32, %c0_i32_0 : i32, i32, i32
  }
  func.func @transform_1(%arg0: i32) -> (i32, i32) {
    %c0_i32 = arith.constant 0 : i32
    %c0_i32_0 = arith.constant 0 : i32
    %c0_i32_1 = arith.constant 0 : i32
    return %c0_i32, %c0_i32_0 : i32, i32
  }
  func.func @transform_2(%arg0: i32) -> (i32, i32) {
    %c0_i32 = arith.constant 0 : i32
    %c0_i32_0 = arith.constant 0 : i32
    %c0_i32_1 = arith.constant 0 : i32
    return %c0_i32, %c0_i32_0 : i32, i32
  }
  func.func @transform_3(%arg0: i32) -> (i32, i32) {
    %c0_i32 = arith.constant 0 : i32
    %c0_i32_0 = arith.constant 0 : i32
    %c0_i32_1 = arith.constant 0 : i32
    return %c0_i32, %c0_i32_0 : i32, i32
  }
  func.func @transform_4(%arg0: i32) -> (i32, i32) {
    %c0_i32 = arith.constant 0 : i32
    %c0_i32_0 = arith.constant 0 : i32
    %c0_i32_1 = arith.constant 0 : i32
    return %c0_i32, %c0_i32_0 : i32, i32
  }
  func.func @transform_5(%arg0: i32) -> (i32, i32, i32) {
    %c0_i32 = arith.constant 0 : i32
    %c0_i32_0 = arith.constant 0 : i32
    %c0_i32_1 = arith.constant 0 : i32
    return %arg0, %c0_i32, %c0_i32_0 : i32, i32, i32
  }
}

module attributes {stable_mosaic.version = 11 : i64} {
  func.func @_head_kernel(%arg0: i32, %arg1: memref<1x7x224xf32, #tpu.memory_space<vmem>>, %arg2: memref<224x16xf32, #tpu.memory_space<vmem>>, %arg3: memref<1x16xf32, #tpu.memory_space<vmem>>, %arg4: memref<1x1x16xf32, #tpu.memory_space<vmem>>) attributes {dimension_semantics = [#tpu.dimension_semantics<parallel>], iteration_bounds = array<i64: 2>, scalar_prefetch = 0 : i64, scratch_operands = 0 : i64, tpu.core_type = #tpu.core_type<tc>, window_params = [{transform_indices = @transform_0, window_bounds = array<i64: 1, 7, 224>}, {pipeline_mode = #tpu.pipeline_mode<synchronous>, transform_indices = @transform_1, window_bounds = array<i64: 224, 16>}, {pipeline_mode = #tpu.pipeline_mode<synchronous>, transform_indices = @transform_2, window_bounds = array<i64: 1, 16>}, {transform_indices = @transform_3, window_bounds = array<i64: 1, 1, 16>}]} {
    %cst = arith.constant 1.000000e+00 : f32
    %0 = vector.broadcast %cst : f32 to vector<1x7xf32>
    %c0 = arith.constant 0 : index
    %c0_0 = arith.constant 0 : index
    %c0_1 = arith.constant 0 : index
    %1 = vector.load %arg1[%c0, %c0_0, %c0_1] : memref<1x7x224xf32, #tpu.memory_space<vmem>>, vector<1x7x224xf32>
    %2 = vector.shape_cast %1 : vector<1x7x224xf32> to vector<7x224xf32>
    %cst_2 = arith.constant dense<0.000000e+00> : vector<1x224xf32>
    %3 = tpu.matmul %0, %2, %cst_2 {dimension_numbers = #tpu.dot_dimension_numbers<[1], [0], [0], [1], [0, 0, 1, 1], [], []>} : vector<1x7xf32>, vector<7x224xf32>, vector<1x224xf32> -> vector<1x224xf32>
    %c0_3 = arith.constant 0 : index
    %c0_4 = arith.constant 0 : index
    %4 = vector.load %arg2[%c0_3, %c0_4] : memref<224x16xf32, #tpu.memory_space<vmem>>, vector<224x16xf32>
    %cst_5 = arith.constant dense<0.000000e+00> : vector<1x16xf32>
    %5 = tpu.matmul %3, %4, %cst_5 {dimension_numbers = #tpu.dot_dimension_numbers<[1], [0], [0], [1], [0, 0, 1, 1], [], []>} : vector<1x224xf32>, vector<224x16xf32>, vector<1x16xf32> -> vector<1x16xf32>
    %c0_6 = arith.constant 0 : index
    %c0_7 = arith.constant 0 : index
    %6 = vector.load %arg3[%c0_6, %c0_7] : memref<1x16xf32, #tpu.memory_space<vmem>>, vector<1x16xf32>
    %7 = arith.addf %5, %6 : vector<1x16xf32>
    %c0_8 = arith.constant 0 : index
    %c0_9 = arith.constant 0 : index
    %c0_10 = arith.constant 0 : index
    %8 = vector.load %arg4[%c0_8, %c0_9, %c0_10] : memref<1x1x16xf32, #tpu.memory_space<vmem>>, vector<1x1x16xf32>
    %9 = vector.shape_cast %8 : vector<1x1x16xf32> to vector<1x16xf32>
    %10 = vector.shape_cast %7 : vector<1x16xf32> to vector<1x1x16xf32>
    tpu.vector_store %arg4[%c0_8, %c0_9, %c0_10], %10 {strides = array<i32>} : memref<1x1x16xf32, #tpu.memory_space<vmem>>, vector<1x1x16xf32>,
    return
  }
  func.func @transform_0(%arg0: i32) -> (i32, i32, i32) {
    %c0_i32 = arith.constant 0 : i32
    %c0_i32_0 = arith.constant 0 : i32
    %c0_i32_1 = arith.constant 0 : i32
    return %arg0, %c0_i32, %c0_i32_0 : i32, i32, i32
  }
  func.func @transform_1(%arg0: i32) -> (i32, i32) {
    %c0_i32 = arith.constant 0 : i32
    %c0_i32_0 = arith.constant 0 : i32
    %c0_i32_1 = arith.constant 0 : i32
    return %c0_i32, %c0_i32_0 : i32, i32
  }
  func.func @transform_2(%arg0: i32) -> (i32, i32) {
    %c0_i32 = arith.constant 0 : i32
    %c0_i32_0 = arith.constant 0 : i32
    %c0_i32_1 = arith.constant 0 : i32
    return %c0_i32, %c0_i32_0 : i32, i32
  }
  func.func @transform_3(%arg0: i32) -> (i32, i32, i32) {
    %c0_i32 = arith.constant 0 : i32
    %c0_i32_0 = arith.constant 0 : i32
    %c0_i32_1 = arith.constant 0 : i32
    return %arg0, %c0_i32, %c0_i32_0 : i32, i32, i32
  }
}

</mosaic_0001>

<bundles_post_ra>
// kernel: tile.49
= control target key start
LH: loop header
LB: loop body
LE: loop exit
PB: predicated region body
PF: predicated region fallthrough
CT: control target
= control target key end

     0   :  { %s28_s0 = inlined_call_operand.vmem [shape: f32[8], index: 0, kind: input, shape index: {}]   ;;  %s29_s1 = inlined_call_operand.vmem [shape: f32[14,8], index: 1, kind: output, shape index: {}]  }
   0x1   :  { %v4_v0 = vld [vmem:[%s28_s0] ss:$0 sm:$0xff] }
   0x2   :  { %5 = vst [vmem:[%s29_s1] sm:$0xff] %v4_v0  ;;  %8 = vst [vmem:[%s29_s1 + $0x8] sm:$0xff] %v4_v0 }

// kernel: tile.50
= control target key start
LH: loop header
LB: loop body
LE: loop exit
PB: predicated region body
PF: predicated region fallthrough
CT: control target
= control target key end

     0   :  { %s115_s10 = smov 104   ;;  %s116_s11 = smov 88   ;;  %vm3_vm0 = vcmask 64512   ;;  %vm9_vm1 = vcmask 917312   ;;  %vm15_vm2 = vcmask 851712   ;;  %vm21_vm3 = vcmask 786112   ;;  %s183_s0 = inlined_call_operand.vmem [shape: f32[14,8], index: 0, kind: input, shape index: {}]   ;;  %s184_s1 = inlined_call_operand.vmem [shape: f32[1,112], index: 1, kind: output, shape index: {}]  }
   0x1   :  { %v89_v0 = vld [vmem:[%s183_s0 + $0xd] sm:$0x1]   ;;  %v91_v1 = vld [vmem:[%s183_s0 + $0xb] sm:$0x1]   ;;  %v90_v2 = vld [vmem:[%s183_s0 + $0xc] sm:$0x1]  }
   0x2   :  { %7 = vrot.lane.b32.xlu0 %v89_v0, %s115_s10  ;;  %19 = vrot.lane.b32.xlu1 %v91_v1, %s116_s11  ;;  %v92_v3 = vld [vmem:[%s183_s0 + $0xa] sm:$0x1]   ;;  %s117_s16 = smov 96   ;;  %s118_s17 = smov 80   ;;  %v93_v4 = vld [vmem:[%s183_s0 + $0x9] sm:$0x1]  }
   0x3   :  { %v94_v5 = vld [vmem:[%s183_s0 + $0x8] sm:$0x1]   ;;  %v2_v6 = vld [vmem:[%s183_s0] sm:$0x1]   ;;  %s119_s24 = smov 72   ;;  %s120_s25 = smov 64  }
   0x4   :  { %4 = vst.msk [vmem:[#allocation0] sm:$0x1] %vm3_vm0, %v2_v6   ;;  %v95_v7 = vld [vmem:[%s183_s0 + $0x7] sm:$0x1]   ;;  %v96_v8 = vld [vmem:[%s183_s0 + $0x6] sm:$0x1]  }
   0x5   :  { %s121_s30 = smov 56   ;;  %s122_s2 = smov 48   ;;  %v97_v9 = vld [vmem:[%s183_s0 + $0x5] sm:$0x1]   ;;  %v98_v10 = vld [vmem:[%s183_s0 + $0x4] sm:$0x1]  }
   0x6   :  { %13 = vrot.lane.b32.xlu0 %v90_v2, %s117_s16  ;;  %25 = vrot.lane.b32.xlu1 %v92_v3, %s118_s17  ;;  %s123_s7 = smov 40   ;;  %s124_s8 = smov 32   ;;  %v99_v11 = vld [vmem:[%s183_s0 + $0x3] sm:$0x1]   ;;  %v100_v12 = vld [vmem:[%s183_s0 + $0x2] sm:$0x1]  }
   0x7   :  { %s125_s13 = smov 24   ;;  %s126_s14 = smov 16   ;;  %v101_v13 = vld [vmem:[%s183_s0 + $0x1] sm:$0x1]   ;;  %vm27_vm4 = vcmask 720512   ;;  %vm33_vm5 = vcmask 654912  }
   0x8   :  { %s127_s0 = smov 8   ;;  %vm39_vm6 = vcmask 589312   ;;  %vm45_vm7 = vcmask 523712   ;;  %vm51_vm8 = vcmask 458112   ;;  %vm57_vm9 = vcmask 392512  }
   0x9   :  { %vm63_vm10 = vcmask 326912   ;;  %vm69_vm11 = vcmask 261312   ;;  %vm75_vm12 = vcmask 195712   ;;  %vm81_vm13 = vcmask 130112  }
   0xa   :  { %31 = vrot.lane.b32.xlu0 %v93_v4, %s119_s24  ;;  %37 = vrot.lane.b32.xlu1 %v94_v5, %s120_s25 }
   0xe   :  { %43 = vrot.lane.b32.xlu0 %v95_v7, %s121_s30  ;;  %49 = vrot.lane.b32.xlu1 %v96_v8, %s122_s2 }
  0x12   :  { %55 = vrot.lane.b32.xlu0 %v97_v9, %s123_s7  ;;  %61 = vrot.lane.b32.xlu1 %v98_v10, %s124_s8 }
  0x16   :  { %67 = vrot.lane.b32.xlu0 %v99_v11, %s125_s13  ;;  %73 = vrot.lane.b32.xlu1 %v100_v12, %s126_s14 }
  0x1a   :  { %79 = vrot.lane.b32.xlu0 %v101_v13, %s127_s0 }
  0x74   :  { %v8_v14 = vpop.permute.xlu0 %7   ;;  %v20_v15 = vpop.permute.xlu1 %19  }
  0x75   :  { %10 = vst.msk [vmem:[#allocation0] sm:$0x1] %vm9_vm1, %v8_v14  }
  0x78   :  { %v14_v16 = vpop.permute.xlu0 %13   ;;  %v26_v17 = vpop.permute.xlu1 %25  }
  0x79   :  { %16 = vst.msk [vmem:[#allocation0] sm:$0x1] %vm15_vm2, %v14_v16  }
  0x7a   :  { %22 = vst.msk [vmem:[#allocation0] sm:$0x1] %vm21_vm3, %v20_v15  }
  0x7b   :  { %28 = vst.msk [vmem:[#allocation0] sm:$0x1] %vm27_vm4, %v26_v17  }
  0x7c   :  { %v32_v18 = vpop.permute.xlu0 %31   ;;  %v38_v19 = vpop.permute.xlu1 %37  }
  0x7d   :  { %34 = vst.msk [vmem:[#allocation0] sm:$0x1] %vm33_vm5, %v32_v18  }
  0x7e   :  { %40 = vst.msk [vmem:[#allocation0] sm:$0x1] %vm39_vm6, %v38_v19  }
  0x80   :  { %v44_v20 = vpop.permute.xlu0 %43   ;;  %v50_v21 = vpop.permute.xlu1 %49  }
  0x81   :  { %46 = vst.msk [vmem:[#allocation0] sm:$0x1] %vm45_vm7, %v44_v20  }
  0x82   :  { %52 = vst.msk [vmem:[#allocation0] sm:$0x1] %vm51_vm8, %v50_v21  }
  0x84   :  { %v56_v22 = vpop.permute.xlu0 %55   ;;  %v62_v23 = vpop.permute.xlu1 %61  }
  0x85   :  { %58 = vst.msk [vmem:[#allocation0] sm:$0x1] %vm57_vm9, %v56_v22  }
  0x86   :  { %64 = vst.msk [vmem:[#allocation0] sm:$0x1] %vm63_vm10, %v62_v23  }
  0x88   :  { %v68_v24 = vpop.permute.xlu0 %67   ;;  %v74_v25 = vpop.permute.xlu1 %73  }
  0x89   :  { %70 = vst.msk [vmem:[#allocation0] sm:$0x1] %vm69_vm11, %v68_v24  }
  0x8a   :  { %76 = vst.msk [vmem:[#allocation0] sm:$0x1] %vm75_vm12, %v74_v25  }
  0x8c   :  { %v80_v26 = vpop.permute.xlu0 %79  }
  0x8d   :  { %82 = vst.msk [vmem:[#allocation0] sm:$0x1] %vm81_vm13, %v80_v26  }
  0x94   :  { %v86_v27 = vld [vmem:[#allocation0] sm:$0x1] }
  0x95   :  { %88 = vst [vmem:[%s184_s1] sm:$0x1] %v86_v27 }

// kernel: tile.55
= control target key start
LH: loop header
LB: loop body
LE: loop exit
PB: predicated region body
PF: predicated region fallthrough
CT: control target
= control target key end

     0   :  { %vm6_vm0 = vcmask 1043458   ;;  %s53_s10 = smov 3  ;;  %s56_s11 = smov 12  ;;  %vm10_vm1 = vcmask 1045508   ;;  %vm14_vm2 = vcmask 1047558   ;;  %vm16_vm3 = vcmask 64512   ;;  %s856_s0 = inlined_call_operand.vmem [shape: f32[9,14,8], index: 0, kind: input, shape index: {}]   ;;  %s857_s1 = inlined_call_operand.vmem [shape: f32[9,112], index: 1, kind: output, shape index: {}]  }
   0x1   :  { %v412_v0 = vld [vmem:[%s856_s0 + $0x8c] sm:$0x1]   ;;  %v406_v1 = vld [vmem:[%s856_s0 + $0x8d] sm:$0x1]   ;;  %s493_s12 = smov 96   ;;  %s494_s13 = smov 104  }
   0x2   :  { %76 = vrot.lane.b32.xlu1 %v412_v0, %s493_s12  ;;  %47 = vrot.lane.b32.xlu0 %v406_v1, %s494_s13  ;;  %v408_v2 = vld [vmem:[%s856_s0 + $0xc] ss:$16 sm:%s53_s10]   ;;  %s61_s16 = smov 48  ;;  %s66_s17 = smov 192  ;;  %vm43_vm4 = vcmask 917312   ;;  %vm72_vm5 = vcmask 851712  }
   0x3   :  { %v409_v3 = vld [vmem:[%s856_s0 + $0xc] ss:$16 sm:%s56_s11]   ;;  %s24_s22 = smov 3  ;;  %s27_s23 = smov 12  ;;  %v418_v15 = vld [vmem:[%s856_s0 + $0x8b] sm:$0x1]  }
   0x4   :  { %v410_v4 = vld [vmem:[%s856_s0 + $0xc] ss:$16 sm:%s61_s16]   ;;  %v59_v5 = vsel %vm6_vm0, %v409_v3, %v408_v2  ;;  %v402_v7 = vld [vmem:[%s856_s0 + $0xd] ss:$16 sm:%s24_s22]   ;;  %s32_s28 = smov 48  ;;  %s37_s29 = smov 192 }
   0x5   :  { %v411_v6 = vld [vmem:[%s856_s0 + $0xc] ss:$16 sm:%s66_s17]   ;;  %v64_v8 = vsel %vm10_vm1, %v410_v4, %v59_v5  ;;  %v403_v9 = vld [vmem:[%s856_s0 + $0xd] ss:$16 sm:%s27_s23]   ;;  %s82_s5 = smov 3  ;;  %s85_s8 = smov 12 }
   0x6   :  { %v404_v10 = vld [vmem:[%s856_s0 + $0xd] ss:$16 sm:%s32_s28]   ;;  %v69_v11 = vsel %vm14_vm2, %v411_v6, %v64_v8  ;;  %v30_v12 = vsel %vm6_vm0, %v403_v9, %v402_v7  ;;  %s90_s9 = smov 48  ;;  %v414_v16 = vld [vmem:[%s856_s0 + $0xb] ss:$16 sm:%s82_s5]   ;;  %s95_s15 = smov 192 }
   0x7   :  { %v405_v13 = vld [vmem:[%s856_s0 + $0xd] ss:$16 sm:%s37_s29]   ;;  %70 = vrot.lane.b32.xlu1 %v69_v11, %s493_s12  ;;  %v35_v14 = vsel %vm10_vm1, %v404_v10, %v30_v12  ;;  %s111_s20 = smov 3  ;;  %s114_s21 = smov 12  ;;  %v424_v26 = vld [vmem:[%s856_s0 + $0x8a] sm:$0x1]  }
   0x8   :  { %v40_v17 = vsel %vm14_vm2, %v405_v13, %v35_v14  ;;  %v415_v18 = vld [vmem:[%s856_s0 + $0xb] ss:$16 sm:%s85_s8]   ;;  %s119_s23 = smov 48  ;;  %s124_s24 = smov 192  ;;  %v420_v23 = vld [vmem:[%s856_s0 + $0xa] ss:$16 sm:%s111_s20]  }
   0x9   :  { %v416_v19 = vld [vmem:[%s856_s0 + $0xb] ss:$16 sm:%s90_s9]   ;;  %41 = vrot.lane.b32.xlu0 %v40_v17, %s494_s13  ;;  %v88_v20 = vsel %vm6_vm0, %v415_v18, %v414_v16  ;;  %s140_s29 = smov 3  ;;  %s495_s30 = smov 88   ;;  %v430_v37 = vld [vmem:[%s856_s0 + $0x89] sm:$0x1]  }
   0xa   :  { %v417_v21 = vld [vmem:[%s856_s0 + $0xb] ss:$16 sm:%s95_s15]   ;;  %v93_v22 = vsel %vm10_vm1, %v416_v19, %v88_v20  ;;  %v421_v24 = vld [vmem:[%s856_s0 + $0xa] ss:$16 sm:%s114_s21]   ;;  %s143_s6 = smov 12  ;;  %s148_s7 = smov 48 }
   0xb   :  { %105 = vrot.lane.b32.xlu1 %v418_v15, %s495_s30  ;;  %v98_v25 = vsel %vm14_vm2, %v417_v21, %v93_v22  ;;  %v117_v27 = vsel %vm6_vm0, %v421_v24, %v420_v23  ;;  %v422_v28 = vld [vmem:[%s856_s0 + $0xa] ss:$16 sm:%s119_s23]   ;;  %s153_s12 = smov 192  ;;  %s169_s16 = smov 3  ;;  %v436_v46 = vld [vmem:[%s856_s0 + $0x88] sm:$0x1]  }
   0xc   :  { %v122_v29 = vsel %vm10_vm1, %v422_v28, %v117_v27  ;;  %v423_v30 = vld [vmem:[%s856_s0 + $0xa] ss:$16 sm:%s124_s24]   ;;  %v426_v31 = vld [vmem:[%s856_s0 + $0x9] ss:$16 sm:%s140_s29]   ;;  %s172_s17 = smov 12  ;;  %s177_s13 = smov 48 }
   0xd   :  { %99 = vrot.lane.b32.xlu0 %v98_v25, %s495_s30  ;;  %v427_v32 = vld [vmem:[%s856_s0 + $0x9] ss:$16 sm:%s143_s6]   ;;  %v127_v33 = vsel %vm14_vm2, %v423_v30, %v122_v29  ;;  %s496_s22 = smov 80   ;;  %s198_s27 = smov 3  ;;  %v442_v54 = vld [vmem:[%s856_s0 + $0x87] sm:$0x1]  }
   0xe   :  { %v146_v34 = vsel %vm6_vm0, %v427_v32, %v426_v31  ;;  %v428_v35 = vld [vmem:[%s856_s0 + $0x9] ss:$16 sm:%s148_s7]   ;;  %v432_v39 = vld [vmem:[%s856_s0 + $0x8] ss:$16 sm:%s169_s16]   ;;  %s182_s3 = smov 192  ;;  %s201_s4 = smov 12 }
   0xf   :  { %v429_v36 = vld [vmem:[%s856_s0 + $0x9] ss:$16 sm:%s153_s12]   ;;  %134 = vrot.lane.b32.xlu1 %v424_v26, %s496_s22  ;;  %v151_v38 = vsel %vm10_vm1, %v428_v35, %v146_v34  ;;  %s206_s5 = smov 48  ;;  %s227_s10 = smov 3  ;;  %v448_v62 = vld [vmem:[%s856_s0 + $0x86] sm:$0x1]  }
  0x10   :  { %v433_v40 = vld [vmem:[%s856_s0 + $0x8] ss:$16 sm:%s172_s17]   ;;  %v156_v43 = vsel %vm14_vm2, %v429_v36, %v151_v38  ;;  %v438_v44 = vld [vmem:[%s856_s0 + $0x7] ss:$16 sm:%s198_s27]   ;;  %s230_s11 = smov 12  ;;  %s497_s12 = smov 72  }
  0x11   :  { %v434_v41 = vld [vmem:[%s856_s0 + $0x8] ss:$16 sm:%s177_s13]   ;;  %128 = vrot.lane.b32.xlu0 %v127_v33, %s496_s22  ;;  %v175_v42 = vsel %vm6_vm0, %v433_v40, %v432_v39  ;;  %s211_s20 = smov 192  ;;  %s235_s24 = smov 48  ;;  %v400_v1 = vld [vmem:[%s856_s0 + $0x80] sm:$0x1]  }
  0x12   :  { %v439_v45 = vld [vmem:[%s856_s0 + $0x7] ss:$16 sm:%s201_s4]   ;;  %v180_v47 = vsel %vm10_vm1, %v434_v41, %v175_v42  ;;  %v435_v48 = vld [vmem:[%s856_s0 + $0x8] ss:$16 sm:%s182_s3]   ;;  %s256_s25 = smov 3  ;;  %s259_s26 = smov 12 }
  0x13   :  { %163 = vrot.lane.b32.xlu1 %v430_v37, %s497_s12  ;;  %v204_v49 = vsel %vm6_vm0, %v439_v45, %v438_v44  ;;  %v440_v50 = vld [vmem:[%s856_s0 + $0x7] ss:$16 sm:%s206_s5]   ;;  %v185_v53 = vsel %vm14_vm2, %v435_v48, %v180_v47  ;;  %s498_s27 = smov 64   ;;  %s240_s5 = smov 192  ;;  %401 = vst.msk [vmem:[%s857_s1 + $0x8] sm:$0x1] %vm16_vm3, %v400_v1  }
  0x14   :  { %v444_v51 = vld [vmem:[%s856_s0 + $0x6] ss:$16 sm:%s227_s10]   ;;  %v209_v55 = vsel %vm10_vm1, %v440_v50, %v204_v49  ;;  %v441_v56 = vld [vmem:[%s856_s0 + $0x7] ss:$16 sm:%s211_s20]   ;;  %s264_s10 = smov 48  ;;  %s288_s15 = smov 12 }
  0x15   :  { %157 = vrot.lane.b32.xlu0 %v156_v43, %s497_s12  ;;  %v445_v52 = vld [vmem:[%s856_s0 + $0x6] ss:$16 sm:%s230_s11]   ;;  %s285_s11 = smov 3  ;;  %v214_v61 = vsel %vm14_vm2, %v441_v56, %v209_v55  ;;  %s499_s16 = smov 56   ;;  %v454_v7 = vld [vmem:[%s856_s0 + $0x85] sm:$0x1]  }
  0x16   :  { %v233_v57 = vsel %vm6_vm0, %v445_v52, %v444_v51  ;;  %v446_v58 = vld [vmem:[%s856_s0 + $0x6] ss:$16 sm:%s235_s24]   ;;  %v450_v59 = vld [vmem:[%s856_s0 + $0x5] ss:$16 sm:%s256_s25]   ;;  %s269_s22 = smov 192  ;;  %s293_s29 = smov 48 }
  0x17   :  { %192 = vrot.lane.b32.xlu1 %v436_v46, %s498_s27  ;;  %v451_v60 = vld [vmem:[%s856_s0 + $0x5] ss:$16 sm:%s259_s26]   ;;  %v238_v63 = vsel %vm10_vm1, %v446_v58, %v233_v57  ;;  %s314_s30 = smov 3  ;;  %s317_s2 = smov 12  ;;  %v460_v17 = vld [vmem:[%s856_s0 + $0x84] sm:$0x1]  }
  0x18   :  { %v447_v0 = vld [vmem:[%s856_s0 + $0x6] ss:$16 sm:%s240_s5]   ;;  %v262_v2 = vsel %vm6_vm0, %v451_v60, %v450_v59  ;;  %v452_v3 = vld [vmem:[%s856_s0 + $0x5] ss:$16 sm:%s264_s10]   ;;  %s500_s3 = smov 48   ;;  %s298_s8 = smov 192 }
  0x19   :  { %186 = vrot.lane.b32.xlu0 %v185_v53, %s498_s27  ;;  %v456_v4 = vld [vmem:[%s856_s0 + $0x4] ss:$16 sm:%s285_s11]   ;;  %v243_v6 = vsel %vm14_vm2, %v447_v0, %v238_v63  ;;  %v267_v8 = vsel %vm10_vm1, %v452_v3, %v262_v2  ;;  %s322_s9 = smov 48  ;;  %s346_s18 = smov 12  ;;  %v466_v28 = vld [vmem:[%s856_s0 + $0x83] sm:$0x1]  }
  0x1a   :  { %v457_v5 = vld [vmem:[%s856_s0 + $0x4] ss:$16 sm:%s288_s15]   ;;  %v453_v9 = vld [vmem:[%s856_s0 + $0x5] ss:$16 sm:%s269_s22]   ;;  %s343_s15 = smov 3  ;;  %s2_s19 = smov 3 }
  0x1b   :  { %221 = vrot.lane.b32.xlu1 %v442_v54, %s499_s16  ;;  %v291_v10 = vsel %vm6_vm0, %v457_v5, %v456_v4  ;;  %v458_v11 = vld [vmem:[%s856_s0 + $0x4] ss:$16 sm:%s293_s29]   ;;  %v272_v14 = vsel %vm14_vm2, %v453_v9, %v267_v8  ;;  %s4_s23 = smov 12  ;;  %s501_s24 = smov 40   ;;  %v472_v40 = vld [vmem:[%s856_s0 + $0x82] sm:$0x1]  }
  0x1c   :  { %v462_v12 = vld [vmem:[%s856_s0 + $0x3] ss:$16 sm:%s314_s30]   ;;  %v459_v15 = vld [vmem:[%s856_s0 + $0x4] ss:$16 sm:%s298_s8]   ;;  %v296_v18 = vsel %vm10_vm1, %v458_v11, %v291_v10  ;;  %s8_s29 = smov 48  ;;  %s12_s30 = smov 192 }
  0x1d   :  { %215 = vrot.lane.b32.xlu0 %v214_v61, %s499_s16  ;;  %v463_v13 = vld [vmem:[%s856_s0 + $0x3] ss:$16 sm:%s317_s2]   ;;  %s327_s2 = smov 192  ;;  %s351_s7 = smov 48  ;;  %v301_v24 = vsel %vm14_vm2, %v459_v15, %v296_v18  ;;  %v478_v46 = vld [vmem:[%s856_s0 + $0x81] sm:$0x1]  }
  0x1e   :  { %v464_v16 = vld [vmem:[%s856_s0 + $0x3] ss:$16 sm:%s322_s9]   ;;  %v468_v19 = vld [vmem:[%s856_s0 + $0x2] ss:$16 sm:%s343_s15]   ;;  %v320_v20 = vsel %vm6_vm0, %v463_v13, %v462_v12  ;;  %s372_s8 = smov 3  ;;  %s375_s11 = smov 12 }
  0x1f   :  { %250 = vrot.lane.b32.xlu1 %v448_v62, %s500_s3  ;;  %v469_v21 = vld [vmem:[%s856_s0 + $0x2] ss:$16 sm:%s346_s18]   ;;  %s502_s17 = smov 32   ;;  %v325_v29 = vsel %vm10_vm1, %v464_v16, %v320_v20  ;;  %s380_s28 = smov 48  ;;  %vm101_vm6 = vcmask 786112   ;;  %vm130_vm7 = vcmask 720512  }
  0x20   :  { %v3_v22 = vld [vmem:[%s856_s0] ss:$16 sm:%s2_s19]   ;;  %v465_v30 = vld [vmem:[%s856_s0 + $0x3] ss:$16 sm:%s327_s2]   ;;  %v349_v32 = vsel %vm6_vm0, %v469_v21, %v468_v19  ;;  %s503_s2 = smov 24   ;;  %s385_s9 = smov 192 }
  0x21   :  { %244 = vrot.lane.b32.xlu0 %v243_v6, %s500_s3  ;;  %v5_v23 = vld [vmem:[%s856_s0] ss:$16 sm:%s4_s23]   ;;  %s356_s23 = smov 192  ;;  %v330_v37 = vsel %vm14_vm2, %v465_v30, %v325_v29  ;;  %s504_s10 = smov 16   ;;  %vm159_vm8 = vcmask 654912   ;;  %vm188_vm9 = vcmask 589312  }
  0x22   :  { %v7_v25 = vsel %vm6_vm0, %v5_v23, %v3_v22  ;;  %v9_v26 = vld [vmem:[%s856_s0] ss:$16 sm:%s8_s29]   ;;  %v470_v33 = vld [vmem:[%s856_s0 + $0x2] ss:$16 sm:%s351_s7]   ;;  %vm217_vm10 = vcmask 523712   ;;  %vm246_vm11 = vcmask 458112  }
  0x23   :  { %279 = vrot.lane.b32.xlu1 %v454_v7, %s501_s24  ;;  %v13_v27 = vld [vmem:[%s856_s0] ss:$16 sm:%s12_s30]   ;;  %v11_v31 = vsel %vm10_vm1, %v9_v26, %v7_v25  ;;  %v354_v38 = vsel %vm10_vm1, %v470_v33, %v349_v32  ;;  %vm275_vm12 = vcmask 392512   ;;  %vm304_vm13 = vcmask 326912  }
  0x24   :  { %v474_v34 = vld [vmem:[%s856_s0 + $0x1] ss:$16 sm:%s372_s8]   ;;  %v15_v35 = vsel %vm14_vm2, %v13_v27, %v11_v31  ;;  %v471_v39 = vld [vmem:[%s856_s0 + $0x2] ss:$16 sm:%s356_s23]   ;;  %vm333_vm14 = vcmask 261312   ;;  %vm362_vm15 = vcmask 195712  }
  0x25   :  { %273 = vrot.lane.b32.xlu0 %v272_v14, %s501_s24  ;;  %v475_v36 = vld [vmem:[%s856_s0 + $0x1] ss:$16 sm:%s375_s11]   ;;  %17 = vst.msk [vmem:[%s857_s1] sm:$0xff] %vm16_vm3, %v15_v35   ;;  %v359_v43 = vsel %vm14_vm2, %v471_v39, %v354_v38 }
  0x26   :  { %v378_v41 = vsel %vm6_vm0, %v475_v36, %v474_v34  ;;  %v476_v42 = vld [vmem:[%s856_s0 + $0x1] ss:$16 sm:%s380_s28]   ;;  %vm391_vm0 = vcmask 130112  }
  0x27   :  { %308 = vrot.lane.b32.xlu1 %v460_v17, %s502_s17  ;;  %v383_v44 = vsel %vm10_vm1, %v476_v42, %v378_v41  ;;  %v477_v45 = vld [vmem:[%s856_s0 + $0x1] ss:$16 sm:%s385_s9]   ;;  %s505_s0 = smov 8  }
  0x28   :  { %v388_v47 = vsel %vm14_vm2, %v477_v45, %v383_v44 }
  0x29   :  { %302 = vrot.lane.b32.xlu0 %v301_v24, %s502_s17 }
  0x2b   :  { %337 = vrot.lane.b32.xlu1 %v466_v28, %s503_s2 }
  0x2d   :  { %331 = vrot.lane.b32.xlu0 %v330_v37, %s503_s2 }
  0x2f   :  { %366 = vrot.lane.b32.xlu1 %v472_v40, %s504_s10 }
  0x31   :  { %360 = vrot.lane.b32.xlu0 %v359_v43, %s504_s10 }
  0x33   :  { %395 = vrot.lane.b32.xlu1 %v478_v46, %s505_s0 }
  0x35   :  { %389 = vrot.lane.b32.xlu0 %v388_v47, %s505_s0 }
  0x74   :  { %v77_v48 = vpop.permute.xlu1 %76   ;;  %v48_v49 = vpop.permute.xlu0 %47  }
  0x75   :  { %407 = vst.msk [vmem:[%s857_s1 + $0x8] sm:$0x1] %vm43_vm4, %v48_v49  }
  0x76   :  { %413 = vst.msk [vmem:[%s857_s1 + $0x8] sm:$0x1] %vm72_vm5, %v77_v48  }
  0x79   :  { %v71_v50 = vpop.permute.xlu1 %70  }
  0x7b   :  { %v42_v51 = vpop.permute.xlu0 %41  }
  0x7c   :  { %44 = vst.msk [vmem:[%s857_s1] sm:$0xff] %vm43_vm4, %v42_v51  }
  0x7d   :  { %73 = vst.msk [vmem:[%s857_s1] sm:$0xff] %vm72_vm5, %v71_v50   ;;  %v106_v52 = vpop.permute.xlu1 %105  }
  0x7e   :  { %419 = vst.msk [vmem:[%s857_s1 + $0x8] sm:$0x1] %vm101_vm6, %v106_v52  }
  0x7f   :  { %v100_v53 = vpop.permute.xlu0 %99  }
  0x80   :  { %102 = vst.msk [vmem:[%s857_s1] sm:$0xff] %vm101_vm6, %v100_v53  }
  0x81   :  { %v135_v54 = vpop.permute.xlu1 %134  }
  0x82   :  { %425 = vst.msk [vmem:[%s857_s1 + $0x8] sm:$0x1] %vm130_vm7, %v135_v54  }
  0x83   :  { %v129_v55 = vpop.permute.xlu0 %128  }
  0x84   :  { %131 = vst.msk [vmem:[%s857_s1] sm:$0xff] %vm130_vm7, %v129_v55  }
  0x85   :  { %v164_v56 = vpop.permute.xlu1 %163  }
  0x86   :  { %431 = vst.msk [vmem:[%s857_s1 + $0x8] sm:$0x1] %vm159_vm8, %v164_v56  }
  0x87   :  { %v158_v57 = vpop.permute.xlu0 %157  }
  0x88   :  { %160 = vst.msk [vmem:[%s857_s1] sm:$0xff] %vm159_vm8, %v158_v57  }
  0x89   :  { %v193_v58 = vpop.permute.xlu1 %192  }
  0x8a   :  { %437 = vst.msk [vmem:[%s857_s1 + $0x8] sm:$0x1] %vm188_vm9, %v193_v58  }
  0x8b   :  { %v187_v59 = vpop.permute.xlu0 %186  }
  0x8c   :  { %189 = vst.msk [vmem:[%s857_s1] sm:$0xff] %vm188_vm9, %v187_v59  }
  0x8d   :  { %v222_v60 = vpop.permute.xlu1 %221  }
  0x8e   :  { %443 = vst.msk [vmem:[%s857_s1 + $0x8] sm:$0x1] %vm217_vm10, %v222_v60  }
  0x8f   :  { %v216_v61 = vpop.permute.xlu0 %215  }
  0x90   :  { %218 = vst.msk [vmem:[%s857_s1] sm:$0xff] %vm217_vm10, %v216_v61  }
  0x91   :  { %v251_v62 = vpop.permute.xlu1 %250  }
  0x92   :  { %449 = vst.msk [vmem:[%s857_s1 + $0x8] sm:$0x1] %vm246_vm11, %v251_v62  }
  0x93   :  { %v245_v63 = vpop.permute.xlu0 %244  }
  0x94   :  { %247 = vst.msk [vmem:[%s857_s1] sm:$0xff] %vm246_vm11, %v245_v63  }
  0x95   :  { %v280_v0 = vpop.permute.xlu1 %279  }
  0x96   :  { %455 = vst.msk [vmem:[%s857_s1 + $0x8] sm:$0x1] %vm275_vm12, %v280_v0  }
  0x97   :  { %v274_v1 = vpop.permute.xlu0 %273  }
  0x98   :  { %276 = vst.msk [vmem:[%s857_s1] sm:$0xff] %vm275_vm12, %v274_v1  }
  0x99   :  { %v309_v2 = vpop.permute.xlu1 %308  }
  0x9a   :  { %461 = vst.msk [vmem:[%s857_s1 + $0x8] sm:$0x1] %vm304_vm13, %v309_v2  }
  0x9b   :  { %v303_v3 = vpop.permute.xlu0 %302  }
  0x9c   :  { %305 = vst.msk [vmem:[%s857_s1] sm:$0xff] %vm304_vm13, %v303_v3  }
  0x9d   :  { %v338_v4 = vpop.permute.xlu1 %337  }
  0x9e   :  { %467 = vst.msk [vmem:[%s857_s1 + $0x8] sm:$0x1] %vm333_vm14, %v338_v4  }
  0x9f   :  { %v332_v5 = vpop.permute.xlu0 %331  }
  0xa0   :  { %334 = vst.msk [vmem:[%s857_s1] sm:$0xff] %vm333_vm14, %v332_v5  }
  0xa1   :  { %v367_v6 = vpop.permute.xlu1 %366  }
  0xa2   :  { %473 = vst.msk [vmem:[%s857_s1 + $0x8] sm:$0x1] %vm362_vm15, %v367_v6  }
  0xa3   :  { %v361_v7 = vpop.permute.xlu0 %360  }
  0xa4   :  { %363 = vst.msk [vmem:[%s857_s1] sm:$0xff] %vm362_vm15, %v361_v7  }
  0xa5   :  { %v396_v8 = vpop.permute.xlu1 %395  }
  0xa6   :  { %479 = vst.msk [vmem:[%s857_s1 + $0x8] sm:$0x1] %vm391_vm0, %v396_v8  }
  0xa7   :  { %v390_v9 = vpop.permute.xlu0 %389  }
  0xa8   :  { %392 = vst.msk [vmem:[%s857_s1] sm:$0xff] %vm391_vm0, %v390_v9  }

// kernel: tile.62
= control target key start
LH: loop header
LB: loop body
LE: loop exit
PB: predicated region body
PF: predicated region fallthrough
CT: control target
= control target key end

     0   :  { %s28_s0 = inlined_call_operand.vmem [shape: f32[16], index: 0, kind: input, shape index: {}]   ;;  %s29_s1 = inlined_call_operand.vmem [shape: f32[14,16], index: 1, kind: output, shape index: {}]  }
   0x1   :  { %v4_v0 = vld [vmem:[%s28_s0] ss:$0 sm:$0xff] }
   0x2   :  { %5 = vst [vmem:[%s29_s1] sm:$0xff] %v4_v0  ;;  %8 = vst [vmem:[%s29_s1 + $0x8] sm:$0xff] %v4_v0 }

// kernel: tile.63
= control target key start
LH: loop header
LB: loop body
LE: loop exit
PB: predicated region body
PF: predicated region fallthrough
CT: control target
= control target key end

     0   :  { %s19_s8 = smov 3  ;;  %s79_s9 = smov 112   ;;  %vm4_vm0 = vcmask 130048   ;;  %vm10_vm1 = vcmask 1048448   ;;  %vm16_vm2 = vcmask 917248   ;;  %vm23_vm3 = vcmask 786048   ;;  %s126_s0 = inlined_call_operand.vmem [shape: f32[14,16], index: 0, kind: input, shape index: {}]   ;;  %s127_s1 = inlined_call_operand.vmem [shape: f32[1,224], index: 1, kind: output, shape index: {}]  }
   0x1   :  { %v64_v0 = vld [vmem:[%s126_s0 + $0x7] sm:$0x1]   ;;  %v66_v1 = vld [vmem:[%s126_s0 + $0x5] ss:$8 sm:%s19_s8]   ;;  %s80_s12 = smov 80   ;;  %s26_s15 = smov 3 }
   0x2   :  { %8 = vrot.lane.b32.xlu0 %v64_v0, %s79_s9  ;;  %21 = vrot.lane.b32.xlu1 %v66_v1, %s80_s12  ;;  %v65_v2 = vld [vmem:[%s126_s0 + $0x6] sm:$0x1]   ;;  %s33_s18 = smov 3  ;;  %s40_s19 = smov 3  ;;  %vm30_vm4 = vcmask 654848   ;;  %vm37_vm5 = vcmask 523648  }
   0x3   :  { %v67_v3 = vld [vmem:[%s126_s0 + $0x4] ss:$8 sm:%s26_s15]   ;;  %s81_s20 = smov 96   ;;  %s82_s21 = smov 64   ;;  %v68_v4 = vld [vmem:[%s126_s0 + $0x3] ss:$8 sm:%s33_s18]  }
   0x4   :  { %s2_s24 = smov 3  ;;  %v69_v5 = vld [vmem:[%s126_s0 + $0x2] ss:$8 sm:%s40_s19]   ;;  %s47_s27 = smov 3  ;;  %vm44_vm6 = vcmask 392448   ;;  %vm51_vm7 = vcmask 261248  }
   0x5   :  { %v3_v6 = vld [vmem:[%s126_s0] ss:$8 sm:%s2_s24]   ;;  %s83_s30 = smov 48   ;;  %s84_s2 = smov 32   ;;  %v70_v7 = vld [vmem:[%s126_s0 + $0x1] ss:$8 sm:%s47_s27]  }
   0x6   :  { %14 = vrot.lane.b32.xlu0 %v65_v2, %s81_s20  ;;  %28 = vrot.lane.b32.xlu1 %v67_v3, %s82_s21  ;;  %5 = vst.msk [vmem:[#allocation0] ss:$8 sm:$0x3] %vm4_vm0, %v3_v6   ;;  %s85_s0 = smov 16  }
   0xa   :  { %35 = vrot.lane.b32.xlu0 %v68_v4, %s83_s30  ;;  %42 = vrot.lane.b32.xlu1 %v69_v5, %s84_s2 }
   0xe   :  { %49 = vrot.lane.b32.xlu0 %v70_v7, %s85_s0 }
  0x74   :  { %v9_v8 = vpop.permute.xlu0 %8   ;;  %v22_v9 = vpop.permute.xlu1 %21  }
  0x75   :  { %11 = vst.msk [vmem:[#allocation0] sm:$0x1] %vm10_vm1, %v9_v8  }
  0x78   :  { %v15_v10 = vpop.permute.xlu0 %14   ;;  %v29_v11 = vpop.permute.xlu1 %28  }
  0x79   :  { %17 = vst.msk [vmem:[#allocation0] sm:$0x1] %vm16_vm2, %v15_v10  }
  0x7a   :  { %24 = vst.msk [vmem:[#allocation0] ss:$8 sm:$0x3] %vm23_vm3, %v22_v9  }
  0x7b   :  { %31 = vst.msk [vmem:[#allocation0] ss:$8 sm:$0x3] %vm30_vm4, %v29_v11  }
  0x7c   :  { %v36_v12 = vpop.permute.xlu0 %35   ;;  %v43_v13 = vpop.permute.xlu1 %42  }
  0x7d   :  { %38 = vst.msk [vmem:[#allocation0] ss:$8 sm:$0x3] %vm37_vm5, %v36_v12  }
  0x7e   :  { %45 = vst.msk [vmem:[#allocation0] ss:$8 sm:$0x3] %vm44_vm6, %v43_v13  }
  0x80   :  { %v50_v14 = vpop.permute.xlu0 %49  }
  0x81   :  { %52 = vst.msk [vmem:[#allocation0] ss:$8 sm:$0x3] %vm51_vm7, %v50_v14  }
  0x88   :  { %v56_v15 = vld [vmem:[#allocation0] sm:$0x1]  ;;  %v60_v16 = vld [vmem:[#allocation0 + $0x8] sm:$0x1] }
  0x89   :  { %58 = vst [vmem:[%s127_s1] sm:$0x1] %v56_v15  ;;  %71 = vst [vmem:[%s127_s1 + $0x1] sm:$0x1] %v60_v16 }

// kernel: tile.68
= control target key start
LH: loop header
LB: loop body
LE: loop exit
PB: predicated region body
PF: predicated region fallthrough
CT: control target
= control target key end

     0   :  { %vm41_vm0 = vcmask 1043458   ;;  %s36_s10 = smov 3  ;;  %s39_s11 = smov 12  ;;  %vm46_vm1 = vcmask 1045508   ;;  %vm51_vm2 = vcmask 1047558   ;;  %vm4_vm3 = vcmask 1047556   ;;  %s773_s0 = inlined_call_operand.vmem [shape: f32[9,14,16], index: 0, kind: input, shape index: {}]   ;;  %s774_s1 = inlined_call_operand.vmem [shape: f32[9,224], index: 1, kind: output, shape index: {}]  }
   0x1   :  { %v373_v0 = vld [vmem:[%s773_s0 + $0x87] sm:$0x1]   ;;  %v379_v1 = vld [vmem:[%s773_s0 + $0x86] sm:$0x1]   ;;  %s443_s12 = smov 112   ;;  %s444_s13 = smov 96  }
   0x2   :  { %59 = vrot.lane.b32.xlu0 %v373_v0, %s443_s12  ;;  %88 = vrot.lane.b32.xlu1 %v379_v1, %s444_s13  ;;  %v369_v2 = vld [vmem:[%s773_s0 + $0x7] ss:$16 sm:%s36_s10]   ;;  %s44_s16 = smov 48  ;;  %s49_s17 = smov 192  ;;  %vm6_vm4 = vcmask 130048   ;;  %vm55_vm5 = vcmask 1048448  }
   0x3   :  { %v370_v3 = vld [vmem:[%s773_s0 + $0x7] ss:$16 sm:%s39_s11]   ;;  %s65_s22 = smov 3  ;;  %s68_s23 = smov 12  ;;  %vm84_vm6 = vcmask 917248   ;;  %vm113_vm7 = vcmask 786048  }
   0x4   :  { %v371_v4 = vld [vmem:[%s773_s0 + $0x7] ss:$16 sm:%s44_s16]   ;;  %v42_v5 = vsel %vm41_vm0, %v370_v3, %v369_v2  ;;  %v375_v7 = vld [vmem:[%s773_s0 + $0x6] ss:$16 sm:%s65_s22]   ;;  %s73_s28 = smov 48  ;;  %s78_s29 = smov 192 }
   0x5   :  { %v372_v6 = vld [vmem:[%s773_s0 + $0x7] ss:$16 sm:%s49_s17]   ;;  %v47_v8 = vsel %vm46_vm1, %v371_v4, %v42_v5  ;;  %v376_v9 = vld [vmem:[%s773_s0 + $0x6] ss:$16 sm:%s68_s23]   ;;  %s94_s5 = smov 3  ;;  %s97_s6 = smov 12 }
   0x6   :  { %v377_v10 = vld [vmem:[%s773_s0 + $0x6] ss:$16 sm:%s73_s28]   ;;  %v52_v11 = vsel %vm51_vm2, %v372_v6, %v47_v8  ;;  %v71_v12 = vsel %vm41_vm0, %v376_v9, %v375_v7  ;;  %v381_v14 = vld [vmem:[%s773_s0 + $0x5] ss:$16 sm:%s94_s5]   ;;  %s102_s11 = smov 48  ;;  %s107_s14 = smov 192 }
   0x7   :  { %v378_v13 = vld [vmem:[%s773_s0 + $0x6] ss:$16 sm:%s78_s29]   ;;  %53 = vrot.lane.b32.xlu0 %v52_v11, %s443_s12  ;;  %v76_v15 = vsel %vm46_vm1, %v377_v10, %v71_v12  ;;  %s116_s16 = smov 3  ;;  %s119_s21 = smov 12  ;;  %vm166_vm8 = vcmask 654848   ;;  %vm219_vm9 = vcmask 523648  }
   0x8   :  { %v382_v16 = vld [vmem:[%s773_s0 + $0x5] ss:$16 sm:%s97_s6]   ;;  %v81_v17 = vsel %vm51_vm2, %v378_v13, %v76_v15  ;;  %s124_s22 = smov 48  ;;  %v385_v22 = vld [vmem:[%s773_s0 + $0xd] ss:$16 sm:%s116_s16]   ;;  %s129_s24 = smov 192 }
   0x9   :  { %v100_v18 = vsel %vm41_vm0, %v382_v16, %v381_v14  ;;  %v383_v19 = vld [vmem:[%s773_s0 + $0x5] ss:$16 sm:%s102_s11]   ;;  %82 = vrot.lane.b32.xlu1 %v81_v17, %s444_s13  ;;  %s139_s25 = smov 3  ;;  %s147_s30 = smov 3  ;;  %vm272_vm10 = vcmask 392448   ;;  %vm325_vm11 = vcmask 261248  }
   0xa   :  { %v384_v20 = vld [vmem:[%s773_s0 + $0x5] ss:$16 sm:%s107_s14]   ;;  %v105_v21 = vsel %vm46_vm1, %v383_v19, %v100_v18  ;;  %v386_v24 = vld [vmem:[%s773_s0 + $0xd] ss:$16 sm:%s119_s21]   ;;  %s150_s2 = smov 12  ;;  %s445_s3 = smov 80  }
   0xb   :  { %v110_v23 = vsel %vm51_vm2, %v384_v20, %v105_v21  ;;  %v387_v25 = vld [vmem:[%s773_s0 + $0xd] ss:$16 sm:%s124_s22]   ;;  %v122_v26 = vsel %vm41_vm0, %v386_v24, %v385_v22  ;;  %s155_s6 = smov 48  ;;  %s160_s7 = smov 192  ;;  %v392_v30 = vld [vmem:[%s773_s0 + $0x4] ss:$16 sm:%s147_s30]  }
   0xc   :  { %111 = vrot.lane.b32.xlu0 %v110_v23, %s445_s3  ;;  %v388_v27 = vld [vmem:[%s773_s0 + $0xd] ss:$16 sm:%s129_s24]   ;;  %v127_v28 = vsel %vm46_vm1, %v387_v25, %v122_v26  ;;  %s169_s14 = smov 3  ;;  %s172_s18 = smov 12 }
   0xd   :  { %v390_v29 = vld [vmem:[%s773_s0 + $0x85] ss:$8 sm:%s139_s25]   ;;  %v132_v31 = vsel %vm51_vm2, %v388_v27, %v127_v28  ;;  %v393_v32 = vld [vmem:[%s773_s0 + $0x4] ss:$16 sm:%s150_s2]   ;;  %s177_s19 = smov 48  ;;  %s182_s22 = smov 192 }
   0xe   :  { %v394_v33 = vld [vmem:[%s773_s0 + $0x4] ss:$16 sm:%s155_s6]   ;;  %133 = vrot.lane.b32.xlu1 %v132_v31, %s445_s3  ;;  %v153_v34 = vsel %vm41_vm0, %v393_v32, %v392_v30  ;;  %s192_s13 = smov 3  ;;  %s200_s25 = smov 3 }
   0xf   :  { %v395_v35 = vld [vmem:[%s773_s0 + $0x4] ss:$16 sm:%s160_s7]   ;;  %v158_v36 = vsel %vm46_vm1, %v394_v33, %v153_v34  ;;  %v396_v37 = vld [vmem:[%s773_s0 + $0xc] ss:$16 sm:%s169_s14]   ;;  %s203_s30 = smov 12  ;;  %s208_s2 = smov 48 }
  0x10   :  { %141 = vrot.lane.b32.xlu0 %v390_v29, %s445_s3  ;;  %v163_v38 = vsel %vm51_vm2, %v395_v35, %v158_v36  ;;  %v397_v39 = vld [vmem:[%s773_s0 + $0xc] ss:$16 sm:%s172_s18]   ;;  %s213_s7 = smov 192  ;;  %s446_s8 = smov 64  }
  0x11   :  { %v398_v40 = vld [vmem:[%s773_s0 + $0xc] ss:$16 sm:%s177_s19]   ;;  %v175_v41 = vsel %vm41_vm0, %v397_v39, %v396_v37  ;;  %v403_v45 = vld [vmem:[%s773_s0 + $0x3] ss:$16 sm:%s200_s25]   ;;  %s222_s11 = smov 3  ;;  %s225_s14 = smov 12 }
  0x12   :  { %v399_v42 = vld [vmem:[%s773_s0 + $0xc] ss:$16 sm:%s182_s22]   ;;  %164 = vrot.lane.b32.xlu1 %v163_v38, %s446_s8  ;;  %v180_v44 = vsel %vm46_vm1, %v398_v40, %v175_v41  ;;  %s230_s18 = smov 48  ;;  %s235_s21 = smov 192 }
  0x13   :  { %v401_v43 = vld [vmem:[%s773_s0 + $0x84] ss:$8 sm:%s192_s13]   ;;  %v185_v46 = vsel %vm51_vm2, %v399_v42, %v180_v44  ;;  %v404_v47 = vld [vmem:[%s773_s0 + $0x3] ss:$16 sm:%s203_s30]   ;;  %s245_s22 = smov 3  ;;  %s253_s26 = smov 3 }
  0x14   :  { %v405_v48 = vld [vmem:[%s773_s0 + $0x3] ss:$16 sm:%s208_s2]   ;;  %186 = vrot.lane.b32.xlu0 %v185_v46, %s446_s8  ;;  %v206_v49 = vsel %vm41_vm0, %v404_v47, %v403_v45  ;;  %s256_s29 = smov 12  ;;  %s261_s30 = smov 48 }
  0x15   :  { %v406_v50 = vld [vmem:[%s773_s0 + $0x3] ss:$16 sm:%s213_s7]   ;;  %v211_v51 = vsel %vm46_vm1, %v405_v48, %v206_v49  ;;  %v407_v52 = vld [vmem:[%s773_s0 + $0xb] ss:$16 sm:%s222_s11]   ;;  %s266_s6 = smov 192  ;;  %s447_s7 = smov 48  }
  0x16   :  { %v408_v53 = vld [vmem:[%s773_s0 + $0xb] ss:$16 sm:%s225_s14]   ;;  %194 = vrot.lane.b32.xlu1 %v401_v43, %s446_s8  ;;  %v216_v54 = vsel %vm51_vm2, %v406_v50, %v211_v51  ;;  %s275_s10 = smov 3  ;;  %s278_s11 = smov 12 }
  0x17   :  { %v228_v55 = vsel %vm41_vm0, %v408_v53, %v407_v52  ;;  %v409_v56 = vld [vmem:[%s773_s0 + $0xb] ss:$16 sm:%s230_s18]   ;;  %v414_v61 = vld [vmem:[%s773_s0 + $0x2] ss:$16 sm:%s253_s26]   ;;  %s283_s17 = smov 48  ;;  %s288_s20 = smov 192 }
  0x18   :  { %v233_v57 = vsel %vm46_vm1, %v409_v56, %v228_v55  ;;  %v410_v58 = vld [vmem:[%s773_s0 + $0xb] ss:$16 sm:%s235_s21]   ;;  %217 = vrot.lane.b32.xlu0 %v216_v54, %s447_s7  ;;  %s298_s21 = smov 3  ;;  %s306_s25 = smov 3 }
  0x19   :  { %v412_v59 = vld [vmem:[%s773_s0 + $0x83] ss:$8 sm:%s245_s22]   ;;  %v238_v60 = vsel %vm51_vm2, %v410_v58, %v233_v57  ;;  %v415_v62 = vld [vmem:[%s773_s0 + $0x2] ss:$16 sm:%s256_s29]   ;;  %s309_s28 = smov 12  ;;  %s314_s29 = smov 48 }
  0x1a   :  { %v416_v63 = vld [vmem:[%s773_s0 + $0x2] ss:$16 sm:%s261_s30]   ;;  %239 = vrot.lane.b32.xlu1 %v238_v60, %s447_s7  ;;  %v259_v0 = vsel %vm41_vm0, %v415_v62, %v414_v61  ;;  %s319_s5 = smov 192  ;;  %v2_v13 = vld [vmem:[%s773_s0] ss:$8 sm:$0xf]  }
  0x1b   :  { %v417_v1 = vld [vmem:[%s773_s0 + $0x2] ss:$16 sm:%s266_s6]   ;;  %v264_v2 = vsel %vm46_vm1, %v416_v63, %v259_v0  ;;  %v418_v3 = vld [vmem:[%s773_s0 + $0xa] ss:$16 sm:%s275_s10]   ;;  %s328_s6 = smov 3  ;;  %s331_s10 = smov 12 }
  0x1c   :  { %v419_v4 = vld [vmem:[%s773_s0 + $0xa] ss:$16 sm:%s278_s11]   ;;  %247 = vrot.lane.b32.xlu0 %v412_v59, %s447_s7  ;;  %v269_v5 = vsel %vm51_vm2, %v417_v1, %v264_v2  ;;  %s448_s7 = smov 32   ;;  %s336_s18 = smov 48 }
  0x1d   :  { %v281_v6 = vsel %vm41_vm0, %v419_v4, %v418_v3  ;;  %v420_v7 = vld [vmem:[%s773_s0 + $0xa] ss:$16 sm:%s283_s17]   ;;  %v425_v12 = vld [vmem:[%s773_s0 + $0x1] ss:$16 sm:%s306_s25]   ;;  %s30_s27 = smov 3  ;;  %s351_s30 = smov 3 }
  0x1e   :  { %v286_v8 = vsel %vm46_vm1, %v420_v7, %v281_v6  ;;  %v421_v9 = vld [vmem:[%s773_s0 + $0xa] ss:$16 sm:%s288_s20]   ;;  %270 = vrot.lane.b32.xlu1 %v269_v5, %s448_s7  ;;  %v3_v18 = vld [vmem:[%s773_s0] ss:$8 sm:$0xf0]   ;;  %s449_s15 = smov 16  }
  0x1f   :  { %v423_v10 = vld [vmem:[%s773_s0 + $0x82] ss:$8 sm:%s298_s21]   ;;  %v291_v11 = vsel %vm51_vm2, %v421_v9, %v286_v8  ;;  %v426_v14 = vld [vmem:[%s773_s0 + $0x1] ss:$16 sm:%s309_s28]   ;;  %s341_s21 = smov 192  ;;  %v5_v22 = vsel %vm4_vm3, %v3_v18, %v2_v13 }
  0x20   :  { %v427_v15 = vld [vmem:[%s773_s0 + $0x1] ss:$16 sm:%s314_s29]   ;;  %292 = vrot.lane.b32.xlu0 %v291_v11, %s448_s7  ;;  %v312_v16 = vsel %vm41_vm0, %v426_v14, %v425_v12  ;;  %7 = vst.msk [vmem:[%s774_s1] ss:$8 sm:$0x3] %vm6_vm4, %v5_v22  }
  0x21   :  { %v428_v17 = vld [vmem:[%s773_s0 + $0x1] ss:$16 sm:%s319_s5]   ;;  %v317_v19 = vsel %vm46_vm1, %v427_v15, %v312_v16  ;;  %v429_v20 = vld [vmem:[%s773_s0 + $0x9] ss:$16 sm:%s328_s6]  }
  0x22   :  { %v430_v21 = vld [vmem:[%s773_s0 + $0x9] ss:$16 sm:%s331_s10]   ;;  %300 = vrot.lane.b32.xlu1 %v423_v10, %s448_s7  ;;  %v322_v23 = vsel %vm51_vm2, %v428_v17, %v317_v19  ;;  %358 = vst.msk [vmem:[%s774_s1 - $0xf] ss:$8 sm:$0xc] %vm6_vm4, %v5_v22  }
  0x23   :  { %v334_v24 = vsel %vm41_vm0, %v430_v21, %v429_v20  ;;  %v431_v25 = vld [vmem:[%s773_s0 + $0x9] ss:$16 sm:%s336_s18]   ;;  %359 = vst.msk [vmem:[%s774_s1 - $0x1e] ss:$8 sm:$0x30] %vm6_vm4, %v5_v22  }
  0x24   :  { %360 = vst.msk [vmem:[%s774_s1 - $0x2d] ss:$8 sm:$0xc0] %vm6_vm4, %v5_v22   ;;  %v361_v26 = vld [vmem:[%s773_s0 + $0x40] ss:$8 sm:$0xf]   ;;  %v339_v27 = vsel %vm46_vm1, %v431_v25, %v334_v24  ;;  %323 = vrot.lane.b32.xlu0 %v322_v23, %s449_s15 }
  0x25   :  { %v432_v28 = vld [vmem:[%s773_s0 + $0x9] ss:$16 sm:%s341_s21]   ;;  %v367_v30 = vld [vmem:[%s773_s0 + $0x80] ss:$8 sm:%s30_s27]  }
  0x26   :  { %v344_v29 = vsel %vm51_vm2, %v432_v28, %v339_v27  ;;  %v362_v31 = vld [vmem:[%s773_s0 + $0x40] ss:$8 sm:$0xf0]   ;;  %v434_v32 = vld [vmem:[%s773_s0 + $0x81] ss:$8 sm:%s351_s30]  }
  0x27   :  { %368 = vst.msk [vmem:[%s774_s1 + $0x10] ss:$8 sm:$0x3] %vm6_vm4, %v367_v30   ;;  %v19_v33 = vsel %vm4_vm3, %v362_v31, %v361_v26  ;;  %345 = vrot.lane.b32.xlu1 %v344_v29, %s449_s15 }
  0x28   :  { %363 = vst.msk [vmem:[%s774_s1 + $0x4] ss:$8 sm:$0x3] %vm6_vm4, %v19_v33   ;;  %364 = vst.msk [vmem:[%s774_s1 - $0xb] ss:$8 sm:$0xc] %vm6_vm4, %v19_v33   ;;  %353 = vrot.lane.b32.xlu0 %v434_v32, %s449_s15 }
  0x29   :  { %365 = vst.msk [vmem:[%s774_s1 - $0x1a] ss:$8 sm:$0x30] %vm6_vm4, %v19_v33   ;;  %366 = vst.msk [vmem:[%s774_s1 - $0x29] ss:$8 sm:$0xc0] %vm6_vm4, %v19_v33  }
  0x74   :  { %v60_v34 = vpop.permute.xlu0 %59   ;;  %v89_v35 = vpop.permute.xlu1 %88  }
  0x75   :  { %374 = vst.msk [vmem:[%s774_s1 + $0x10] sm:$0x1] %vm55_vm5, %v60_v34  }
  0x76   :  { %380 = vst.msk [vmem:[%s774_s1 + $0x10] sm:$0x1] %vm84_vm6, %v89_v35  }
  0x79   :  { %v54_v36 = vpop.permute.xlu0 %53  }
  0x7a   :  { %56 = vst.msk [vmem:[%s774_s1] sm:$0xff] %vm55_vm5, %v54_v36  }
  0x7b   :  { %v83_v37 = vpop.permute.xlu1 %82  }
  0x7c   :  { %85 = vst.msk [vmem:[%s774_s1] sm:$0xff] %vm84_vm6, %v83_v37  }
  0x7e   :  { %v112_v38 = vpop.permute.xlu0 %111  }
  0x7f   :  { %114 = vst.msk [vmem:[%s774_s1] sm:$0xff] %vm113_vm7, %v112_v38  }
  0x80   :  { %v134_v39 = vpop.permute.xlu1 %133  }
  0x81   :  { %389 = vst.msk [vmem:[%s774_s1 + $0x8] sm:$0xff] %vm113_vm7, %v134_v39  }
  0x82   :  { %v142_v40 = vpop.permute.xlu0 %141  }
  0x83   :  { %391 = vst.msk [vmem:[%s774_s1 + $0x10] ss:$8 sm:$0x3] %vm113_vm7, %v142_v40  }
  0x84   :  { %v165_v41 = vpop.permute.xlu1 %164  }
  0x85   :  { %167 = vst.msk [vmem:[%s774_s1] sm:$0xff] %vm166_vm8, %v165_v41  }
  0x86   :  { %v187_v42 = vpop.permute.xlu0 %186  }
  0x87   :  { %400 = vst.msk [vmem:[%s774_s1 + $0x8] sm:$0xff] %vm166_vm8, %v187_v42  }
  0x88   :  { %v195_v43 = vpop.permute.xlu1 %194  }
  0x89   :  { %402 = vst.msk [vmem:[%s774_s1 + $0x10] ss:$8 sm:$0x3] %vm166_vm8, %v195_v43  }
  0x8a   :  { %v218_v44 = vpop.permute.xlu0 %217  }
  0x8b   :  { %220 = vst.msk [vmem:[%s774_s1] sm:$0xff] %vm219_vm9, %v218_v44  }
  0x8c   :  { %v240_v45 = vpop.permute.xlu1 %239  }
  0x8d   :  { %411 = vst.msk [vmem:[%s774_s1 + $0x8] sm:$0xff] %vm219_vm9, %v240_v45  }
  0x8e   :  { %v248_v46 = vpop.permute.xlu0 %247  }
  0x8f   :  { %413 = vst.msk [vmem:[%s774_s1 + $0x10] ss:$8 sm:$0x3] %vm219_vm9, %v248_v46  }
  0x90   :  { %v271_v47 = vpop.permute.xlu1 %270  }
  0x91   :  { %273 = vst.msk [vmem:[%s774_s1] sm:$0xff] %vm272_vm10, %v271_v47  }
  0x92   :  { %v293_v48 = vpop.permute.xlu0 %292  }
  0x93   :  { %422 = vst.msk [vmem:[%s774_s1 + $0x8] sm:$0xff] %vm272_vm10, %v293_v48  }
  0x94   :  { %v301_v49 = vpop.permute.xlu1 %300  }
  0x95   :  { %424 = vst.msk [vmem:[%s774_s1 + $0x10] ss:$8 sm:$0x3] %vm272_vm10, %v301_v49  }
  0x96   :  { %v324_v50 = vpop.permute.xlu0 %323  }
  0x97   :  { %326 = vst.msk [vmem:[%s774_s1] sm:$0xff] %vm325_vm11, %v324_v50  }
  0x99   :  { %v346_v51 = vpop.permute.xlu1 %345  }
  0x9a   :  { %433 = vst.msk [vmem:[%s774_s1 + $0x8] sm:$0xff] %vm325_vm11, %v346_v51   ;;  %v354_v52 = vpop.permute.xlu0 %353  }
  0x9b   :  { %435 = vst.msk [vmem:[%s774_s1 + $0x10] ss:$8 sm:$0x3] %vm325_vm11, %v354_v52  }

// kernel: tile.75
= control target key start
LH: loop header
LB: loop body
LE: loop exit
PB: predicated region body
PF: predicated region fallthrough
CT: control target
= control target key end

     0   :  { %s22_s0 = inlined_call_operand.vmem [shape: f32[32], index: 0, kind: input, shape index: {}]   ;;  %s23_s1 = inlined_call_operand.vmem [shape: f32[7,32], index: 1, kind: output, shape index: {}]  }
   0x1   :  { %v4_v0 = vld [vmem:[%s22_s0] ss:$0 sm:$0xff] }
   0x2   :  { %5 = vst [vmem:[%s23_s1] sm:$0xff] %v4_v0 }

// kernel: tile.76
= control target key start
LH: loop header
LB: loop body
LE: loop exit
PB: predicated region body
PF: predicated region fallthrough
CT: control target
= control target key end

     0   :  { %s13_s8 = smov 3  ;;  %s44_s9 = smov 96   ;;  %vm4_vm0 = vcmask 261120   ;;  %vm10_vm1 = vcmask 1048320   ;;  %vm17_vm2 = vcmask 785920   ;;  %vm24_vm3 = vcmask 523520   ;;  %s75_s0 = inlined_call_operand.vmem [shape: f32[7,32], index: 0, kind: input, shape index: {}]   ;;  %s76_s1 = inlined_call_operand.vmem [shape: f32[1,224], index: 1, kind: output, shape index: {}]  }
   0x1   :  { %v37_v0 = vld [vmem:[%s75_s0 + $0x3] sm:$0x1]   ;;  %s20_s10 = smov 3  ;;  %v38_v1 = vld [vmem:[%s75_s0 + $0x2] ss:$4 sm:%s13_s8]   ;;  %s2_s15 = smov 3 }
   0x2   :  { %8 = vrot.lane.b32.xlu0 %v37_v0, %s44_s9  ;;  %v39_v2 = vld [vmem:[%s75_s0 + $0x1] ss:$4 sm:%s20_s10]   ;;  %s45_s16 = smov 32  }
   0x3   :  { %22 = vrot.lane.b32.xlu1 %v39_v2, %s45_s16  ;;  %v3_v3 = vld [vmem:[%s75_s0] ss:$4 sm:%s2_s15]   ;;  %s46_s0 = smov 64  }
   0x4   :  { %5 = vst.msk [vmem:[#allocation0] ss:$8 sm:$0x3] %vm4_vm0, %v3_v3  }
   0x6   :  { %15 = vrot.lane.b32.xlu0 %v38_v1, %s46_s0 }
  0x74   :  { %v9_v4 = vpop.permute.xlu0 %8  }
  0x75   :  { %11 = vst.msk [vmem:[#allocation0] sm:$0x1] %vm10_vm1, %v9_v4   ;;  %v23_v5 = vpop.permute.xlu1 %22  }
  0x78   :  { %v16_v6 = vpop.permute.xlu0 %15  }
  0x79   :  { %18 = vst.msk [vmem:[#allocation0] ss:$8 sm:$0x3] %vm17_vm2, %v16_v6  }
  0x7a   :  { %25 = vst.msk [vmem:[#allocation0] ss:$8 sm:$0x3] %vm24_vm3, %v23_v5  }
  0x81   :  { %v29_v7 = vld [vmem:[#allocation0] sm:$0x1]  ;;  %v33_v8 = vld [vmem:[#allocation0 + $0x8] sm:$0x1] }
  0x82   :  { %31 = vst [vmem:[%s76_s1] sm:$0x1] %v29_v7  ;;  %40 = vst [vmem:[%s76_s1 + $0x1] sm:$0x1] %v33_v8 }

// kernel: tile.81
= control target key start
LH: loop header
LB: loop body
LE: loop exit
PB: predicated region body
PF: predicated region fallthrough
CT: control target
= control target key end

     0   :  { %vm32_vm0 = vcmask 1047556   ;;  %s134_s14 = smov 64   ;;  %s135_s19 = smov 96   ;;  %vm3_vm1 = vcmask 261120   ;;  %vm36_vm2 = vcmask 1048320   ;;  %vm53_vm3 = vcmask 785920   ;;  %s263_s0 = inlined_call_operand.vmem [shape: f32[9,7,32], index: 0, kind: input, shape index: {}]   ;;  %s264_s1 = inlined_call_operand.vmem [shape: f32[9,224], index: 1, kind: output, shape index: {}]  }
   0x1   :  { %v117_v0 = vld [vmem:[%s263_s0 + $0x2] ss:$8 sm:$0xf]   ;;  %v113_v3 = vld [vmem:[%s263_s0 + $0x3] ss:$8 sm:$0xf]  }
   0x2   :  { %v118_v1 = vld [vmem:[%s263_s0 + $0x2] ss:$8 sm:$0xf0]   ;;  %v114_v4 = vld [vmem:[%s263_s0 + $0x3] ss:$8 sm:$0xf0]  }
   0x3   :  { %v50_v2 = vsel %vm32_vm0, %v118_v1, %v117_v0  ;;  %v33_v5 = vsel %vm32_vm0, %v114_v4, %v113_v3  ;;  %v119_v6 = vld [vmem:[%s263_s0 + $0x6] ss:$8 sm:$0xf]   ;;  %v115_v9 = vld [vmem:[%s263_s0 + $0x43] sm:$0x1]   ;;  %s67_s26 = smov 3 }
   0x4   :  { %51 = vrot.lane.b32.xlu1 %v50_v2, %s134_s14  ;;  %v120_v7 = vld [vmem:[%s263_s0 + $0x6] ss:$8 sm:$0xf0]   ;;  %34 = vrot.lane.b32.xlu0 %v33_v5, %s135_s19  ;;  %v124_v10 = vld [vmem:[%s263_s0 + $0x1] ss:$8 sm:$0xf]  }
   0x5   :  { %v60_v8 = vsel %vm32_vm0, %v120_v7, %v119_v6  ;;  %v125_v11 = vld [vmem:[%s263_s0 + $0x1] ss:$8 sm:$0xf0]   ;;  %s23_s27 = smov 3  ;;  %v2_v13 = vld [vmem:[%s263_s0] ss:$4 sm:$0xff]  }
   0x6   :  { %v79_v12 = vsel %vm32_vm0, %v125_v11, %v124_v10  ;;  %v106_v14 = vld [vmem:[%s263_s0 + $0x20] ss:$4 sm:$0xff]   ;;  %v122_v15 = vld [vmem:[%s263_s0 + $0x42] ss:$4 sm:%s67_s26]   ;;  %s96_s5 = smov 3  ;;  %s136_s2 = smov 32  }
   0x7   :  { %4 = vst.msk [vmem:[%s264_s1] ss:$8 sm:$0x3] %vm3_vm1, %v2_v13   ;;  %103 = vst.msk [vmem:[%s264_s1 - $0xf] ss:$8 sm:$0xc] %vm3_vm1, %v2_v13  }
   0x8   :  { %61 = vrot.lane.b32.xlu1 %v60_v8, %s134_s14  ;;  %40 = vrot.lane.b32.xlu0 %v115_v9, %s135_s19  ;;  %104 = vst.msk [vmem:[%s264_s1 - $0x1e] ss:$8 sm:$0x30] %vm3_vm1, %v2_v13   ;;  %105 = vst.msk [vmem:[%s264_s1 - $0x2d] ss:$8 sm:$0xc0] %vm3_vm1, %v2_v13  }
   0x9   :  { %107 = vst.msk [vmem:[%s264_s1 + $0x4] ss:$8 sm:$0x3] %vm3_vm1, %v106_v14   ;;  %108 = vst.msk [vmem:[%s264_s1 - $0xb] ss:$8 sm:$0xc] %vm3_vm1, %v106_v14  }
   0xa   :  { %109 = vst.msk [vmem:[%s264_s1 - $0x1a] ss:$8 sm:$0x30] %vm3_vm1, %v106_v14   ;;  %110 = vst.msk [vmem:[%s264_s1 - $0x29] ss:$8 sm:$0xc0] %vm3_vm1, %v106_v14  }
   0xb   :  { %v111_v16 = vld [vmem:[%s263_s0 + $0x40] ss:$4 sm:%s23_s27]   ;;  %v126_v17 = vld [vmem:[%s263_s0 + $0x5] ss:$8 sm:$0xf]   ;;  %vm82_vm4 = vcmask 523520  }
   0xc   :  { %v127_v18 = vld [vmem:[%s263_s0 + $0x5] ss:$8 sm:$0xf0]   ;;  %112 = vst.msk [vmem:[%s264_s1 + $0x10] ss:$8 sm:$0x3] %vm3_vm1, %v111_v16   ;;  %80 = vrot.lane.b32.xlu1 %v79_v12, %s136_s2  ;;  %69 = vrot.lane.b32.xlu0 %v122_v15, %s134_s14 }
   0xd   :  { %v129_v19 = vld [vmem:[%s263_s0 + $0x41] ss:$4 sm:%s96_s5]   ;;  %v89_v20 = vsel %vm32_vm0, %v127_v18, %v126_v17 }
  0x10   :  { %98 = vrot.lane.b32.xlu1 %v129_v19, %s136_s2  ;;  %90 = vrot.lane.b32.xlu0 %v89_v20, %s136_s2 }
  0x76   :  { %v52_v21 = vpop.permute.xlu1 %51   ;;  %v35_v22 = vpop.permute.xlu0 %34  }
  0x77   :  { %37 = vst.msk [vmem:[%s264_s1] sm:$0xff] %vm36_vm2, %v35_v22  }
  0x78   :  { %54 = vst.msk [vmem:[%s264_s1] sm:$0xff] %vm53_vm3, %v52_v21  }
  0x7a   :  { %v62_v23 = vpop.permute.xlu1 %61   ;;  %v41_v24 = vpop.permute.xlu0 %40  }
  0x7b   :  { %121 = vst.msk [vmem:[%s264_s1 + $0x8] sm:$0xff] %vm53_vm3, %v62_v23  }
  0x7c   :  { %116 = vst.msk [vmem:[%s264_s1 + $0x10] sm:$0x1] %vm36_vm2, %v41_v24  }
  0x7e   :  { %v81_v25 = vpop.permute.xlu1 %80   ;;  %v70_v26 = vpop.permute.xlu0 %69  }
  0x7f   :  { %83 = vst.msk [vmem:[%s264_s1] sm:$0xff] %vm82_vm4, %v81_v25  }
  0x80   :  { %123 = vst.msk [vmem:[%s264_s1 + $0x10] ss:$8 sm:$0x3] %vm53_vm3, %v70_v26  }
  0x82   :  { %v99_v27 = vpop.permute.xlu1 %98   ;;  %v91_v28 = vpop.permute.xlu0 %90  }
  0x83   :  { %130 = vst.msk [vmem:[%s264_s1 + $0x10] ss:$8 sm:$0x3] %vm82_vm4, %v99_v27   ;;  %128 = vst.msk [vmem:[%s264_s1 + $0x8] sm:$0xff] %vm82_vm4, %v91_v28  }

// kernel: _lambda_.6
= control target key start
LH: loop header
LB: loop body
LE: loop exit
PB: predicated region body
PF: predicated region fallthrough
CT: control target
= control target key end

     0   :  { %s747_s18 = smov 0   ;;  %s935_s0 = inlined_call_operand.vmem [shape: f32[2,14,112], index: 0, kind: input, shape index: {}]   ;;  %s936_s1 = inlined_call_operand.vmem [shape: f32[9,112], index: 1, kind: input, shape index: {}]   ;;  %s937_s2 = inlined_call_operand.vmem [shape: f32[1,112], index: 2, kind: input, shape index: {}]   ;;  %s938_s3 = inlined_call_operand.vmem [shape: f32[112,224], index: 3, kind: input, shape index: {}]   ;;  %s939_s4 = inlined_call_operand.vmem [shape: f32[1,224], index: 4, kind: input, shape index: {}]   ;;  %s940_s5 = inlined_call_operand.vmem [shape: f32[2,14,224], index: 5, kind: output, shape index: {}]  }
   0x1 LB: > { %s624_s19 = sadd.s32 4294967295, %s710_s18   ;;  %p628_p0 = scmp.ge.s32.totalorder %s710_s18, 1  ;;  %s710_s18 = sphi %s747_s18, %s15_s18  }
   0x2   : > { %p187_p1 = scmp.lt.s32.totalorder %s710_s18, 3 }
   0x4   : > { %p188_p2 = pnand %p628_p0, %p187_p1 }
   0x5   : > { %v634_v0 = vld [vmem:[%s936_s1 + $0x1] ss:$0 sm:$0xff] (!%p188_p2)  ;;  %s712_s22 = smov (!%p188_p2), 8   ;;  %p215_p3 = scmp.lt.s32.totalorder (!%p188_p2), %s624_s19, 1  ;;  %v635_v1 = vld [vmem:[%s936_s1 + $0x2] ss:$0 sm:$0xff] (!%p188_p2) }
   0x6   : > { %191 = sbr.rel (%p188_p2) target bundleno = 505 (0x1f9), region = 40  ;;  %258 = vrot.lane.b32.xlu1 (!%p188_p2), %v634_v0, %s712_s22  ;;  %v713_v2 = vmov (!%p188_p2), 0.0   ;;  %s714_s25 = smov (!%p188_p2), 16   ;;  %v638_v3 = vld [vmem:[%s936_s1 + $0x5] ss:$0 sm:$0xff] (!%p188_p2)  ;;  %v436_v9 = vld [vmem:[%s938_s3 + $0x8] sm:$0xff] (!%p188_p2) }
   0x7   : > { %225 = vst [vmem:[#allocation2] sm:$0xff] (!%p188_p2), %v713_v2  ;;  %226 = vst [vmem:[#allocation2 + $0x8] sm:$0xff] (!%p188_p2), %v713_v2  ;;  %546 = vmatprep.mubr.f32.mxu0 (!%p188_p2), %v713_v2  ;;  %552 = vmatprep.mubr.f32.mxu1 (!%p188_p2), %v713_v2  ;;  %v641_v6 = vld [vmem:[%s936_s1 + $0x8] ss:$0 sm:$0xff] (!%p188_p2)  ;;  %v637_v7 = vld [vmem:[%s936_s1 + $0x4] ss:$0 sm:$0xff] (!%p188_p2) }
   0x8   : > { %v640_v8 = vld [vmem:[%s936_s1 + $0x7] ss:$0 sm:$0xff] (!%p188_p2)  ;;  %v438_v10 = vld [vmem:[%s938_s3 + $0x18] sm:$0xff] (!%p188_p2)  ;;  %v437_v13 = vld [vmem:[%s938_s3 + $0x10] sm:$0xff] (!%p188_p2)  ;;  %vm237_vm0 = vcmask (!%p188_p2), 982080   ;;  %vm239_vm1 = vcmask (!%p188_p2), 980032  }
   0x9   : > { %v435_v11 = vld [vmem:[%s938_s3] sm:$0xff] (!%p188_p2)  ;;  %v649_v12 = vpack.c.bf16 (!%p188_p2), %v438_v10, %v436_v9  ;;  %v440_v15 = vld [vmem:[%s938_s3 + $0x28] sm:$0xff] (!%p188_p2)  ;;  %v442_v16 = vld [vmem:[%s938_s3 + $0x38] sm:$0xff] (!%p188_p2)  ;;  %vm303_vm2 = vcmask (!%p188_p2), 1046528   ;;  %vm368_vm3 = vcmask (!%p188_p2), 1045504   ;;  %s716_s12 = smov (!%p188_p2), 112  }
   0xa   : > { %279 = vrot.lane.b32.xlu1 (!%p188_p2), %v635_v1, %s714_s25  ;;  %v651_v14 = vpack.c.bf16 (!%p188_p2), %v437_v13, %v435_v11  ;;  %v439_v17 = vld [vmem:[%s938_s3 + $0x20] sm:$0xff] (!%p188_p2)  ;;  %v653_v18 = vpack.c.bf16 (!%p188_p2), %v442_v16, %v440_v15  ;;  %v441_v19 = vld [vmem:[%s938_s3 + $0x30] sm:$0xff] (!%p188_p2)  ;;  %v444_v23 = vld [vmem:[%s938_s3 + $0x48] sm:$0xff] (!%p188_p2)  ;;  %vm475_vm4 = vcmask (!%p188_p2), 916480   ;;  %vm564_vm5 = vcmask (!%p188_p2), 785408  }
   0xb   : > { %650 = vmatprep.subr.bf16.mxu0 (!%p188_p2), %v649_v12  ;;  %677 = vmatprep.subr.bf16.mxu1 (!%p188_p2), %v649_v12  ;;  %v655_v21 = vpack.c.bf16 (!%p188_p2), %v441_v19, %v439_v17  ;;  %v446_v24 = vld [vmem:[%s938_s3 + $0x58] sm:$0xff] (!%p188_p2)  ;;  %v443_v26 = vld [vmem:[%s938_s3 + $0x40] sm:$0xff] (!%p188_p2)  ;;  %v445_v27 = vld [vmem:[%s938_s3 + $0x50] sm:$0xff] (!%p188_p2)  ;;  %vm567_vm6 = vcmask (!%p188_p2), 783360  }
   0xc   : > { %652 = vmatpush1.bf16.msra.mxu0 (!%p188_p2), %v651_v14  ;;  %684 = vmatpush1.bf16.msra.mxu1 (!%p188_p2), %v651_v14  ;;  %v657_v25 = vpack.c.bf16 (!%p188_p2), %v446_v24, %v444_v23  ;;  %v659_v29 = vpack.c.bf16 (!%p188_p2), %v445_v27, %v443_v26  ;;  %v448_v31 = vld [vmem:[%s938_s3 + $0x68] sm:$0xff] (!%p188_p2)  ;;  %v450_v32 = vld [vmem:[%s938_s3 + $0x78] sm:$0xff] (!%p188_p2)  ;;  %v447_v33 = vld [vmem:[%s938_s3 + $0x60] sm:$0xff] (!%p188_p2) }
   0xd   : > { %s942_s19 = smov (!%p215_p3, %s624_s19), 1  ;;  %654 = vmatprep.subr.bf16.mxu0 %v653_v18  ;;  %678 = vmatprep.subr.bf16.mxu1 %v653_v18  ;;  %v636_v36 = vld [vmem:[%s936_s1 + $0x3] ss:$0 sm:$0xff]  ;;  %v661_v37 = vpack.c.bf16 %v450_v32, %v448_v31  ;;  %v449_v38 = vld [vmem:[%s938_s3 + $0x70] sm:$0xff]  ;;  %v452_v43 = vld [vmem:[%s938_s3 + $0x88] sm:$0xff] }
   0xe   : > { %s647_s26 = sshll.u32 %s942_s19, 4  ;;  %341 = vrot.lane.b32.xlu1 %v638_v3, %s714_s25  ;;  %v663_v40 = vpack.c.bf16 %v449_v38, %v447_v33  ;;  %v454_v44 = vld [vmem:[%s938_s3 + $0x98] sm:$0xff]  ;;  %v639_v45 = vld [vmem:[%s936_s1 + $0x6] ss:$0 sm:$0xff]  ;;  %v453_v53 = vld [vmem:[%s938_s3 + $0x90] sm:$0xff] }
   0xf   : > { %s219_s29 = scalar_lea.vmem %s935_s0, %s647_s26  ;;  %s715_s26 = smov 120   ;;  %v665_v47 = vpack.c.bf16 %v454_v44, %v452_v43  ;;  %v451_v52 = vld [vmem:[%s938_s3 + $0x80] sm:$0xff]  ;;  %v456_v61 = vld [vmem:[%s938_s3 + $0xa8] sm:$0xff]  ;;  %v458_v62 = vld [vmem:[%s938_s3 + $0xb8] sm:$0xff] }
  0x10   : > { %v227_v4 = vld [vmem:[%s219_s29] sm:$0xff]  ;;  %v228_v5 = vld [vmem:[%s219_s29 + $0x8] sm:$0x3f]  ;;  %656 = vmatpush1.bf16.msra.mxu0 %v655_v21  ;;  %685 = vmatpush1.bf16.msra.mxu1 %v655_v21  ;;  %v667_v1 = vpack.c.bf16 %v453_v53, %v451_v52  ;;  %v669_v12 = vpack.c.bf16 %v458_v62, %v456_v61  ;;  %v462_v23 = vld [vmem:[%s938_s3 + $0xd8] sm:$0xff] }
  0x11   : > { %231 = vrot.lane.b32.xlu0 %v227_v4, %s712_s22  ;;  %658 = vmatprep.subr.bf16.mxu0 %v657_v25  ;;  %v455_v3 = vld [vmem:[%s938_s3 + $0xa0] sm:$0xff]  ;;  %v457_v4 = vld [vmem:[%s938_s3 + $0xb0] sm:$0xff] }
  0x12   : > { %406 = vrot.lane.b32.xlu1 %v641_v6, %s714_s25  ;;  %679 = vmatprep.subr.bf16.mxu1 %v657_v25  ;;  %v671_v13 = vpack.c.bf16 %v457_v4, %v455_v3  ;;  %v459_v24 = vld [vmem:[%s938_s3 + $0xc0] sm:$0xff]  ;;  %v461_v26 = vld [vmem:[%s938_s3 + $0xd0] sm:$0xff] }
  0x13   : > { %v633_v33 = vld [vmem:[%s936_s1] ss:$0 sm:$0xff] }
  0x14   : > { %660 = vmatpush1.bf16.msra.mxu0 %v659_v29  ;;  %686 = vmatpush1.bf16.msra.mxu1 %v659_v29 }
  0x15   : > { %233 = vrot.lane.b32.xlu0 %v228_v5, %s712_s22  ;;  %662 = vmatprep.subr.bf16.mxu0 %v661_v37 }
  0x16   : > { %680 = vmatprep.subr.bf16.mxu1 %v661_v37 }
  0x18   : > { %664 = vmatpush1.bf16.msra.mxu0 %v663_v40  ;;  %687 = vmatpush1.bf16.msra.mxu1 %v663_v40 }
  0x19   : > { %317 = vrot.lane.b32.xlu0 %v637_v7, %s712_s22  ;;  %666 = vmatprep.subr.bf16.mxu0 %v665_v47 }
  0x1a   : > { %681 = vmatprep.subr.bf16.mxu1 %v665_v47 }
  0x1c   : > { %668 = vmatpush1.bf16.msra.mxu0 %v667_v1  ;;  %688 = vmatpush1.bf16.msra.mxu1 %v667_v1 }
  0x1d   : > { %382 = vrot.lane.b32.xlu0 %v640_v8, %s712_s22  ;;  %670 = vmatprep.subr.bf16.mxu0 %v669_v12 }
  0x1e   : > { %682 = vmatprep.subr.bf16.mxu1 %v669_v12 }
  0x20   : > { %672 = vmatpush1.bf16.msra.mxu0 %v671_v13  ;;  %689 = vmatpush1.bf16.msra.mxu1 %v671_v13 }
  0x78   : > { %v259_v22 = vpop.permute.xlu1 %258 }
  0x7c   : > { %v280_v30 = vpop.permute.xlu1 %279 }
  0x80   : > { %v342_v48 = vpop.permute.xlu1 %341 }
  0x83   : > { %v232_v20 = vpop.permute.xlu0 %231 }
  0x84   : > { %238 = vst.msk [vmem:[#allocation2 + $0x1] sm:$0xff] %vm237_vm0, %v232_v20  ;;  %v407_v17 = vpop.permute.xlu1 %406 }
  0x87   : > { %v234_v28 = vpop.permute.xlu0 %233 }
  0x88   : > { %240 = vst.msk [vmem:[#allocation2 + $0x9] sm:$0x3f] %vm239_vm1, %v234_v28  ;;  %v675_v28 = vpack.c.bf16 %v461_v26, %v459_v24 }
  0x8b   : > { %v824_v34 = vld [vmem:[#allocation2] sm:$0xff]  ;;  %v318_v35 = vpop.permute.xlu0 %317 }
  0x8c   : > { %v261_v39 = vmul.f32 %v259_v22, %v824_v34  ;;  %v320_v41 = vmul.f32 %v318_v35, %v824_v34  ;;  %v299_v42 = vmul.f32 %v636_v36, %v824_v34  ;;  %v282_v51 = vmul.f32 %v280_v30, %v824_v34 }
  0x8d   : > { %v364_v56 = vmul.f32 %v639_v45, %v824_v34  ;;  %v344_v57 = vmul.f32 %v342_v48, %v824_v34  ;;  %v409_v27 = vmul.f32 %v407_v17, %v824_v34 }
  0x8e   : > { %265 = vrot.lane.b32.xlu0 %v261_v39, %s715_s26  ;;  %v324_v58 = vrot.slane %v320_v41, 1  ;;  %v304_v60 = vrot.slane %v299_v42, 1 }
  0x8f   : > { %v845_v46 = vld [vmem:[#allocation2 + $0x8] sm:$0xff]  ;;  %v383_v50 = vpop.permute.xlu0 %382  ;;  %v369_v10 = vrot.slane %v364_v56, 2  ;;  %v348_v14 = vrot.slane %v344_v57, 1  ;;  %v413_v31 = vrot.slane %v409_v27, 2 }
  0x90   : > { %v321_v49 = vmul.f32 %v318_v35, %v845_v46  ;;  %v262_v54 = vmul.f32 %v259_v22, %v845_v46  ;;  %v345_v55 = vmul.f32 %v342_v48, %v845_v46  ;;  %v385_v63 = vmul.f32 %v383_v50, %v824_v34  ;;  %v460_v22 = vld [vmem:[%s938_s3 + $0xc8] sm:$0xff] }
  0x91   : > { %v869_v0 = vmul.f32 %v636_v36, %v845_v46  ;;  %v872_v2 = vmul.f32 %v639_v45, %v845_v46  ;;  %v386_v5 = vmul.f32 %v383_v50, %v845_v46  ;;  %v283_v6 = vmul.f32 %v280_v30, %v845_v46 }
  0x92   : > { %v325_v59 = vrot.slane %v321_v49, 1  ;;  %286 = vrot.lane.b32.xlu0 %v282_v51, %s716_s12  ;;  %267 = vrot.lane.b32.xlu1 %v262_v54, %s715_s26  ;;  %v349_v8 = vrot.slane %v345_v55, 1  ;;  %v410_v18 = vmul.f32 %v407_v17, %v845_v46  ;;  %v389_v19 = vrot.slane %v385_v63, 2 }
  0x93   : > { %v305_v9 = vrot.slane %v869_v0, 1  ;;  %v370_v11 = vrot.slane %v872_v2, 2  ;;  %v390_v20 = vrot.slane %v386_v5, 2  ;;  %v673_v25 = vpack.c.bf16 %v462_v23, %v460_v22 }
  0x94   : > { %v326_v7 = vsel %vm303_vm2, %v324_v58, %v325_v59  ;;  %v350_v21 = vsel %vm303_vm2, %v348_v14, %v349_v8  ;;  %v414_v29 = vrot.slane %v410_v18, 2  ;;  %v248_v36 = vmul.f32 %v633_v33, %v824_v34 }
  0x95   : > { %v306_v15 = vsel %vm303_vm2, %v304_v60, %v305_v9  ;;  %v371_v16 = vsel %vm368_vm3, %v369_v10, %v370_v11  ;;  %674 = vmatprep.subr.bf16.mxu0 %v673_v25  ;;  %683 = vmatprep.subr.bf16.mxu1 %v673_v25  ;;  %v391_v30 = vsel %vm368_vm3, %v389_v19, %v390_v20  ;;  %v465_v2 = vlaneseq }
  0x96   : > { %327 = vrot.lane.b32.xlu0 %v326_v7, %s715_s26  ;;  %288 = vrot.lane.b32.xlu1 %v283_v6, %s716_s12  ;;  %v415_v32 = vsel %vm368_vm3, %v413_v31, %v414_v29  ;;  %v249_v41 = vmul.f32 %v633_v33, %v845_v46  ;;  %v642_v46 = vld [vmem:[%s937_s2] ss:$0 sm:$0xff] }
  0x97   : > { %676 = vmatpush1.bf16.msra.mxu0 %v675_v28  ;;  %690 = vmatpush1.bf16.msra.mxu1 %v675_v28  ;;  %v466_v6 = vshrl.u32 %v465_v2, 7 }
  0x99   : > { %v467_v7 = vsub.s32 0, %v466_v6 }
  0x9a   : > { %351 = vrot.lane.b32.xlu0 %v350_v21, %s716_s12  ;;  %329 = vrot.lane.b32.xlu1 %v325_v59, %s715_s26 }
  0x9e   : > { %392 = vrot.lane.b32.xlu0 %v391_v30, %s715_s26  ;;  %353 = vrot.lane.b32.xlu1 %v349_v8, %s716_s12  ;;  %v463_v8 = vld [vmem:[%s939_s4] sm:$0x3] }
  0x9f   : > { %v468_v10 = vrot.slane %v463_v8, %v467_v7 }
  0xa2   : > { %416 = vrot.lane.b32.xlu0 %v415_v32, %s716_s12  ;;  %394 = vrot.lane.b32.xlu1 %v390_v20, %s715_s26 }
  0xa6   : > { %418 = vrot.lane.b32.xlu1 %v414_v29, %s716_s12  ;;  %s648_s12 = sshll.u32 %s942_s19, 5 }
  0xa7   : > { %s224_s15 = scalar_lea.vmem %s940_s5, %s648_s12 }
 0x100   : > { %v266_v35 = vpop.permute.xlu0 %265 }
 0x101   : > { %v271_v37 = vadd.f32 %v266_v35, %v248_v36 }
 0x104   : > { %v287_v38 = vpop.permute.xlu0 %286  ;;  %v268_v39 = vpop.permute.xlu1 %267 }
 0x105   : > { %v292_v40 = vadd.f32 %v287_v38, %v271_v37  ;;  %v272_v43 = vadd.f32 %v268_v39, %v249_v41 }
 0x107   : > { %v309_v42 = vadd.f32 %v306_v15, %v292_v40 }
 0x108   : > { %v328_v44 = vpop.permute.xlu0 %327  ;;  %v289_v45 = vpop.permute.xlu1 %288 }
 0x109   : > { %v293_v47 = vadd.f32 %v289_v45, %v272_v43  ;;  %v333_v48 = vadd.f32 %v328_v44, %v309_v42 }
 0x10b   : > { %v310_v49 = vadd.f32 %v305_v9, %v293_v47  ;;  %v471_v9 = vsub.s32 1, %v466_v6 }
 0x10c   : > { %v352_v50 = vpop.permute.xlu0 %351  ;;  %v330_v51 = vpop.permute.xlu1 %329 }
 0x10d   : > { %v357_v52 = vadd.f32 %v352_v50, %v333_v48  ;;  %v334_v54 = vadd.f32 %v330_v51, %v310_v49 }
 0x10f   : > { %v374_v53 = vadd.f32 %v371_v16, %v357_v52 }
 0x110   : > { %v393_v55 = vpop.permute.xlu0 %392  ;;  %v354_v34 = vpop.permute.xlu1 %353 }
 0x111   : > { %v358_v56 = vadd.f32 %v354_v34, %v334_v54  ;;  %v398_v57 = vadd.f32 %v393_v55, %v374_v53 }
 0x113   : > { %v375_v58 = vadd.f32 %v370_v11, %v358_v56  ;;  %v472_v11 = vrot.slane %v463_v8, %v471_v9 }
 0x114   : > { %v417_v59 = vpop.permute.xlu0 %416  ;;  %v395_v60 = vpop.permute.xlu1 %394 }
 0x115   : > { %v422_v61 = vadd.f32 %v417_v59, %v398_v57  ;;  %v399_v63 = vadd.f32 %v395_v60, %v375_v58 }
 0x117   : > { %v431_v62 = vadd.f32 %v642_v46, %v422_v61 }
 0x118   : > { %v419_v1 = vpop.permute.xlu1 %418 }
 0x119   : > { %v433_v0 = vmax.f32 %v431_v62, 0.0  ;;  %v423_v3 = vadd.f32 %v419_v1, %v399_v63 }
 0x11b   : > { %643 = vmatmul.mubr.msk.f32.vlgmr.msra.gmra.mrb[0].mxu0 %vm475_vm4, %v433_v0  ;;  %v432_v4 = vadd.f32 %v642_v46, %v423_v3 }
 0x11d   : > { %v434_v5 = vmax.f32 %v432_v4, 0.0 }
 0x11f   : > { %644 = vmatmul.mubr.msk.f32.vlgmr.msra.gmra.mrb[0].mxu1 %vm475_vm4, %v434_v5 }
 0x1ee   : > { %v548_v12 = vpop.f32.mrb[0].mxu0 }
 0x1ef   : > { %v549_v13 = vadd.f32 %v548_v12, %v468_v10  ;;  %v550_v14 = vpop.f32.mrb[1].mxu0 }
 0x1f0   : > { %v551_v15 = vadd.f32 %v550_v14, %v472_v11 }
 0x1f1   : > { %v559_v16 = vmax.f32 %v549_v13, 0.0 }
 0x1f2   : > { %v560_v17 = vmax.f32 %v551_v15, 0.0  ;;  %v554_v18 = vpop.f32.mrb[0].mxu1 }
 0x1f3   : > { %563 = vst [vmem:[%s224_s15] sm:$0xff] %v559_v16  ;;  %v555_v19 = vadd.f32 %v554_v18, %v468_v10  ;;  %v556_v20 = vpop.f32.mrb[1].mxu1 }
 0x1f4   : > { %565 = vst.msk [vmem:[%s224_s15 + $0x8] sm:$0xff] %vm564_vm5, %v560_v17  ;;  %v557_v21 = vadd.f32 %v556_v20, %v472_v11 }
 0x1f5   : > { %v561_v22 = vmax.f32 %v555_v19, 0.0 }
 0x1f6   : > { %v562_v23 = vmax.f32 %v557_v21, 0.0 }
 0x1f7   : > { %566 = vst [vmem:[%s224_s15 + $0x10] sm:$0x3f] %v561_v22 }
 0x1f8   : > { %568 = vst.msk [vmem:[%s224_s15 + $0x18] sm:$0x3f] %vm567_vm6, %v562_v23 }
 0x1f9 PF: > { %s15_s18 = sadd.s32 1, %s710_s18  }
 0x1fa   : > { %p12_p4 = scmp.ge.s32.totalorder %s15_s18, 4  }
 0x1fc   :  { %14 = sbr.rel (!%p12_p4) target bundleno = 1 (0x1), region = 70 }

// kernel: _lambda_.5
= control target key start
LH: loop header
LB: loop body
LE: loop exit
PB: predicated region body
PF: predicated region fallthrough
CT: control target
= control target key end

     0   :  { %8 = vsyncpa [#allocation3], 0  ;;  %s2222_s12 = smov 0   ;;  %s2441_s0 = inlined_call_operand.vmem [shape: f32[2,29,87], index: 0, kind: input, shape index: {}]   ;;  %s2442_s1 = inlined_call_operand.hbm [shape: f32[9,81,112], index: 1, kind: input, shape index: {}]   ;;  %s2443_s2 = inlined_call_operand.vmem [shape: f32[1,112], index: 2, kind: input, shape index: {}]   ;;  %s2444_s3 = inlined_call_operand.vmem [shape: f32[2,14,112], index: 3, kind: output, shape index: {}]  }
   0x1 LB: > { %s2228_s13 = sadd.s32 4294967295, %s2193_s12   ;;  %p1440_p0 = scmp.ge.s32.totalorder %s2193_s12, 1  ;;  %s2193_s12 = sphi %s2222_s12, %s14_s12  }
   0x2   : > { %p113_p1 = scmp.lt.s32.totalorder %s2193_s12, 3  ;;  %s2195_s14 = smov [#allocation2]  }
   0x3   : > { %s125_s15 = sshll.u32 %s2195_s14, 4  ;;  %p2445_p3 = scmp.eq.s32.totalorder %s2228_s13, 0  ;;  %s126_s15 = int_to_ptr.vmem [resolvable:$true] %s125_s15 }
   0x4   : > { %p2232_p2 = pnand %p1440_p0, %p113_p1  ;;  %s2155_s20 = scalar_lea.hbm %s2442_s1, 12672 }
   0x5   : > { %p2156_p6 = scmp.ne.s32.totalorder %s2442_s1, %s2155_s20  ;;  %p2162_p10 = scmp.lt.u32.totalorder %s2155_s20, %s2442_s1 }
   0x6   : > { %s2447_s16 = scalar_select %p2232_p2, 1, 0 }
   0x7   : > { %p2134_p4 = pneg %p2232_p2 }
   0x9   : > { %p2241_p5 = pnand %p2445_p3, %p2134_p4 }
   0xb   : > { %p2157_p7 = pneg %p2241_p5 }
   0xd   : > { %p2158_p8 = pnand %p2157_p7, %p2156_p6 }
   0xf   : > { %p2159_p9 = pneg %p2158_p8 }
  0x11   : > { %p2164_p11 = pnand %p2162_p10, %p2159_p9 }
  0x13   : > { %2167 = shalt.err (!%p2164_p11)
}
  0x14   : > { %s2168_s25 = scalar_lea.vmem %s126_s15, 12672  ;;  %p2176_p1 = scmp.lt.s32.totalorder %s126_s15, %s126_s15 }
  0x15   : > { %p2169_p12 = scmp.ne.s32.totalorder %s126_s15, %s2168_s25  ;;  %p2177_p4 = scmp.lt.s32.totalorder %s2168_s25, %s2168_s25 }
  0x17   : > { %p2171_p13 = pnand %p2169_p12, %p2157_p7  ;;  %p2178_p3 = por %p2177_p4, %p2176_p1 }
  0x19   : > { %p2172_p0 = pneg %p2171_p13 }
  0x1b   : > { %p2179_p2 = pnand %p2178_p3, %p2172_p0 }
  0x1d   : > { %2182 = shalt.err (!%p2179_p2)
}
  0x1e   : > { %s2196_s26 = smov 128   ;;  %s2197_s27 = smov 8  }
  0x1f   : > { %2137 = dma.hbm_to_vmem [thread:$0]  (!%p2241_p5), %s2442_s1, 12672, %s126_s15, [#allocation3], %s2196_s26, %s2196_s26, %s2197_s27  }
  0x20   : > { %p2449_p6 = scmp.ne.s32.totalorder %s2447_s16, 0 }
  0x21   : > { %p2450_p8 = scmp.eq.s32.totalorder (!%p2449_p6), %s2228_s13, 0 }
  0x22   : > { %152 = sbr.rel (%p2449_p6) target bundleno = 701 (0x2bd), region = 32 }
  0x29   : > { %2188 = dma.done.wait (%p2450_p8), [#allocation3], 12672   ;;  %p2451_p7 = pmov %p2450_p8 }
  0x2a   : > { %p176_p2 = scmp.lt.s32.totalorder %s2228_s13, 1  ;;  %vm551_vm0 = vcmask 1046528   ;;  %v660_v8 = vld [vmem:[#allocation2 + $0x160] sm:$0xff]  ;;  %v661_v9 = vld [vmem:[#allocation2 + $0x168] sm:$0xff]  ;;  %v662_v12 = vld [vmem:[#allocation2 + $0x170] sm:$0xff]  ;;  %s2198_s7 = smov 125  }
  0x2b   : > { %2190 = vsyncadd (%p2451_p7), [#allocation3], 4294954624  ;;  %v1988_v11 = vpack.c.bf16 %v661_v9, %v660_v8  ;;  %v663_v13 = vld [vmem:[#allocation2 + $0x178] sm:$0xff]  ;;  %v203_v15 = vld [vmem:[#allocation2 + $0x60] sm:$0xff]  ;;  %s2199_s8 = smov 122   ;;  %vm234_vm1 = vcmask 1040384  }
  0x2c   : > { %s2453_s13 = smov (!%p176_p2, %s2228_s13), 1  ;;  %v202_v14 = vld [vmem:[#allocation2 + $0x58] sm:$0xff]  ;;  %v664_v16 = vld [vmem:[#allocation2 + $0x180] sm:$0xff]  ;;  %v665_v17 = vld [vmem:[#allocation2 + $0x188] sm:$0xff]  ;;  %v1992_v20 = vpack.c.bf16 %v663_v13, %v662_v12  ;;  %vm911_vm2 = vcmask 1045504   ;;  %vm225_vm3 = vcmask 662528  }
  0x2d   : > { %s1502_s30 = sshll.u32 %s2453_s13, 5  ;;  %1989 = vmatprep.subr.bf16.mxu0 %v1988_v11  ;;  %v1908_v21 = vpack.c.bf16 %v203_v15, %v202_v14  ;;  %v204_v22 = vld [vmem:[#allocation2 + $0x68] sm:$0xff]  ;;  %v205_v23 = vld [vmem:[#allocation2 + $0x70] sm:$0xff]  ;;  %v1996_v25 = vpack.c.bf16 %v665_v17, %v664_v16  ;;  %v206_v26 = vld [vmem:[#allocation2 + $0x78] sm:$0xff]  ;;  %vm1279_vm5 = vcmask 220160   ;;  %vm1286_vm7 = vcmask 1042432  }
  0x2e   : > { %s180_s6 = scalar_lea.vmem %s2441_s0, %s1502_s30  ;;  %1991 = vmatpush3.bf16.msra.mxu0 %v1988_v11  ;;  %v1912_v24 = vpack.c.bf16 %v205_v23, %v204_v22  ;;  %v207_v27 = vld [vmem:[#allocation2 + $0x80] sm:$0xff]  ;;  %v666_v28 = vld [vmem:[#allocation2 + $0x190] sm:$0xff]  ;;  %v667_v29 = vld [vmem:[#allocation2 + $0x198] sm:$0xff]  ;;  %vm2201_vm8 = vmmov 1   ;;  %s1503_s11 = sshll.u32 %s2453_s13, 4  ;;  %vm1369_vm10 = vcmask 914432  }
  0x2f   : > { %v2275_v0 = vld [vmem:[%s180_s6] sm:$0xff]  ;;  %v2277_v1 = vld [vmem:[%s180_s6 + $0x8] sm:$0xff]  ;;  %v2279_v2 = vld [vmem:[%s180_s6 + $0x10] sm:$0xff]  ;;  %1993 = vmatprep.subr.bf16.mxu0 %v1992_v20  ;;  %1909 = vmatprep.subr.bf16.mxu1 %v1908_v21  ;;  %v1916_v30 = vpack.c.bf16 %v207_v27, %v206_v26  ;;  %v2000_v31 = vpack.c.bf16 %v667_v29, %v666_v28  ;;  %s185_s16 = scalar_lea.vmem %s2444_s3, %s1503_s11  ;;  %vm1367_vm11 = vcmask 916480  }
  0x30   : > { %v552_v3 = vrot.slane %v2275_v0, 1  ;;  %v553_v4 = vrot.slane %v2277_v1, 1  ;;  %v555_v5 = vrot.slane %v2279_v2, 1  ;;  %v2284_v6 = vld [vmem:[%s180_s6 + $0x18] sm:$0x1f]  ;;  %1911 = vmatpush3.bf16.msra.mxu1 %v1908_v21  ;;  %v208_v32 = vld [vmem:[#allocation2 + $0x88] sm:$0xff]  ;;  %vm2093_vm9 = vmpackc.low %vm1286_vm7, %vm2201_vm8 }
  0x31   : > { %v2287_v7 = vrot.slane %v2284_v6, 1  ;;  %1913 = vmatprep.subr.bf16.mxu1 %v1912_v24  ;;  %v209_v33 = vld [vmem:[#allocation2 + $0x90] sm:$0xff]  ;;  %v668_v34 = vld [vmem:[#allocation2 + $0x1a0] sm:$0xff]  ;;  %v669_v35 = vld [vmem:[#allocation2 + $0x1a8] sm:$0xff]  ;;  %v912_v44 = vrot.slane %v2275_v0, 2  ;;  %v913_v45 = vrot.slane %v2277_v1, 2 }
  0x32   : > { %v2290_v10 = vsel %vm551_vm0, %v552_v3, %v553_v4  ;;  %v2297_v18 = vsel %vm551_vm0, %v553_v4, %v555_v5  ;;  %1995 = vmatpush3.bf16.msra.mxu0 %v1992_v20  ;;  %v1920_v36 = vpack.c.bf16 %v209_v33, %v208_v32  ;;  %v2004_v37 = vpack.c.bf16 %v669_v35, %v668_v34  ;;  %v210_v38 = vld [vmem:[#allocation2 + $0x98] sm:$0xff]  ;;  %v211_v39 = vld [vmem:[#allocation2 + $0xa0] sm:$0xff]  ;;  %v670_v41 = vld [vmem:[#allocation2 + $0x1b0] sm:$0x1] }
  0x33   : > { %671 = vrot.lane.b32.xlu0 %v2290_v10, %s2198_s7  ;;  %677 = vrot.lane.b32.xlu1 %v2287_v7, %s2198_s7  ;;  %v2301_v19 = vsel %vm551_vm0, %v555_v5, %v2287_v7  ;;  %v1924_v40 = vpack.c.bf16 %v211_v39, %v210_v38  ;;  %v780_v42 = vld [vmem:[#allocation2 + $0x1b8] sm:$0xff]  ;;  %v781_v43 = vld [vmem:[#allocation2 + $0x1c0] sm:$0xff]  ;;  %v212_v47 = vld [vmem:[#allocation2 + $0xa8] sm:$0x1]  ;;  %v2327_v50 = vsel %vm911_vm2, %v912_v44, %v913_v45  ;;  %v915_v51 = vrot.slane %v2279_v2, 2 }
  0x34   : > { %1997 = vmatprep.subr.bf16.mxu0 %v1996_v25  ;;  %1915 = vmatpush3.bf16.msra.mxu1 %v1912_v24  ;;  %v2008_v46 = vpack.c.bf16 %v781_v43, %v780_v42  ;;  %v190_v48 = vld [vmem:[#allocation2] sm:$0xff]  ;;  %v191_v49 = vld [vmem:[#allocation2 + $0x8] sm:$0xff]  ;;  %v2340_v54 = vrot.slane %v2284_v6, 2  ;;  %v783_v58 = vld [vmem:[#allocation2 + $0x1d0] sm:$0xff] }
  0x35   : > { %1917 = vmatprep.subr.bf16.mxu1 %v1916_v30  ;;  %v1928_v52 = vpack.c.bf16 %v191_v49, %v190_v48  ;;  %v2337_v53 = vsel %vm911_vm2, %v913_v45, %v915_v51  ;;  %v782_v57 = vld [vmem:[#allocation2 + $0x1c8] sm:$0xff]  ;;  %v784_v62 = vld [vmem:[#allocation2 + $0x1d8] sm:$0xff]  ;;  %v785_v63 = vld [vmem:[#allocation2 + $0x1e0] sm:$0xff] }
  0x36   : > { %1999 = vmatpush3.bf16.msra.mxu0 %v1996_v25  ;;  %v2349_v55 = vsel %vm911_vm2, %v915_v51, %v2340_v54  ;;  %v2012_v60 = vpack.c.bf16 %v783_v58, %v782_v57  ;;  %v2016_v4 = vpack.c.bf16 %v785_v63, %v784_v62  ;;  %v192_v5 = vld [vmem:[#allocation2 + $0x10] sm:$0xff]  ;;  %v193_v9 = vld [vmem:[#allocation2 + $0x18] sm:$0xff]  ;;  %v786_v11 = vld [vmem:[#allocation2 + $0x1e8] sm:$0xff] }
  0x37   : > { %673 = vrot.lane.b32.xlu0 %v2297_v18, %s2198_s7  ;;  %675 = vrot.lane.b32.xlu1 %v2301_v19, %s2198_s7  ;;  %v787_v12 = vld [vmem:[#allocation2 + $0x1f0] sm:$0xff]  ;;  %v1932_v14 = vpack.c.bf16 %v193_v9, %v192_v5  ;;  %v194_v16 = vld [vmem:[#allocation2 + $0x20] sm:$0xff]  ;;  %v195_v20 = vld [vmem:[#allocation2 + $0x28] sm:$0xff] }
  0x38   : > { %2001 = vmatprep.subr.bf16.mxu0 %v2000_v31  ;;  %1919 = vmatpush3.bf16.msra.mxu1 %v1916_v30  ;;  %v2020_v15 = vpack.c.bf16 %v787_v12, %v786_v11  ;;  %v788_v21 = vld [vmem:[#allocation2 + $0x1f8] sm:$0xff]  ;;  %v789_v22 = vld [vmem:[#allocation2 + $0x200] sm:$0xff]  ;;  %v1936_v23 = vpack.c.bf16 %v195_v20, %v194_v16  ;;  %v196_v25 = vld [vmem:[#allocation2 + $0x30] sm:$0xff] }
  0x39   : > { %1921 = vmatprep.subr.bf16.mxu1 %v1920_v36  ;;  %v2024_v24 = vpack.c.bf16 %v789_v22, %v788_v21  ;;  %v197_v26 = vld [vmem:[#allocation2 + $0x38] sm:$0xff]  ;;  %v790_v30 = vld [vmem:[#allocation2 + $0x208] sm:$0x1]  ;;  %v198_v34 = vld [vmem:[#allocation2 + $0x40] sm:$0xff] }
  0x3a   : > { %2003 = vmatpush3.bf16.msra.mxu0 %v2000_v31  ;;  %v1940_v29 = vpack.c.bf16 %v197_v26, %v196_v25  ;;  %v900_v31 = vld [vmem:[#allocation2 + $0x210] sm:$0xff]  ;;  %v901_v32 = vld [vmem:[#allocation2 + $0x218] sm:$0xff]  ;;  %v199_v35 = vld [vmem:[#allocation2 + $0x48] sm:$0xff] }
  0x3b   : > { %217 = vrot.lane.b32.xlu0 %v2275_v0, %s2198_s7  ;;  %791 = vrot.lane.b32.xlu1 %v2290_v10, %s2199_s8  ;;  %v2028_v39 = vpack.c.bf16 %v901_v32, %v900_v31  ;;  %v904_v42 = vld [vmem:[#allocation2 + $0x230] sm:$0xff]  ;;  %v905_v43 = vld [vmem:[#allocation2 + $0x238] sm:$0xff]  ;;  %v422_v49 = vld [vmem:[#allocation2 + $0xc0] sm:$0xff] }
  0x3c   : > { %2005 = vmatprep.subr.bf16.mxu0 %v2004_v37  ;;  %1923 = vmatpush3.bf16.msra.mxu1 %v1920_v36  ;;  %v902_v36 = vld [vmem:[#allocation2 + $0x220] sm:$0xff]  ;;  %v200_v44 = vld [vmem:[#allocation2 + $0x50] sm:$0x1]  ;;  %v2036_v48 = vpack.c.bf16 %v905_v43, %v904_v42  ;;  %v909_v62 = vld [vmem:[#allocation2 + $0x258] sm:$0xff] }
  0x3d   : > { %1925 = vmatprep.subr.bf16.mxu1 %v1924_v40  ;;  %v420_v45 = vld [vmem:[#allocation2 + $0xb0] sm:$0xff]  ;;  %v906_v51 = vld [vmem:[#allocation2 + $0x240] sm:$0xff]  ;;  %v1020_v9 = vld [vmem:[#allocation2 + $0x268] sm:$0xff] }
  0x3e   : > { %2007 = vmatpush3.bf16.msra.mxu0 %v2004_v37  ;;  %v903_v37 = vld [vmem:[#allocation2 + $0x228] sm:$0xff]  ;;  %v1021_v11 = vld [vmem:[#allocation2 + $0x270] sm:$0xff]  ;;  %v430_v22 = vld [vmem:[#allocation2 + $0x100] sm:$0x1] }
  0x3f   : > { %219 = vrot.lane.b32.xlu0 %v2277_v1, %s2198_s7  ;;  %793 = vrot.lane.b32.xlu1 %v2297_v18, %s2199_s8  ;;  %v428_v12 = vld [vmem:[#allocation2 + $0xf0] sm:$0xff]  ;;  %v542_v26 = vld [vmem:[#allocation2 + $0x118] sm:$0xff] }
  0x40   : > { %1777 = vmatprep.subr.msk.mxu0 %vm234_vm1, %v670_v41  ;;  %1927 = vmatpush3.bf16.msra.mxu1 %v1924_v40  ;;  %v1944_v40 = vpack.c.bf16 %v199_v35, %v198_v34  ;;  %v1025_v20 = vld [vmem:[#allocation2 + $0x290] sm:$0xff]  ;;  %v544_v34 = vld [vmem:[#allocation2 + $0x128] sm:$0xff]  ;;  %v1030_v43 = vld [vmem:[#allocation2 + $0x2b8] sm:$0x1] }
  0x41   : > { %1665 = vmatprep.subr.msk.mxu1 %vm234_vm1, %v212_v47  ;;  %v1028_v35 = vld [vmem:[#allocation2 + $0x2a8] sm:$0xff] }
  0x42   : > { %1778 = vmatpush3.msk.msra.mxu0 %vm234_vm1, %v670_v41  ;;  %v2032_v41 = vpack.c.bf16 %v903_v37, %v902_v36  ;;  %v1029_v36 = vld [vmem:[#allocation2 + $0x2b0] sm:$0xff] }
  0x43   : > { %221 = vrot.lane.b32.xlu0 %v2279_v2, %s2198_s7  ;;  %795 = vrot.lane.b32.xlu1 %v2301_v19, %s2199_s8 }
  0x44   : > { %2009 = vmatprep.subr.bf16.mxu0 %v2008_v46  ;;  %1666 = vmatpush3.msk.msra.mxu1 %vm234_vm1, %v212_v47 }
  0x45   : > { %1929 = vmatprep.subr.bf16.mxu1 %v1928_v52 }
  0x47   : > { %223 = vrot.lane.b32.xlu0 %v2284_v6, %s2198_s7  ;;  %797 = vrot.lane.b32.xlu1 %v2287_v7, %s2199_s8 }
  0x4b   : > { %431 = vrot.lane.b32.xlu0 %v2275_v0, %s2199_s8  ;;  %1031 = vrot.lane.b32.xlu1 %v2327_v50, %s2198_s7 }
  0x4f   : > { %433 = vrot.lane.b32.xlu0 %v2277_v1, %s2199_s8  ;;  %1033 = vrot.lane.b32.xlu1 %v2337_v53, %s2198_s7 }
  0x53   : > { %435 = vrot.lane.b32.xlu0 %v2279_v2, %s2199_s8  ;;  %1035 = vrot.lane.b32.xlu1 %v2349_v55, %s2198_s7 }
  0x57   : > { %437 = vrot.lane.b32.xlu0 %v2284_v6, %s2199_s8  ;;  %1037 = vrot.lane.b32.xlu1 %v2340_v54, %s2198_s7 }
  0x5b   : > { %1151 = vrot.lane.b32.xlu0 %v2327_v50, %s2199_s8  ;;  %1153 = vrot.lane.b32.xlu1 %v2337_v53, %s2199_s8 }
  0x5f   : > { %1155 = vrot.lane.b32.xlu0 %v2349_v55, %s2199_s8  ;;  %1157 = vrot.lane.b32.xlu1 %v2340_v54, %s2199_s8 }
  0xa5   : > { %v672_v56 = vpop.permute.xlu0 %671  ;;  %v678_v59 = vpop.permute.xlu1 %677 }
  0xa6   : > { %1779 = vmatprep.mubr.msk.f32.mxu0 %vm225_vm3, %v672_v56 }
  0xa9   : > { %v674_v61 = vpop.permute.xlu0 %673  ;;  %v676_v3 = vpop.permute.xlu1 %675 }
  0xaa   : > { %1780 = vmatmul.mubr.msk.f32.vlgmr.msra.gmra.mrb[0].mxu0 %vm225_vm3, %v674_v61  ;;  %v908_v61 = vld [vmem:[#allocation2 + $0x250] sm:$0xff] }
  0xab   : > { %2011 = vmatpush3.bf16.msra.mxu0 %v2008_v46  ;;  %1782 = vmatprep.mubr.msk.f32.mxu0 %vm225_vm3, %v676_v3  ;;  %v421_v46 = vld [vmem:[#allocation2 + $0xb8] sm:$0xff]  ;;  %v2044_v3 = vpack.c.bf16 %v909_v62, %v908_v61  ;;  %v1146_v62 = vld [vmem:[#allocation2 + $0x2f0] sm:$0xff] }
  0xac   : > { %2013 = vmatprep.subr.bf16.mxu0 %v2012_v60  ;;  %v1948_v56 = vpack.c.bf16 %v421_v46, %v420_v45  ;;  %v1141_v45 = vld [vmem:[#allocation2 + $0x2c8] sm:$0xff] }
  0xad   : > { %v218_v8 = vpop.permute.xlu0 %217  ;;  %v792_v13 = vpop.permute.xlu1 %791  ;;  %v548_v46 = vld [vmem:[#allocation2 + $0x148] sm:$0xff] }
  0xae   : > { %1667 = vmatprep.mubr.msk.f32.mxu1 %vm225_vm3, %v218_v8  ;;  %1783 = vmatmul.mubr.msk.f32.gmra.mrb[2].mxu0 %vm225_vm3, %v678_v59  ;;  %v424_v59 = vld [vmem:[#allocation2 + $0xd0] sm:$0xff]  ;;  %v910_v8 = vld [vmem:[#allocation2 + $0x260] sm:$0x1] }
  0xaf   : > { %2015 = vmatpush3.bf16.msra.mxu0 %v2012_v60  ;;  %1807 = vmatprep.mubr.msk.f32.mxu0 %vm225_vm3, %v792_v13  ;;  %v425_v60 = vld [vmem:[#allocation2 + $0xd8] sm:$0xff] }
  0xb0   : > { %2017 = vmatprep.subr.bf16.mxu0 %v2016_v4  ;;  %v1956_v63 = vpack.c.bf16 %v425_v60, %v424_v59  ;;  %v429_v13 = vld [vmem:[#allocation2 + $0xf8] sm:$0xff] }
  0xb1   : > { %v220_v17 = vpop.permute.xlu0 %219  ;;  %v794_v28 = vpop.permute.xlu1 %793 }
  0xb2   : > { %1668 = vmatmul.mubr.msk.f32.vlgmr.msra.gmra.mrb[0].mxu1 %vm225_vm3, %v220_v17  ;;  %v1024_v17 = vld [vmem:[#allocation2 + $0x288] sm:$0xff] }
  0xb3   : > { %1931 = vmatpush3.bf16.msra.mxu1 %v1928_v52  ;;  %2019 = vmatpush3.bf16.msra.mxu0 %v2016_v4  ;;  %v907_v52 = vld [vmem:[#allocation2 + $0x248] sm:$0xff]  ;;  %v2056_v25 = vpack.c.bf16 %v1025_v20, %v1024_v17 }
  0xb4   : > { %1933 = vmatprep.subr.bf16.mxu1 %v1932_v14  ;;  %2021 = vmatprep.subr.bf16.mxu0 %v2020_v15  ;;  %v2040_v58 = vpack.c.bf16 %v907_v52, %v906_v51  ;;  %v427_v4 = vld [vmem:[#allocation2 + $0xe8] sm:$0xff] }
  0xb5   : > { %v222_v27 = vpop.permute.xlu0 %221  ;;  %v796_v38 = vpop.permute.xlu1 %795 }
  0xb6   : > { %1670 = vmatprep.mubr.msk.f32.mxu1 %vm225_vm3, %v222_v27 }
  0xb7   : > { %1935 = vmatpush3.bf16.msra.mxu1 %v1932_v14  ;;  %2023 = vmatpush3.bf16.msra.mxu0 %v2020_v15  ;;  %v1022_v14 = vld [vmem:[#allocation2 + $0x278] sm:$0xff]  ;;  %v1964_v15 = vpack.c.bf16 %v429_v13, %v428_v12 }
  0xb8   : > { %1937 = vmatprep.subr.bf16.mxu1 %v1936_v23  ;;  %2025 = vmatprep.subr.bf16.mxu0 %v2024_v24 }
  0xb9   : > { %v224_v33 = vpop.permute.xlu0 %223  ;;  %v798_v47 = vpop.permute.xlu1 %797 }
  0xba   : > { %1671 = vmatmul.mubr.msk.f32.gmra.mrb[2].mxu1 %vm225_vm3, %v224_v33 }
  0xbb   : > { %1939 = vmatpush3.bf16.msra.mxu1 %v1936_v23  ;;  %2027 = vmatpush3.bf16.msra.mxu0 %v2024_v24  ;;  %v540_v23 = vld [vmem:[#allocation2 + $0x108] sm:$0xff]  ;;  %v541_v24 = vld [vmem:[#allocation2 + $0x110] sm:$0xff] }
  0xbc   : > { %1941 = vmatprep.subr.bf16.mxu1 %v1940_v29  ;;  %1805 = vmatprep.subr.msk.mxu0 %vm234_vm1, %v790_v30 }
  0xbd   : > { %1695 = vmatprep.mubr.msk.f32.mxu1 %vm225_vm3, %v2275_v0  ;;  %v423_v0 = vld [vmem:[#allocation2 + $0xc8] sm:$0xff]  ;;  %v1032_v27 = vpop.permute.xlu1 %1031 }
  0xbe   : > { %v1952_v57 = vpack.c.bf16 %v423_v0, %v422_v49  ;;  %v1143_v49 = vld [vmem:[#allocation2 + $0x2d8] sm:$0xff] }
  0xbf   : > { %1943 = vmatpush3.bf16.msra.mxu1 %v1940_v29  ;;  %1806 = vmatpush3.msk.msra.mxu0 %vm234_vm1, %v790_v30  ;;  %v1026_v29 = vld [vmem:[#allocation2 + $0x298] sm:$0xff]  ;;  %v1027_v30 = vld [vmem:[#allocation2 + $0x2a0] sm:$0xff] }
  0xc0   : > { %2029 = vmatprep.subr.bf16.mxu0 %v2028_v39  ;;  %1808 = vmatmul.mubr.msk.f32.vlgmr.msra.gmra.mrb[0].mxu0 %vm225_vm3, %v794_v28  ;;  %v543_v28 = vld [vmem:[#allocation2 + $0x120] sm:$0xff]  ;;  %v2060_v33 = vpack.c.bf16 %v1027_v30, %v1026_v29 }
  0xc1   : > { %2031 = vmatpush3.bf16.msra.mxu0 %v2028_v39  ;;  %1945 = vmatprep.subr.bf16.mxu1 %v1944_v40  ;;  %v1972_v32 = vpack.c.bf16 %v543_v28, %v542_v26  ;;  %v546_v39 = vld [vmem:[#allocation2 + $0x138] sm:$0xff] }
  0xc2   : > { %2033 = vmatprep.subr.bf16.mxu0 %v2032_v41  ;;  %1810 = vmatprep.mubr.msk.f32.mxu0 %vm225_vm3, %v796_v38  ;;  %v2064_v38 = vpack.c.bf16 %v1029_v36, %v1028_v35 }
  0xc3   : > { %1947 = vmatpush3.bf16.msra.mxu1 %v1944_v40  ;;  %v547_v40 = vld [vmem:[#allocation2 + $0x140] sm:$0xff] }
  0xc4   : > { %1693 = vmatprep.subr.msk.mxu1 %vm234_vm1, %v200_v44  ;;  %1811 = vmatmul.mubr.msk.f32.gmra.mrb[2].mxu0 %vm225_vm3, %v798_v47  ;;  %v1980_v42 = vpack.c.bf16 %v547_v40, %v546_v39  ;;  %v549_v47 = vld [vmem:[#allocation2 + $0x150] sm:$0xff] }
  0xc5   : > { %2035 = vmatpush3.bf16.msra.mxu0 %v2032_v41  ;;  %1835 = vmatprep.mubr.msk.f32.mxu0 %vm225_vm3, %v2327_v50  ;;  %v426_v50 = vld [vmem:[#allocation2 + $0xe0] sm:$0xff]  ;;  %v1034_v41 = vpop.permute.xlu1 %1033  ;;  %v1984_v52 = vpack.c.bf16 %v549_v47, %v548_v46 }
  0xc6   : > { %2037 = vmatprep.subr.bf16.mxu0 %v2036_v48  ;;  %v1960_v5 = vpack.c.bf16 %v427_v4, %v426_v50  ;;  %v1148_v50 = vld [vmem:[#allocation2 + $0x300] sm:$0xff]  ;;  %v1149_v4 = vld [vmem:[#allocation2 + $0x308] sm:$0xff] }
  0xc7   : > { %1694 = vmatpush3.msk.msra.mxu1 %vm234_vm1, %v200_v44  ;;  %v1140_v44 = vld [vmem:[#allocation2 + $0x2c0] sm:$0xff] }
  0xc8   : > { %1949 = vmatprep.subr.bf16.mxu1 %v1948_v56  ;;  %1696 = vmatmul.mubr.msk.f32.vlgmr.msra.gmra.mrb[0].mxu1 %vm225_vm3, %v2277_v1  ;;  %v432_v1 = vpop.permute.xlu0 %431  ;;  %v2068_v51 = vpack.c.bf16 %v1141_v45, %v1140_v44 }
  0xc9   : > { %1951 = vmatpush3.bf16.msra.mxu1 %v1948_v56  ;;  %2039 = vmatpush3.bf16.msra.mxu0 %v2036_v48  ;;  %v1142_v48 = vld [vmem:[#allocation2 + $0x2d0] sm:$0xff]  ;;  %v1036_v0 = vpop.permute.xlu1 %1035 }
  0xca   : > { %1953 = vmatprep.subr.bf16.mxu1 %v1952_v57  ;;  %2041 = vmatprep.subr.bf16.mxu0 %v2040_v58  ;;  %v2072_v56 = vpack.c.bf16 %v1143_v49, %v1142_v48 }
  0xcb   : > { %1698 = vmatprep.mubr.msk.f32.mxu1 %vm225_vm3, %v2279_v2  ;;  %v1023_v2 = vld [vmem:[#allocation2 + $0x280] sm:$0xff] }
  0xcc   : > { %1699 = vmatmul.mubr.msk.f32.gmra.mrb[2].mxu1 %vm225_vm3, %v2284_v6  ;;  %v2048_v6 = vpack.c.bf16 %v1021_v11, %v1020_v9  ;;  %v2052_v16 = vpack.c.bf16 %v1023_v2, %v1022_v14  ;;  %v434_v21 = vpop.permute.xlu0 %433  ;;  %v2200_v2 = vmov 0.0  }
  0xcd   : > { %1955 = vmatpush3.bf16.msra.mxu1 %v1952_v57  ;;  %2043 = vmatpush3.bf16.msra.mxu0 %v2040_v58  ;;  %v1144_v57 = vld [vmem:[#allocation2 + $0x2e0] sm:$0xff]  ;;  %v1145_v58 = vld [vmem:[#allocation2 + $0x2e8] sm:$0xff]  ;;  %v1038_v59 = vpop.permute.xlu1 %1037 }
  0xce   : > { %1957 = vmatprep.subr.bf16.mxu1 %v1956_v63  ;;  %2045 = vmatprep.subr.bf16.mxu0 %v2044_v3  ;;  %v2076_v60 = vpack.c.bf16 %v1145_v58, %v1144_v57 }
  0xcf   : > { %1723 = vmatprep.mubr.msk.f32.mxu1 %vm225_vm3, %v432_v1  ;;  %v1150_v1 = vld [vmem:[#allocation2 + $0x310] sm:$0x1] }
  0xd0   : > { %v436_v31 = vpop.permute.xlu0 %435 }
  0xd1   : > { %1959 = vmatpush3.bf16.msra.mxu1 %v1956_v63  ;;  %2047 = vmatpush3.bf16.msra.mxu0 %v2044_v3  ;;  %v1147_v63 = vld [vmem:[#allocation2 + $0x2f8] sm:$0xff] }
  0xd2   : > { %1961 = vmatprep.subr.bf16.mxu1 %v1960_v5  ;;  %1833 = vmatprep.subr.msk.mxu0 %vm234_vm1, %v910_v8  ;;  %v2080_v3 = vpack.c.bf16 %v1147_v63, %v1146_v62 }
  0xd4   : > { %v438_v37 = vpop.permute.xlu0 %437 }
  0xd5   : > { %1963 = vmatpush3.bf16.msra.mxu1 %v1960_v5  ;;  %1834 = vmatpush3.msk.msra.mxu0 %vm234_vm1, %v910_v8  ;;  %v2084_v5 = vpack.c.bf16 %v1149_v4, %v1148_v50  ;;  %v1154_v8 = vpop.permute.xlu1 %1153 }
  0xd6   : > { %2049 = vmatprep.subr.bf16.mxu0 %v2048_v6  ;;  %1836 = vmatmul.mubr.msk.f32.vlgmr.msra.gmra.mrb[0].mxu0 %vm225_vm3, %v2337_v53  ;;  %v1968_v53 = vpack.c.bf16 %v541_v24, %v540_v23 }
  0xd7   : > { %2051 = vmatpush3.bf16.msra.mxu0 %v2048_v6  ;;  %1965 = vmatprep.subr.bf16.mxu1 %v1964_v15 }
  0xd8   : > { %2053 = vmatprep.subr.bf16.mxu0 %v2052_v16  ;;  %1838 = vmatprep.mubr.msk.f32.mxu0 %vm225_vm3, %v2349_v55  ;;  %v545_v55 = vld [vmem:[#allocation2 + $0x130] sm:$0xff]  ;;  %v1152_v61 = vpop.permute.xlu0 %1151 }
  0xd9   : > { %1967 = vmatpush3.bf16.msra.mxu1 %v1964_v15 }
  0xda   : > { %1721 = vmatprep.subr.msk.mxu1 %vm234_vm1, %v430_v22  ;;  %1839 = vmatmul.mubr.msk.f32.gmra.mrb[2].mxu0 %vm225_vm3, %v2340_v54  ;;  %v1976_v54 = vpack.c.bf16 %v545_v55, %v544_v34 }
  0xdb   : > { %2055 = vmatpush3.bf16.msra.mxu0 %v2052_v16  ;;  %1863 = vmatprep.mubr.msk.f32.mxu0 %vm225_vm3, %v1032_v27 }
  0xdc   : > { %2057 = vmatprep.subr.bf16.mxu0 %v2056_v25  ;;  %v1156_v9 = vpop.permute.xlu0 %1155 }
  0xdd   : > { %1722 = vmatpush3.msk.msra.mxu1 %vm234_vm1, %v430_v22 }
  0xde   : > { %1969 = vmatprep.subr.bf16.mxu1 %v1968_v53  ;;  %1724 = vmatmul.mubr.msk.f32.vlgmr.msra.gmra.mrb[0].mxu1 %vm225_vm3, %v434_v21 }
  0xdf   : > { %1971 = vmatpush3.bf16.msra.mxu1 %v1968_v53  ;;  %2059 = vmatpush3.bf16.msra.mxu0 %v2056_v25  ;;  %v1496_v53 = vld [vmem:[%s2443_s2] ss:$0 sm:$0xff] }
  0xe0   : > { %1973 = vmatprep.subr.bf16.mxu1 %v1972_v32  ;;  %2061 = vmatprep.subr.bf16.mxu0 %v2060_v33 }
  0xe1   : > { %1726 = vmatprep.mubr.msk.f32.mxu1 %vm225_vm3, %v436_v31 }
  0xe2   : > { %1727 = vmatmul.mubr.msk.f32.gmra.mrb[2].mxu1 %vm225_vm3, %v438_v37 }
  0xe3   : > { %1975 = vmatpush3.bf16.msra.mxu1 %v1972_v32  ;;  %2063 = vmatpush3.bf16.msra.mxu0 %v2060_v33 }
  0xe4   : > { %1977 = vmatprep.subr.bf16.mxu1 %v1976_v54  ;;  %2065 = vmatprep.subr.bf16.mxu0 %v2064_v38 }
  0xe5   : > { %1751 = vmatprep.mubr.msk.f32.mxu1 %vm225_vm3, %v2290_v10  ;;  %v550_v10 = vld [vmem:[#allocation2 + $0x158] sm:$0x1] }
  0xe7   : > { %1979 = vmatpush3.bf16.msra.mxu1 %v1976_v54  ;;  %2067 = vmatpush3.bf16.msra.mxu0 %v2064_v38 }
  0xe8   : > { %1981 = vmatprep.subr.bf16.mxu1 %v1980_v42  ;;  %1861 = vmatprep.subr.msk.mxu0 %vm234_vm1, %v1030_v43 }
  0xeb   : > { %1983 = vmatpush3.bf16.msra.mxu1 %v1980_v42  ;;  %1862 = vmatpush3.msk.msra.mxu0 %vm234_vm1, %v1030_v43 }
  0xec   : > { %2069 = vmatprep.subr.bf16.mxu0 %v2068_v51  ;;  %1864 = vmatmul.mubr.msk.f32.vlgmr.msra.gmra.mrb[0].mxu0 %vm225_vm3, %v1034_v41 }
  0xed   : > { %2071 = vmatpush3.bf16.msra.mxu0 %v2068_v51  ;;  %1985 = vmatprep.subr.bf16.mxu1 %v1984_v52 }
  0xee   : > { %2073 = vmatprep.subr.bf16.mxu0 %v2072_v56  ;;  %1866 = vmatprep.mubr.msk.f32.mxu0 %vm225_vm3, %v1036_v0 }
  0xef   : > { %1987 = vmatpush3.bf16.msra.mxu1 %v1984_v52 }
  0xf0   : > { %1749 = vmatprep.subr.msk.mxu1 %vm234_vm1, %v550_v10  ;;  %1867 = vmatmul.mubr.msk.f32.gmra.mrb[2].mxu0 %vm225_vm3, %v1038_v59 }
  0xf1   : > { %2075 = vmatpush3.bf16.msra.mxu0 %v2072_v56  ;;  %1891 = vmatprep.mubr.msk.f32.mxu0 %vm225_vm3, %v1152_v61 }
  0xf2   : > { %2077 = vmatprep.subr.bf16.mxu0 %v2076_v60 }
  0xf3   : > { %1750 = vmatpush3.msk.msra.mxu1 %vm234_vm1, %v550_v10 }
  0xf4   : > { %1752 = vmatmul.mubr.msk.f32.vlgmr.msra.gmra.mrb[0].mxu1 %vm225_vm3, %v2297_v18  ;;  %v1158_v18 = vpop.permute.xlu1 %1157 }
  0xf5   : > { %2079 = vmatpush3.bf16.msra.mxu0 %v2076_v60  ;;  %1754 = vmatprep.mubr.msk.f32.mxu1 %vm225_vm3, %v2301_v19  ;;  %v1259_v19 = vlaneseq }
  0xf6   : > { %2081 = vmatprep.subr.bf16.mxu0 %v2080_v3 }
  0xf7   : > { %v1260_v11 = vshrl.u32 %v1259_v19, 7  ;;  %v1263_v12 = vand.u32 127, %v1259_v19 }
  0xf8   : > { %1755 = vmatmul.mubr.msk.f32.gmra.mrb[2].mxu1 %vm225_vm3, %v2287_v7 }
  0xf9   : > { %2083 = vmatpush3.bf16.msra.mxu0 %v2080_v3  ;;  %v1261_v7 = vadd.s32 8, %v1260_v11  ;;  %v1264_v13 = vmul.u32 2, %v1260_v11 }
  0xfa   : > { %2085 = vmatprep.subr.bf16.mxu0 %v2084_v5 }
  0xfb   : > { %v1265_v14 = vmul.u32 2, %v1261_v7  ;;  %vm1266_vm4 = vcmp.eq.s32.totalorder %v1263_v12, %v1264_v13 }
  0xfc   : > { %v1494_v6 = vsel %vm1266_vm4, 1.0, %v2200_v2 }
  0xfd   : > { %2087 = vmatpush3.bf16.msra.mxu0 %v2084_v5  ;;  %vm1267_vm6 = vcmp.eq.s32.totalorder %v1263_v12, %v1265_v14  ;;  %1905 = vmatprep.mubr.msk.f32.mxu1 %vm1279_vm5, %v1494_v6 }
  0xfe   : > { %1889 = vmatprep.subr.msk.mxu0 %vm234_vm1, %v1150_v1  ;;  %v1495_v15 = vsel %vm1267_vm6, 1.0, %v2200_v2 }
 0x101   : > { %1890 = vmatpush3.msk.msra.mxu0 %vm234_vm1, %v1150_v1 }
 0x102   : > { %1892 = vmatmul.mubr.msk.f32.vlgmr.msra.gmra.mrb[0].mxu0 %vm225_vm3, %v1154_v8 }
 0x103   : > { %1894 = vmatprep.mubr.msk.f32.mxu0 %vm225_vm3, %v1156_v9 }
 0x106   : > { %1895 = vmatmul.mubr.msk.f32.gmra.mrb[2].mxu0 %vm225_vm3, %v1158_v18 }
 0x1c7   : > { %v1753_v16 = vpop.f32.mrb[0].mxu1 }
 0x1c8   : > { %v636_v17 = vpop.f32.mrb[1].mxu1 }
 0x1cb   : > { %v1756_v20 = vpop.f32.mrb[2].mxu1 }
 0x1cc   : > { %v646_v21 = vpop.f32.mrb[3].mxu1 }
 0x1d5   : > { %v1893_v22 = vpop.f32.mrb[0].mxu0 }
 0x1d6   : > { %v2098_v23 = vadd.f32 %v1893_v22, %v1753_v16  ;;  %v1236_v24 = vpop.f32.mrb[1].mxu0 }
 0x1d7   : > { %v2099_v25 = vadd.f32 %v1236_v24, %v636_v17 }
 0x1d9   : > { %v2088_v26 = vpack.c.bf16 %v2098_v23, %v2099_v25  ;;  %v1896_v27 = vpop.f32.mrb[2].mxu0 }
 0x1da   : > { %v2100_v28 = vadd.f32 %v1896_v27, %v1756_v20  ;;  %v1246_v29 = vpop.f32.mrb[3].mxu0 }
 0x1db   : > { %v2101_v30 = vadd.f32 %v1246_v29, %v646_v21  ;;  %2089 = vmatprep.subr.bf16.mxu1 %v2088_v26 }
 0x1dc   : > { %2091 = vmatpush3.bf16.msra.mxu1 %v2088_v26 }
 0x1dd   : > { %v2092_v31 = vpack.c.bf16 %v2100_v28, %v2101_v30 }
 0x1df   : > { %2094 = vmatprep.subr.msk.bf16.mxu1 %vm2093_vm9, %v2092_v31 }
 0x1e0   : > { %2097 = vmatpush3.bf16.msk.msra.mxu1 %vm2093_vm9, %v2092_v31 }
 0x1e3   : > { %1906 = vmatmul.mubr.msk.f32.vlgmr.msra.gmra.mrb[4].mxu1 %vm1279_vm5, %v1495_v15 }
 0x2b6   : > { %v1907_v32 = vpop.f32.mrb[4].mxu1 }
 0x2b7   : > { %v1362_v33 = vadd.f32 %v1907_v32, %v1496_v53  ;;  %v1356_v34 = vpop.f32.mrb[5].mxu1 }
 0x2b8   : > { %v1357_v55 = vadd.f32 %v1496_v53, %v1356_v34 }
 0x2b9   : > { %v1366_v35 = vmax.f32 %v1362_v33, 0.0 }
 0x2ba   : > { %v1365_v36 = vmax.f32 %v1357_v55, 0.0 }
 0x2bb   : > { %1370 = vst.msk [vmem:[%s185_s16 + $0x8] sm:$0x3f] %vm1369_vm10, %v1366_v35 }
 0x2bc   : > { %1368 = vst.msk [vmem:[%s185_s16] sm:$0xff] %vm1367_vm11, %v1365_v36 }
 0x2bd PF: > { %s14_s12 = sadd.s32 1, %s2193_s12  }
 0x2be   : > { %p11_p3 = scmp.ge.s32.totalorder %s14_s12, 4  }
 0x2c0   :  { %13 = sbr.rel (!%p11_p3) target bundleno = 1 (0x1), region = 75 }
 0x2c7   :  { %1392 = vsyncpa [#allocation3], 1 }
 0x2c8   :  { %1394 = vsyncpa [#allocation3 + $0x1], 1 }

// kernel: _lambda_.7
= control target key start
LH: loop header
LB: loop body
LE: loop exit
PB: predicated region body
PF: predicated region fallthrough
CT: control target
= control target key end

     0   :  { %s1111_s18 = smov 0   ;;  %s1524_s0 = inlined_call_operand.vmem [shape: f32[2,14,224], index: 0, kind: input, shape index: {}]   ;;  %s1525_s1 = inlined_call_operand.vmem [shape: f32[9,224], index: 1, kind: input, shape index: {}]   ;;  %s1526_s2 = inlined_call_operand.vmem [shape: f32[1,224], index: 2, kind: input, shape index: {}]   ;;  %s1527_s3 = inlined_call_operand.vmem [shape: f32[224,224], index: 3, kind: input, shape index: {}]   ;;  %s1528_s4 = inlined_call_operand.vmem [shape: f32[1,224], index: 4, kind: input, shape index: {}]   ;;  %s1529_s5 = inlined_call_operand.vmem [shape: f32[2,7,224], index: 5, kind: output, shape index: {}]  }
   0x1 LB: > { %s965_s19 = sadd.s32 4294967295, %s1073_s18   ;;  %p969_p0 = scmp.ge.s32.totalorder %s1073_s18, 1  ;;  %s1073_s18 = sphi %s1111_s18, %s15_s18  }
   0x2   : > { %p187_p1 = scmp.lt.s32.totalorder %s1073_s18, 3 }
   0x4   : > { %p188_p2 = pnand %p969_p0, %p187_p1 }
   0x5   : > { %v273_v0 = vlaneseq (!%p188_p2)  ;;  %p215_p3 = scmp.lt.s32.totalorder (!%p188_p2), %s965_s19, 1  ;;  %v1075_v2 = vmov (!%p188_p2), 0.0   ;;  %v974_v3 = vld [vmem:[%s1525_s1 + $0x1] ss:$8 sm:$0x3] (!%p188_p2)  ;;  %vm237_vm0 = vcmask (!%p188_p2), 1040384  }
   0x6   : > { %191 = sbr.rel (%p188_p2) target bundleno = 752 (0x2f0), region = 40  ;;  %225 = vst [vmem:[#allocation2] sm:$0xff] (!%p188_p2), %v1075_v2  ;;  %226 = vst [vmem:[#allocation2 + $0x8] sm:$0xff] (!%p188_p2), %v1075_v2  ;;  %756 = vmatprep.mubr.f32.mxu0 (!%p188_p2), %v1075_v2  ;;  %s1076_s26 = smov (!%p188_p2), 16   ;;  %vm259_vm1 = vcmask (!%p188_p2), 1047681   ;;  %vm263_vm2 = vcmask (!%p188_p2), 1046656  }
   0x7   : > { %v1120_v1 = vshrl.u32 (!%p188_p2), %v273_v0, 7  ;;  %227 = vst [vmem:[#allocation2 + $0x10] sm:$0xff] (!%p188_p2), %v1075_v2  ;;  %228 = vst [vmem:[#allocation2 + $0x18] sm:$0xff] (!%p188_p2), %v1075_v2  ;;  %v975_v18 = vld [vmem:[%s1525_s1 + $0x2] ss:$8 sm:$0x3] (!%p188_p2) }
   0x8   : > { %v977_v21 = vld [vmem:[%s1525_s1 + $0x4] ss:$8 sm:$0x3] (!%p188_p2)  ;;  %s1077_s6 = smov (!%p188_p2), 32   ;;  %vm261_vm3 = vcmask (!%p188_p2), 916481   ;;  %vm265_vm4 = vcmask (!%p188_p2), 915456  }
   0x9   : > { %v1133_v4 = vsub.s32 (!%p188_p2), 1, %v1120_v1  ;;  %v1136_v5 = vsub.s32 (!%p188_p2), 0, %v1120_v1  ;;  %v978_v24 = vld [vmem:[%s1525_s1 + $0x5] ss:$8 sm:$0x3] (!%p188_p2)  ;;  %vm252_vm5 = vcmask (!%p188_p2), 130048  }
   0xa   : > { %v980_v27 = vld [vmem:[%s1525_s1 + $0x7] ss:$8 sm:$0x3] (!%p188_p2)  ;;  %v981_v30 = vld [vmem:[%s1525_s1 + $0x10] ss:$8 sm:$0x3] (!%p188_p2) }
   0xb   : > { %v301_v6 = vrot.slane (!%p188_p2), %v974_v3, %v1133_v4  ;;  %v297_v7 = vrot.slane (!%p188_p2), %v974_v3, %v1136_v5  ;;  %v342_v19 = vrot.slane (!%p188_p2), %v975_v18, %v1136_v5  ;;  %v346_v20 = vrot.slane (!%p188_p2), %v975_v18, %v1133_v4  ;;  %v976_v43 = vld [vmem:[%s1525_s1 + $0x3] ss:$8 sm:$0x3] (!%p188_p2)  ;;  %s1078_s15 = smov (!%p188_p2), 112   ;;  %s1079_s20 = smov (!%p188_p2), 96  }
   0xc   : > { %v424_v22 = vrot.slane (!%p188_p2), %v977_v21, %v1136_v5  ;;  %v428_v23 = vrot.slane (!%p188_p2), %v977_v21, %v1133_v4  ;;  %v474_v25 = vrot.slane (!%p188_p2), %v978_v24, %v1136_v5  ;;  %v478_v26 = vrot.slane (!%p188_p2), %v978_v24, %v1133_v4  ;;  %v979_v48 = vld [vmem:[%s1525_s1 + $0x6] ss:$8 sm:$0x3] (!%p188_p2) }
   0xd   : > { %s1531_s19 = smov (!%p215_p3, %s965_s19), 1  ;;  %304 = vrot.lane.b32.xlu1 %v301_v6, %s1076_s26  ;;  %302 = vrot.lane.b32.xlu0 %v297_v7, %s1076_s26  ;;  %v560_v28 = vrot.slane %v980_v27, %v1136_v5  ;;  %v564_v29 = vrot.slane %v980_v27, %v1133_v4  ;;  %v610_v31 = vrot.slane %v981_v30, %v1136_v5  ;;  %vm351_vm6 = vcmask 261120  }
   0xe   : > { %s989_s22 = sshll.u32 %s1531_s19, 5  ;;  %v614_v32 = vrot.slane %v981_v30, %v1133_v4  ;;  %v388_v46 = vrot.slane %v976_v43, %v1136_v5  ;;  %v392_v53 = vrot.slane %v976_v43, %v1133_v4  ;;  %v524_v57 = vrot.slane %v979_v48, %v1136_v5  ;;  %s990_s24 = sshll.u32 %s1531_s19, 4 }
   0xf   : > { %s219_s25 = scalar_lea.vmem %s1524_s0, %s989_s22  ;;  %v528_v62 = vrot.slane %v979_v48, %v1133_v4  ;;  %vm403_vm7 = vcmask 1046528   ;;  %vm539_vm8 = vcmask 1045504   ;;  %vm325_vm9 = vcmask 916480   ;;  %s224_s27 = scalar_lea.vmem %s1529_s5, %s990_s24 }
  0x10   : > { %v229_v8 = vld [vmem:[%s219_s25] sm:$0xff]  ;;  %v231_v9 = vld [vmem:[%s219_s25 + $0x10] sm:$0x3f]  ;;  %v230_v10 = vld [vmem:[%s219_s25 + $0x8] sm:$0xff]  ;;  %vm371_vm10 = vcmask 785408   ;;  %vm1080_vm11 = vmmov 1  }
  0x11   : > { %v238_v11 = vrot.slane %v229_v8, 7  ;;  %v240_v12 = vrot.slane %v231_v9, 7  ;;  %v232_v13 = vld [vmem:[%s219_s25 + $0x18] sm:$0x3f]  ;;  %v239_v15 = vrot.slane %v230_v10, 7  ;;  %vm992_vm12 = vmpackc.low %vm539_vm8, %vm1080_vm11  ;;  %vm682_vm14 = vcmask 113664  }
  0x12   : > { %v242_v16 = vrot.slane %v232_v13, 7  ;;  %vm908_vm15 = vcmask 784384  }
  0x13   : > { %v241_v14 = vsel %vm237_vm0, %v238_v11, %v240_v12  ;;  %244 = vrot.lane.b32.xlu0 %v238_v11, %s1076_s26 }
  0x14   : > { %248 = vrot.lane.b32.xlu1 %v241_v14, %s1076_s26  ;;  %v243_v17 = vsel %vm237_vm0, %v239_v15, %v242_v16 }
  0x17   : > { %246 = vrot.lane.b32.xlu0 %v239_v15, %s1076_s26 }
  0x18   : > { %250 = vrot.lane.b32.xlu1 %v243_v17, %s1076_s26 }
  0x1b   : > { %347 = vrot.lane.b32.xlu0 %v342_v19, %s1077_s6 }
  0x1c   : > { %349 = vrot.lane.b32.xlu1 %v346_v20, %s1077_s6 }
  0x1f   : > { %429 = vrot.lane.b32.xlu0 %v424_v22, %s1076_s26 }
  0x20   : > { %431 = vrot.lane.b32.xlu1 %v428_v23, %s1076_s26 }
  0x23   : > { %479 = vrot.lane.b32.xlu0 %v474_v25, %s1077_s6 }
  0x24   : > { %481 = vrot.lane.b32.xlu1 %v478_v26, %s1077_s6 }
  0x27   : > { %565 = vrot.lane.b32.xlu0 %v560_v28, %s1076_s26 }
  0x28   : > { %567 = vrot.lane.b32.xlu1 %v564_v29, %s1076_s26 }
  0x2b   : > { %615 = vrot.lane.b32.xlu0 %v610_v31, %s1077_s6 }
  0x2c   : > { %617 = vrot.lane.b32.xlu1 %v614_v32, %s1077_s6 }
  0x7f   : > { %v305_v33 = vpop.permute.xlu1 %304  ;;  %v303_v34 = vpop.permute.xlu0 %302 }
  0x80   : > { %v306_v51 = vsel %vm252_vm5, %v303_v34, %v305_v33 }
  0x85   : > { %v245_v35 = vpop.permute.xlu0 %244 }
  0x86   : > { %v249_v36 = vpop.permute.xlu1 %248  ;;  %260 = vst.msk [vmem:[#allocation2] sm:$0xfe] %vm259_vm1, %v245_v35 }
  0x87   : > { %264 = vst.msk [vmem:[#allocation2 + $0x10] sm:$0x7f] %vm263_vm2, %v249_v36 }
  0x89   : > { %v247_v37 = vpop.permute.xlu0 %246 }
  0x8a   : > { %v251_v38 = vpop.permute.xlu1 %250  ;;  %v253_v39 = vsel %vm252_vm5, %v245_v35, %v247_v37 }
  0x8b   : > { %v254_v40 = vsel %vm252_vm5, %v249_v36, %v251_v38  ;;  %262 = vst.msk [vmem:[#allocation2 + $0x8] sm:$0xfe] %vm261_vm3, %v253_v39 }
  0x8c   : > { %266 = vst.msk [vmem:[#allocation2 + $0x18] sm:$0x7f] %vm265_vm4, %v254_v40 }
  0x8d   : > { %v1181_v41 = vld [vmem:[#allocation2] sm:$0xff]  ;;  %v348_v42 = vpop.permute.xlu0 %347 }
  0x8e   : > { %v309_v44 = vmul.f32 %v303_v34, %v1181_v41  ;;  %v350_v45 = vpop.permute.xlu1 %349  ;;  %v1189_v47 = vld [vmem:[#allocation2 + $0x10] sm:$0xff]  ;;  %v355_v49 = vmul.f32 %v348_v42, %v1181_v41  ;;  %v395_v59 = vmul.f32 %v388_v46, %v1181_v41  ;;  %v531_v11 = vmul.f32 %v524_v57, %v1181_v41 }
  0x8f   : > { %v1204_v56 = vmul.f32 %v388_v46, %v1189_v47  ;;  %v352_v58 = vsel %vm351_vm6, %v348_v42, %v350_v45  ;;  %v311_v61 = vmul.f32 %v303_v34, %v1189_v47  ;;  %v1219_v7 = vmul.f32 %v524_v57, %v1189_v47 }
  0x90   : > { %317 = vrot.lane.b32.xlu0 %v309_v44, %s1078_s15  ;;  %v404_v10 = vrot.slane %v395_v59, 1  ;;  %v357_v12 = vmul.f32 %v348_v42, %v1189_v47  ;;  %v540_v23 = vrot.slane %v531_v11, 2 }
  0x91   : > { %v430_v52 = vpop.permute.xlu0 %429  ;;  %v405_v6 = vrot.slane %v1204_v56, 1  ;;  %v541_v18 = vrot.slane %v1219_v7, 2 }
  0x92   : > { %v1195_v50 = vld [vmem:[#allocation2 + $0x8] sm:$0xff]  ;;  %v432_v60 = vpop.permute.xlu1 %431  ;;  %v438_v13 = vmul.f32 %v430_v52, %v1189_v47  ;;  %v436_v38 = vmul.f32 %v430_v52, %v1181_v41 }
  0x93   : > { %v1199_v54 = vld [vmem:[#allocation2 + $0x18] sm:$0xff]  ;;  %v310_v55 = vmul.f32 %v306_v51, %v1195_v50  ;;  %v356_v3 = vmul.f32 %v352_v58, %v1195_v50  ;;  %v396_v8 = vmul.f32 %v392_v53, %v1195_v50  ;;  %v1236_v19 = vsel %vm403_vm7, %v404_v10, %v405_v6 }
  0x94   : > { %363 = vrot.lane.b32.xlu0 %v355_v49, %s1079_s20  ;;  %v1213_v63 = vmul.f32 %v392_v53, %v1199_v54  ;;  %v1227_v14 = vmul.f32 %v528_v62, %v1199_v54  ;;  %v312_v17 = vmul.f32 %v306_v51, %v1199_v54  ;;  %v433_v21 = vsel %vm252_vm5, %v430_v52, %v432_v60 }
  0x95   : > { %319 = vrot.lane.b32.xlu1 %v310_v55, %s1078_s15  ;;  %v480_v9 = vpop.permute.xlu0 %479  ;;  %v407_v20 = vrot.slane %v396_v8, 1  ;;  %v532_v22 = vmul.f32 %v528_v62, %v1195_v50  ;;  %v445_v25 = vrot.slane %v438_v13, 1  ;;  %v358_v29 = vmul.f32 %v352_v58, %v1199_v54 }
  0x96   : > { %v408_v15 = vrot.slane %v1213_v63, 1  ;;  %v482_v16 = vpop.permute.xlu1 %481  ;;  %v488_v24 = vmul.f32 %v480_v9, %v1189_v47  ;;  %v544_v26 = vrot.slane %v1227_v14, 2  ;;  %v439_v30 = vmul.f32 %v433_v21, %v1199_v54 }
  0x97   : > { %v1254_v31 = vsel %vm539_vm8, %v540_v23, %v541_v18  ;;  %v543_v32 = vrot.slane %v532_v22, 2  ;;  %v483_v33 = vsel %vm351_vm6, %v480_v9, %v482_v16  ;;  %v444_v44 = vrot.slane %v436_v38, 1  ;;  %v768_v38 = vld [vmem:[%s1527_s3 + $0x28] sm:$0xff] }
  0x98   : > { %321 = vrot.lane.b32.xlu0 %v311_v61, %s1078_s15  ;;  %v1246_v28 = vsel %vm403_vm7, %v407_v20, %v408_v15  ;;  %v495_v36 = vrot.slane %v488_v24, 1  ;;  %v448_v39 = vrot.slane %v439_v30, 1  ;;  %v489_v40 = vmul.f32 %v483_v33, %v1199_v54 }
  0x99   : > { %365 = vrot.lane.b32.xlu1 %v356_v3, %s1079_s20  ;;  %v566_v27 = vpop.permute.xlu0 %565  ;;  %v1262_v37 = vsel %vm539_vm8, %v543_v32, %v544_v26  ;;  %v486_v45 = vmul.f32 %v480_v9, %v1181_v41  ;;  %v437_v49 = vmul.f32 %v433_v21, %v1195_v50  ;;  %v446_v53 = vsel %vm403_vm7, %v444_v44, %v445_v25  ;;  %v764_v32 = vld [vmem:[%s1527_s3 + $0x8] sm:$0xff]  ;;  %v769_v44 = vld [vmem:[%s1527_s3 + $0x30] sm:$0xff] }
  0x9a   : > { %v574_v34 = vmul.f32 %v566_v27, %v1189_v47  ;;  %v568_v35 = vpop.permute.xlu1 %567  ;;  %v498_v46 = vrot.slane %v489_v40, 1  ;;  %v572_v52 = vmul.f32 %v566_v27, %v1181_v41  ;;  %v487_v59 = vmul.f32 %v483_v33, %v1195_v50  ;;  %v766_v33 = vld [vmem:[%s1527_s3 + $0x18] sm:$0xff] }
  0x9b   : > { %v569_v42 = vsel %vm252_vm5, %v566_v27, %v568_v35  ;;  %v494_v51 = vrot.slane %v486_v45, 1  ;;  %v447_v58 = vrot.slane %v437_v49, 1  ;;  %v997_v35 = vpack.c.bf16 %v766_v33, %v764_v32  ;;  %v772_v45 = vld [vmem:[%s1527_s3 + $0x48] sm:$0xff] }
  0x9c   : > { %367 = vrot.lane.b32.xlu0 %v357_v12, %s1079_s20  ;;  %v581_v43 = vrot.slane %v574_v34, 2  ;;  %v575_v48 = vmul.f32 %v569_v42, %v1199_v54  ;;  %v580_v60 = vrot.slane %v572_v52, 2  ;;  %v497_v9 = vrot.slane %v487_v59, 1  ;;  %v763_v34 = vld [vmem:[%s1527_s3] sm:$0xff]  ;;  %v773_v52 = vld [vmem:[%s1527_s3 + $0x50] sm:$0xff] }
  0x9d   : > { %323 = vrot.lane.b32.xlu1 %v312_v17, %s1078_s15  ;;  %v616_v57 = vpop.permute.xlu0 %615  ;;  %v496_v8 = vsel %vm403_vm7, %v494_v51, %v495_v36  ;;  %v573_v10 = vmul.f32 %v569_v42, %v1195_v50  ;;  %v449_v11 = vsel %vm403_vm7, %v447_v58, %v448_v39  ;;  %998 = vmatprep.subr.bf16.mxu1 %v997_v35  ;;  %v771_v51 = vld [vmem:[%s1527_s3 + $0x40] sm:$0xff]  ;;  %v793_v35 = vld [vmem:[%s1527_s3 + $0xf0] sm:$0xff] }
  0x9e   : > { %v584_v55 = vrot.slane %v575_v48, 2  ;;  %v622_v61 = vmul.f32 %v616_v57, %v1181_v41  ;;  %v624_v62 = vmul.f32 %v616_v57, %v1189_v47  ;;  %v618_v3 = vpop.permute.xlu1 %617  ;;  %v582_v17 = vsel %vm539_vm8, %v580_v60, %v581_v43  ;;  %v775_v59 = vld [vmem:[%s1527_s3 + $0x60] sm:$0xff]  ;;  %v777_v60 = vld [vmem:[%s1527_s3 + $0x70] sm:$0xff] }
  0x9f   : > { %v619_v12 = vsel %vm351_vm6, %v616_v57, %v618_v3  ;;  %v583_v20 = vrot.slane %v573_v10, 2  ;;  %v499_v23 = vsel %vm403_vm7, %v497_v9, %v498_v46  ;;  %v1007_v57 = vpack.c.bf16 %v773_v52, %v771_v51  ;;  %v779_v9 = vld [vmem:[%s1527_s3 + $0x80] sm:$0xff]  ;;  %v781_v10 = vld [vmem:[%s1527_s3 + $0x90] sm:$0xff]  ;;  %v804_v52 = vld [vmem:[%s1527_s3 + $0x148] sm:$0xff] }
  0xa0   : > { %454 = vrot.lane.b32.xlu0 %v445_v25, %s1078_s15  ;;  %v630_v13 = vrot.slane %v622_v61, 2  ;;  %v631_v16 = vrot.slane %v624_v62, 2  ;;  %v623_v21 = vmul.f32 %v619_v12, %v1195_v50  ;;  %v625_v22 = vmul.f32 %v619_v12, %v1199_v54  ;;  %v780_v61 = vld [vmem:[%s1527_s3 + $0x88] sm:$0xff]  ;;  %v782_v62 = vld [vmem:[%s1527_s3 + $0x98] sm:$0xff]  ;;  %v801_v51 = vld [vmem:[%s1527_s3 + $0x130] sm:$0xff] }
  0xa1   : > { %369 = vrot.lane.b32.xlu1 %v358_v29, %s1079_s20  ;;  %v585_v29 = vsel %vm539_vm8, %v583_v20, %v584_v55  ;;  %v1011_v3 = vpack.c.bf16 %v777_v60, %v775_v59  ;;  %v786_v12 = vld [vmem:[%s1527_s3 + $0xb8] sm:$0xff]  ;;  %v785_v20 = vld [vmem:[%s1527_s3 + $0xb0] sm:$0xff]  ;;  %v808_v60 = vld [vmem:[%s1527_s3 + $0x168] sm:$0xff] }
  0xa2   : > { %v632_v24 = vsel %vm539_vm8, %v630_v13, %v631_v16  ;;  %v633_v25 = vrot.slane %v623_v21, 2  ;;  %v634_v27 = vrot.slane %v625_v22, 2  ;;  %v1015_v13 = vpack.c.bf16 %v781_v10, %v779_v9  ;;  %v788_v21 = vld [vmem:[%s1527_s3 + $0xc8] sm:$0xff]  ;;  %v790_v22 = vld [vmem:[%s1527_s3 + $0xd8] sm:$0xff]  ;;  %v805_v59 = vld [vmem:[%s1527_s3 + $0x150] sm:$0xff] }
  0xa3   : > { %v809_v9 = vld [vmem:[%s1527_s3 + $0x170] sm:$0xff]  ;;  %v812_v10 = vld [vmem:[%s1527_s3 + $0x188] sm:$0xff] }
  0xa4   : > { %504 = vrot.lane.b32.xlu0 %v495_v36, %s1079_s20  ;;  %v635_v30 = vsel %vm539_vm8, %v633_v25, %v634_v27  ;;  %v765_v36 = vld [vmem:[%s1527_s3 + $0x10] sm:$0xff]  ;;  %v787_v25 = vld [vmem:[%s1527_s3 + $0xc0] sm:$0xff] }
  0xa5   : > { %456 = vrot.lane.b32.xlu1 %v448_v39, %s1078_s15  ;;  %v770_v39 = vld [vmem:[%s1527_s3 + $0x38] sm:$0xff]  ;;  %v999_v40 = vpack.c.bf16 %v765_v36, %v763_v34  ;;  %v791_v34 = vld [vmem:[%s1527_s3 + $0xe0] sm:$0xff]  ;;  %v796_v36 = vld [vmem:[%s1527_s3 + $0x108] sm:$0xff] }
  0xa6   : > { %v1001_v42 = vpack.c.bf16 %v770_v39, %v768_v38  ;;  %v798_v38 = vld [vmem:[%s1527_s3 + $0x118] sm:$0xff]  ;;  %v1027_v39 = vpack.c.bf16 %v793_v35, %v791_v34 }
  0xa7   : > { %1000 = vmatpush1.bf16.msra.mxu1 %v999_v40  ;;  %v1029_v40 = vpack.c.bf16 %v798_v38, %v796_v36 }
  0xa8   : > { %590 = vrot.lane.b32.xlu0 %v581_v43, %s1078_s15  ;;  %v767_v43 = vld [vmem:[%s1527_s3 + $0x20] sm:$0xff]  ;;  %1002 = vmatprep.subr.bf16.mxu1 %v1001_v42 }
  0xa9   : > { %506 = vrot.lane.b32.xlu1 %v498_v46, %s1079_s20  ;;  %v774_v46 = vld [vmem:[%s1527_s3 + $0x58] sm:$0xff]  ;;  %v1003_v48 = vpack.c.bf16 %v769_v44, %v767_v43  ;;  %v795_v42 = vld [vmem:[%s1527_s3 + $0x100] sm:$0xff]  ;;  %v797_v43 = vld [vmem:[%s1527_s3 + $0x110] sm:$0xff] }
  0xaa   : > { %v1005_v49 = vpack.c.bf16 %v774_v46, %v772_v45  ;;  %v800_v44 = vld [vmem:[%s1527_s3 + $0x128] sm:$0xff]  ;;  %v802_v45 = vld [vmem:[%s1527_s3 + $0x138] sm:$0xff]  ;;  %v1031_v46 = vpack.c.bf16 %v797_v43, %v795_v42 }
  0xab   : > { %1004 = vmatpush1.bf16.msra.mxu1 %v1003_v48  ;;  %v1033_v48 = vpack.c.bf16 %v802_v45, %v800_v44 }
  0xac   : > { %450 = vrot.lane.b32.xlu0 %v446_v53, %s1078_s15  ;;  %v776_v53 = vld [vmem:[%s1527_s3 + $0x68] sm:$0xff]  ;;  %1006 = vmatprep.subr.bf16.mxu1 %v1005_v49  ;;  %v799_v49 = vld [vmem:[%s1527_s3 + $0x120] sm:$0xff] }
  0xad   : > { %592 = vrot.lane.b32.xlu1 %v584_v55, %s1078_s15  ;;  %v778_v55 = vld [vmem:[%s1527_s3 + $0x78] sm:$0xff] }
  0xae   : > { %v1009_v58 = vpack.c.bf16 %v778_v55, %v776_v53  ;;  %v806_v53 = vld [vmem:[%s1527_s3 + $0x158] sm:$0xff]  ;;  %v1035_v55 = vpack.c.bf16 %v801_v51, %v799_v49 }
  0xaf   : > { %1008 = vmatpush1.bf16.msra.mxu1 %v1007_v57  ;;  %v1037_v57 = vpack.c.bf16 %v806_v53, %v804_v52 }
  0xb0   : > { %500 = vrot.lane.b32.xlu0 %v496_v8, %s1079_s20  ;;  %1010 = vmatprep.subr.bf16.mxu1 %v1009_v58  ;;  %v1013_v8 = vpack.c.bf16 %v782_v62, %v780_v61  ;;  %v803_v58 = vld [vmem:[%s1527_s3 + $0x140] sm:$0xff]  ;;  %v810_v61 = vld [vmem:[%s1527_s3 + $0x178] sm:$0xff] }
  0xb1   : > { %452 = vrot.lane.b32.xlu1 %v449_v11, %s1078_s15  ;;  %v784_v11 = vld [vmem:[%s1527_s3 + $0xa8] sm:$0xff]  ;;  %v1039_v62 = vpack.c.bf16 %v805_v59, %v803_v58 }
  0xb3   : > { %1012 = vmatpush1.bf16.msra.mxu1 %v1011_v3  ;;  %v1041_v3 = vpack.c.bf16 %v810_v61, %v808_v60 }
  0xb4   : > { %586 = vrot.lane.b32.xlu0 %v582_v17, %s1078_s15  ;;  %1014 = vmatprep.subr.bf16.mxu1 %v1013_v8  ;;  %v783_v17 = vld [vmem:[%s1527_s3 + $0xa0] sm:$0xff] }
  0xb5   : > { %502 = vrot.lane.b32.xlu1 %v499_v23, %s1079_s20  ;;  %v1019_v23 = vpack.c.bf16 %v785_v20, %v783_v17  ;;  %v807_v8 = vld [vmem:[%s1527_s3 + $0x160] sm:$0xff]  ;;  %v813_v17 = vld [vmem:[%s1527_s3 + $0x190] sm:$0xff]  ;;  %v816_v20 = vld [vmem:[%s1527_s3 + $0x1a8] sm:$0xff] }
  0xb7   : > { %1016 = vmatpush1.bf16.msra.mxu1 %v1015_v13 }
  0xb8   : > { %636 = vrot.lane.b32.xlu0 %v632_v24, %s1079_s20  ;;  %v1021_v24 = vpack.c.bf16 %v790_v22, %v788_v21  ;;  %v818_v21 = vld [vmem:[%s1527_s3 + $0x1b8] sm:$0xff] }
  0xb9   : > { %588 = vrot.lane.b32.xlu1 %v585_v29, %s1078_s15  ;;  %v792_v29 = vld [vmem:[%s1527_s3 + $0xe8] sm:$0xff] }
  0xbc   : > { %640 = vrot.lane.b32.xlu0 %v631_v16, %s1079_s20  ;;  %v1017_v16 = vpack.c.bf16 %v786_v12, %v784_v11  ;;  %v814_v11 = vld [vmem:[%s1527_s3 + $0x198] sm:$0xff]  ;;  %v1043_v12 = vpack.c.bf16 %v809_v9, %v807_v8 }
  0xbd   : > { %638 = vrot.lane.b32.xlu1 %v635_v30, %s1079_s20  ;;  %v794_v30 = vld [vmem:[%s1527_s3 + $0xf8] sm:$0xff]  ;;  %v1045_v13 = vpack.c.bf16 %v814_v11, %v812_v10 }
  0xbe   : > { %1018 = vmatprep.subr.bf16.mxu1 %v1017_v16  ;;  %v1025_v33 = vpack.c.bf16 %v794_v30, %v792_v29  ;;  %v811_v16 = vld [vmem:[%s1527_s3 + $0x180] sm:$0xff] }
  0xbf   : > { %1020 = vmatpush1.bf16.msra.mxu1 %v1019_v23  ;;  %v1047_v22 = vpack.c.bf16 %v813_v17, %v811_v16  ;;  %v1049_v23 = vpack.c.bf16 %v818_v21, %v816_v20 }
  0xc0   : > { %1022 = vmatprep.subr.bf16.mxu1 %v1021_v24 }
  0xc1   : > { %642 = vrot.lane.b32.xlu1 %v634_v27, %s1079_s20  ;;  %v789_v27 = vld [vmem:[%s1527_s3 + $0xd0] sm:$0xff] }
  0xc2   : > { %v1023_v32 = vpack.c.bf16 %v789_v27, %v787_v25  ;;  %v271_v25 = vld [vmem:[%s1525_s1] ss:$8 sm:$0x3] }
  0xc3   : > { %v280_v27 = vrot.slane %v271_v25, %v1133_v4  ;;  %v276_v30 = vrot.slane %v271_v25, %v1136_v5 }
  0xc4   : > { %1024 = vmatpush1.bf16.msra.mxu1 %v1023_v32 }
  0xc5   : > { %1026 = vmatprep.subr.bf16.mxu1 %v1025_v33  ;;  %v284_v33 = vmul.f32 %v280_v27, %v1195_v50  ;;  %v283_v35 = vmul.f32 %v276_v30, %v1181_v41  ;;  %v285_v59 = vmul.f32 %v276_v30, %v1189_v47 }
  0xc8   : > { %1028 = vmatpush1.bf16.msra.mxu1 %v1027_v39 }
  0xc9   : > { %1030 = vmatprep.subr.bf16.mxu1 %v1029_v40 }
  0xcc   : > { %1032 = vmatpush1.bf16.msra.mxu1 %v1031_v46 }
  0xcd   : > { %1034 = vmatprep.subr.bf16.mxu1 %v1033_v48 }
  0xd0   : > { %1036 = vmatpush1.bf16.msra.mxu1 %v1035_v55 }
  0xd1   : > { %1038 = vmatprep.subr.bf16.mxu1 %v1037_v57  ;;  %v286_v57 = vmul.f32 %v280_v27, %v1199_v54 }
  0xd4   : > { %1040 = vmatpush1.bf16.msra.mxu1 %v1039_v62 }
  0xd5   : > { %1042 = vmatprep.subr.bf16.mxu1 %v1041_v3 }
  0xd8   : > { %1044 = vmatpush1.bf16.msra.mxu1 %v1043_v12 }
  0xd9   : > { %1046 = vmatprep.subr.bf16.mxu1 %v1045_v13 }
  0xdc   : > { %1048 = vmatpush1.bf16.msra.mxu1 %v1047_v22 }
  0xdd   : > { %1050 = vmatprep.subr.bf16.mxu1 %v1049_v23 }
 0x102   : > { %v318_v24 = vpop.permute.xlu0 %317 }
 0x106   : > { %v364_v29 = vpop.permute.xlu0 %363 }
 0x107   : > { %v320_v32 = vpop.permute.xlu1 %319 }
 0x108   : > { %v326_v34 = vsel %vm325_vm9, %v318_v24, %v320_v32  ;;  %v333_v38 = vadd.f32 %v320_v32, %v284_v33  ;;  %v654_v33 = vld [vmem:[%s1526_s2] sm:$0x3] }
 0x109   : > { %v332_v39 = vadd.f32 %v326_v34, %v283_v35 }
 0x10a   : > { %v322_v36 = vpop.permute.xlu0 %321 }
 0x10b   : > { %v366_v40 = vpop.permute.xlu1 %365 }
 0x10c   : > { %v372_v42 = vsel %vm371_vm10, %v364_v29, %v366_v40  ;;  %v379_v43 = vadd.f32 %v366_v40, %v333_v38 }
 0x10d   : > { %v378_v44 = vadd.f32 %v372_v42, %v332_v39 }
 0x10e   : > { %v368_v45 = vpop.permute.xlu0 %367  ;;  %v415_v46 = vadd.f32 %v1246_v28, %v379_v43  ;;  %v659_v43 = vrot.slane %v654_v33, %v1136_v5 }
 0x10f   : > { %v324_v48 = vpop.permute.xlu1 %323  ;;  %v414_v49 = vadd.f32 %v1236_v19, %v378_v44 }
 0x110   : > { %v327_v58 = vsel %vm325_vm9, %v322_v36, %v324_v48  ;;  %v335_v61 = vadd.f32 %v324_v48, %v286_v57 }
 0x111   : > { %v334_v28 = vadd.f32 %v327_v58, %v285_v59 }
 0x112   : > { %v455_v50 = vpop.permute.xlu0 %454 }
 0x113   : > { %v370_v51 = vpop.permute.xlu1 %369 }
 0x114   : > { %v373_v62 = vsel %vm371_vm10, %v368_v45, %v370_v51  ;;  %v381_v8 = vadd.f32 %v370_v51, %v335_v61 }
 0x115   : > { %v380_v19 = vadd.f32 %v373_v62, %v334_v28 }
 0x116   : > { %v505_v52 = vpop.permute.xlu0 %504  ;;  %v417_v11 = vadd.f32 %v408_v15, %v381_v8 }
 0x117   : > { %v457_v53 = vpop.permute.xlu1 %456  ;;  %v416_v54 = vadd.f32 %v405_v6, %v380_v19 }
 0x118   : > { %v459_v47 = vsel %vm325_vm9, %v455_v50, %v457_v53  ;;  %v467_v21 = vadd.f32 %v457_v53, %v417_v11  ;;  %v678_v53 = vmul.u32 2, %v1120_v1  ;;  %v817_v1 = vld [vmem:[%s1527_s3 + $0x1b0] sm:$0xff] }
 0x119   : > { %v466_v25 = vadd.f32 %v459_v47, %v416_v54 }
 0x11a   : > { %v591_v41 = vpop.permute.xlu0 %590 }
 0x11b   : > { %v507_v55 = vpop.permute.xlu1 %506 }
 0x11c   : > { %v509_v22 = vsel %vm371_vm10, %v505_v52, %v507_v55  ;;  %v517_v15 = vadd.f32 %v507_v55, %v467_v21  ;;  %v677_v52 = vand.u32 127, %v273_v0  ;;  %v815_v0 = vld [vmem:[%s1527_s3 + $0x1a0] sm:$0xff] }
 0x11d   : > { %v516_v29 = vadd.f32 %v509_v22, %v466_v25  ;;  %v1051_v28 = vpack.c.bf16 %v817_v1, %v815_v0 }
 0x11e   : > { %v451_v60 = vpop.permute.xlu0 %450  ;;  %v553_v34 = vadd.f32 %v544_v26, %v517_v15  ;;  %vm679_vm13 = vcmp.eq.s32.totalorder %v677_v52, %v678_v53 }
 0x11f   : > { %v593_v3 = vpop.permute.xlu1 %592  ;;  %v552_v36 = vadd.f32 %v541_v18, %v516_v29  ;;  %v982_v62 = vsel %vm679_vm13, 1.0, %v1075_v2  ;;  %1052 = vmatpush1.bf16.msra.mxu1 %v1051_v28  ;;  %v819_v2 = vld [vmem:[%s1528_s4] sm:$0x3] }
 0x120   : > { %v595_v39 = vsel %vm325_vm9, %v591_v41, %v593_v3  ;;  %v603_v45 = vadd.f32 %v593_v3, %v553_v34  ;;  %v824_v19 = vrot.slane %v819_v2, %v1136_v5 }
 0x122   : > { %v501_v9 = vpop.permute.xlu0 %500 }
 0x123   : > { %v453_v10 = vpop.permute.xlu1 %452 }
 0x124   : > { %v458_v12 = vsel %vm325_vm9, %v451_v60, %v453_v10  ;;  %v465_v13 = vadd.f32 %v453_v10, %v415_v46  ;;  %v602_v46 = vadd.f32 %v595_v39, %v552_v36 }
 0x125   : > { %v464_v16 = vadd.f32 %v458_v12, %v414_v49 }
 0x126   : > { %v587_v17 = vpop.permute.xlu0 %586 }
 0x127   : > { %v503_v20 = vpop.permute.xlu1 %502 }
 0x128   : > { %v508_v23 = vsel %vm371_vm10, %v501_v9, %v503_v20  ;;  %v515_v24 = vadd.f32 %v503_v20, %v465_v13  ;;  %v828_v9 = vrot.slane %v819_v2, %v1133_v4 }
 0x129   : > { %v514_v63 = vadd.f32 %v508_v23, %v464_v16 }
 0x12a   : > { %v551_v27 = vadd.f32 %v1262_v37, %v515_v24  ;;  %v637_v32 = vpop.permute.xlu0 %636 }
 0x12b   : > { %v550_v56 = vadd.f32 %v1254_v31, %v514_v63  ;;  %v589_v6 = vpop.permute.xlu1 %588  ;;  %v663_v31 = vrot.slane %v654_v33, %v1133_v4 }
 0x12c   : > { %v594_v30 = vsel %vm325_vm9, %v587_v17, %v589_v6  ;;  %v601_v35 = vadd.f32 %v589_v6, %v551_v27 }
 0x12d   : > { %v600_v38 = vadd.f32 %v594_v30, %v550_v56 }
 0x12e   : > { %v641_v14 = vpop.permute.xlu0 %640 }
 0x12f   : > { %v639_v37 = vpop.permute.xlu1 %638 }
 0x130   : > { %v644_v40 = vsel %vm371_vm10, %v637_v32, %v639_v37  ;;  %v651_v42 = vadd.f32 %v639_v37, %v601_v35 }
 0x131   : > { %v650_v44 = vadd.f32 %v644_v40, %v600_v38 }
 0x132   : > { %v667_v48 = vadd.f32 %v663_v31, %v651_v42 }
 0x133   : > { %v643_v26 = vpop.permute.xlu1 %642  ;;  %v666_v49 = vadd.f32 %v659_v43, %v650_v44 }
 0x134   : > { %v645_v7 = vsel %vm371_vm10, %v641_v14, %v643_v26  ;;  %v653_v18 = vadd.f32 %v643_v26, %v603_v45  ;;  %v671_v57 = vmax.f32 %v667_v48, 0.0 }
 0x135   : > { %v652_v50 = vadd.f32 %v645_v7, %v602_v46  ;;  %v670_v58 = vmax.f32 %v666_v49, 0.0 }
 0x136   : > { %v669_v51 = vadd.f32 %v663_v31, %v653_v18 }
 0x137   : > { %v668_v41 = vadd.f32 %v659_v43, %v652_v50 }
 0x138   : > { %v673_v55 = vmax.f32 %v669_v51, 0.0 }
 0x139   : > { %v672_v59 = vmax.f32 %v668_v41, 0.0 }
 0x13a   : > { %v991_v60 = vpack.c.bf16 %v673_v55, %v671_v57 }
 0x13b   : > { %v994_v61 = vpack.c.bf16 %v672_v59, %v670_v58 }
 0x13c   : > { %993 = vmatprep.subr.msk.bf16.mxu0 %vm992_vm12, %v991_v60 }
 0x13d   : > { %996 = vmatpush1.bf16.msk.msra.mxu0 %vm992_vm12, %v994_v61 }
 0x140   : > { %985 = vmatmul.mubr.msk.f32.vlgmr.msra.gmra.mrb[0].mxu0 %vm682_vm14, %v982_v62 }
 0x213   : > { %v758_v3 = vpop.f32.mrb[0].mxu0 }
 0x214   : > { %v760_v8 = vpop.f32.mrb[1].mxu0 }
 0x215   : > { %986 = vmatprep.mubr.msk.f32.mxu1 %vm371_vm10, %v760_v8 }
 0x216   : > { %899 = vmatmul.mubr.f32.vlgmr.msra.gmra.mrb[0].mxu1 %v758_v3 }
 0x2e9   : > { %v900_v10 = vpop.f32.mrb[0].mxu1 }
 0x2ea   : > { %v901_v11 = vadd.f32 %v900_v10, %v824_v19  ;;  %v902_v12 = vpop.f32.mrb[1].mxu1 }
 0x2eb   : > { %v903_v54 = vadd.f32 %v902_v12, %v828_v9 }
 0x2ec   : > { %v905_v47 = vmax.f32 %v901_v11, 0.0 }
 0x2ed   : > { %v906_v13 = vmax.f32 %v903_v54, 0.0 }
 0x2ee   : > { %907 = vst [vmem:[%s224_s27] sm:$0x7f] %v905_v47 }
 0x2ef   : > { %909 = vst.msk [vmem:[%s224_s27 + $0x8] sm:$0x7f] %vm908_vm15, %v906_v13 }
 0x2f0 PF: > { %s15_s18 = sadd.s32 1, %s1073_s18  }
 0x2f1   : > { %p12_p4 = scmp.ge.s32.totalorder %s15_s18, 4  }
 0x2f3   :  { %14 = sbr.rel (!%p12_p4) target bundleno = 1 (0x1), region = 78 }

// kernel: _lambda_.8
= control target key start
LH: loop header
LB: loop body
LE: loop exit
PB: predicated region body
PF: predicated region fallthrough
CT: control target
= control target key end

     0   :  { %s912_s18 = smov 0   ;;  %s1271_s0 = inlined_call_operand.vmem [shape: f32[2,7,224], index: 0, kind: input, shape index: {}]   ;;  %s1272_s1 = inlined_call_operand.vmem [shape: f32[9,224], index: 1, kind: input, shape index: {}]   ;;  %s1273_s2 = inlined_call_operand.vmem [shape: f32[1,224], index: 2, kind: input, shape index: {}]   ;;  %s1274_s3 = inlined_call_operand.vmem [shape: f32[224,224], index: 3, kind: input, shape index: {}]   ;;  %s1275_s4 = inlined_call_operand.vmem [shape: f32[1,224], index: 4, kind: input, shape index: {}]   ;;  %s1276_s5 = inlined_call_operand.vmem [shape: f32[2,7,224], index: 5, kind: output, shape index: {}]  }
   0x1 LB: > { %s780_s19 = sadd.s32 4294967295, %s876_s18   ;;  %p784_p0 = scmp.ge.s32.totalorder %s876_s18, 1  ;;  %s876_s18 = sphi %s912_s18, %s15_s18  }
   0x2   : > { %p187_p1 = scmp.lt.s32.totalorder %s876_s18, 3 }
   0x4   : > { %p188_p2 = pnand %p784_p0, %p187_p1 }
   0x5   : > { %v257_v0 = vlaneseq (!%p188_p2)  ;;  %p215_p3 = scmp.lt.s32.totalorder (!%p188_p2), %s780_s19, 1  ;;  %v878_v1 = vmov (!%p188_p2), 0.0   ;;  %vm231_vm0 = vcmask (!%p188_p2), 253952   ;;  %vm227_vm1 = vcmask (!%p188_p2), 261120   ;;  %s879_s26 = smov (!%p188_p2), 32   ;;  %v579_v27 = vld [vmem:[%s1274_s3 + $0x8] sm:$0xff] (!%p188_p2) }
   0x6   : > { %191 = sbr.rel (%p188_p2) target bundleno = 516 (0x204), region = 40  ;;  %225 = vst [vmem:[#allocation2] sm:$0xff] (!%p188_p2), %v878_v1  ;;  %229 = vst [vmem:[#allocation2 + $0x18] sm:$0x1] (!%p188_p2), %v878_v1  ;;  %s880_s6 = smov (!%p188_p2), 64   ;;  %v581_v28 = vld [vmem:[%s1274_s3 + $0x18] sm:$0xff] (!%p188_p2) }
   0x7   : > { %230 = vst [vmem:[#allocation2 + $0x20] sm:$0x1] (!%p188_p2), %v878_v1  ;;  %226 = vst [vmem:[#allocation2 + $0x8] sm:$0xff] (!%p188_p2), %v878_v1  ;;  %v258_v2 = vshrl.u32 (!%p188_p2), %v257_v0, 7  ;;  %v578_v29 = vld [vmem:[%s1274_s3] sm:$0xff] (!%p188_p2)  ;;  %v802_v30 = vpack.c.bf16 (!%p188_p2), %v581_v28, %v579_v27  ;;  %v580_v31 = vld [vmem:[%s1274_s3 + $0x10] sm:$0xff] (!%p188_p2) }
   0x8   : > { %232 = vst.msk [vmem:[#allocation2 + $0x28] sm:$0x1] (!%p188_p2), %vm231_vm0, %v878_v1  ;;  %v789_v3 = vld [vmem:[%s1272_s1 + $0x1] ss:$8 sm:$0x3] (!%p188_p2)  ;;  %v585_v33 = vld [vmem:[%s1274_s3 + $0x38] sm:$0xff] (!%p188_p2)  ;;  %v804_v34 = vpack.c.bf16 (!%p188_p2), %v580_v31, %v578_v29 }
   0x9   : > { %228 = vst.msk [vmem:[#allocation2 + $0x10] sm:$0xff] (!%p188_p2), %vm227_vm1, %v878_v1  ;;  %v926_v4 = vsub.s32 (!%p188_p2), 0, %v258_v2  ;;  %v928_v5 = vsub.s32 (!%p188_p2), 1, %v258_v2  ;;  %v790_v12 = vld [vmem:[%s1272_s1 + $0x2] ss:$8 sm:$0x3] (!%p188_p2)  ;;  %803 = vmatprep.subr.bf16.mxu0 (!%p188_p2), %v802_v30 }
   0xa   : > { %v792_v15 = vld [vmem:[%s1272_s1 + $0x4] ss:$8 sm:$0x3] (!%p188_p2)  ;;  %v793_v18 = vld [vmem:[%s1272_s1 + $0x5] ss:$8 sm:$0x3] (!%p188_p2)  ;;  %805 = vmatpush1.bf16.msra.mxu0 (!%p188_p2), %v804_v34 }
   0xb   : > { %v277_v6 = vrot.slane (!%p188_p2), %v789_v3, %v926_v4  ;;  %v281_v10 = vrot.slane (!%p188_p2), %v789_v3, %v928_v5  ;;  %v313_v13 = vrot.slane (!%p188_p2), %v790_v12, %v928_v5  ;;  %v309_v14 = vrot.slane (!%p188_p2), %v790_v12, %v926_v4  ;;  %v795_v21 = vld [vmem:[%s1272_s1 + $0x7] ss:$8 sm:$0x3] (!%p188_p2)  ;;  %v796_v24 = vld [vmem:[%s1272_s1 + $0x10] ss:$8 sm:$0x3] (!%p188_p2) }
   0xc   : > { %v374_v16 = vrot.slane (!%p188_p2), %v792_v15, %v928_v5  ;;  %v370_v17 = vrot.slane (!%p188_p2), %v792_v15, %v926_v4  ;;  %v407_v19 = vrot.slane (!%p188_p2), %v793_v18, %v928_v5  ;;  %v403_v20 = vrot.slane (!%p188_p2), %v793_v18, %v926_v4  ;;  %v583_v32 = vld [vmem:[%s1274_s3 + $0x28] sm:$0xff] (!%p188_p2)  ;;  %v582_v36 = vld [vmem:[%s1274_s3 + $0x20] sm:$0xff] (!%p188_p2)  ;;  %v584_v37 = vld [vmem:[%s1274_s3 + $0x30] sm:$0xff] (!%p188_p2)  ;;  %s881_s23 = smov (!%p188_p2), 96  }
   0xd   : > { %s1278_s19 = smov (!%p215_p3, %s780_s19), 1  ;;  %282 = vrot.lane.b32.xlu1 %v277_v6, %s879_s26  ;;  %v479_v22 = vrot.slane %v795_v21, %v928_v5  ;;  %v475_v23 = vrot.slane %v795_v21, %v926_v4  ;;  %v520_v25 = vrot.slane %v796_v24, %v928_v5  ;;  %v516_v26 = vrot.slane %v796_v24, %v926_v4  ;;  %v587_v38 = vld [vmem:[%s1274_s3 + $0x48] sm:$0xff]  ;;  %v589_v39 = vld [vmem:[%s1274_s3 + $0x58] sm:$0xff]  ;;  %v586_v42 = vld [vmem:[%s1274_s3 + $0x40] sm:$0xff] }
   0xe   : > { %s800_s22 = sshll.u32 %s1278_s19, 4  ;;  %v806_v35 = vpack.c.bf16 %v585_v33, %v583_v32  ;;  %v808_v40 = vpack.c.bf16 %v584_v37, %v582_v36  ;;  %v810_v41 = vpack.c.bf16 %v589_v39, %v587_v38  ;;  %v588_v43 = vld [vmem:[%s1274_s3 + $0x50] sm:$0xff]  ;;  %v591_v45 = vld [vmem:[%s1274_s3 + $0x68] sm:$0xff]  ;;  %v593_v46 = vld [vmem:[%s1274_s3 + $0x78] sm:$0xff]  ;;  %vm246_vm2 = vcmask 1047809  }
   0xf   : > { %s219_s25 = scalar_lea.vmem %s1271_s0, %s800_s22  ;;  %v812_v44 = vpack.c.bf16 %v588_v43, %v586_v42  ;;  %v590_v47 = vld [vmem:[%s1274_s3 + $0x60] sm:$0xff]  ;;  %v814_v48 = vpack.c.bf16 %v593_v46, %v591_v45  ;;  %v592_v49 = vld [vmem:[%s1274_s3 + $0x70] sm:$0xff]  ;;  %v595_v50 = vld [vmem:[%s1274_s3 + $0x88] sm:$0xff]  ;;  %vm458_vm3 = vcmask 1045504   ;;  %vm318_vm4 = vcmask 523264   ;;  %s224_s12 = scalar_lea.vmem %s1276_s5, %s800_s22 }
  0x10   : > { %v233_v7 = vld [vmem:[%s219_s25] sm:$0x7f]  ;;  %v234_v8 = vld [vmem:[%s219_s25 + $0x8] sm:$0x7f]  ;;  %807 = vmatprep.subr.bf16.mxu0 %v806_v35  ;;  %v597_v51 = vld [vmem:[%s1274_s3 + $0x98] sm:$0xff]  ;;  %v816_v52 = vpack.c.bf16 %v592_v49, %v590_v47  ;;  %vm297_vm5 = vcmask 785408  }
  0x11   : > { %v237_v9 = vrot.slane %v233_v7, 7  ;;  %v238_v11 = vrot.slane %v234_v8, 7  ;;  %284 = vrot.lane.b32.xlu1 %v281_v10, %s879_s26  ;;  %809 = vmatpush1.bf16.msra.mxu0 %v808_v40  ;;  %v818_v53 = vpack.c.bf16 %v597_v51, %v595_v50  ;;  %v794_v56 = vld [vmem:[%s1272_s1 + $0x6] ss:$8 sm:$0x3]  ;;  %v596_v58 = vld [vmem:[%s1274_s3 + $0x90] sm:$0xff] }
  0x12   : > { %811 = vmatprep.subr.bf16.mxu0 %v810_v41  ;;  %v594_v57 = vld [vmem:[%s1274_s3 + $0x80] sm:$0xff]  ;;  %v599_v61 = vld [vmem:[%s1274_s3 + $0xa8] sm:$0xff]  ;;  %v601_v62 = vld [vmem:[%s1274_s3 + $0xb8] sm:$0xff]  ;;  %v443_v1 = vrot.slane %v794_v56, %v926_v4  ;;  %vm723_vm6 = vcmask 784384  }
  0x13   : > { %239 = vrot.lane.b32.xlu0 %v237_v9, %s879_s26  ;;  %v820_v59 = vpack.c.bf16 %v596_v58, %v594_v57  ;;  %v1040_v0 = vld [vmem:[#allocation2 + $0x10] sm:$0xff]  ;;  %v822_v2 = vpack.c.bf16 %v601_v62, %v599_v61  ;;  %v1044_v6 = vld [vmem:[#allocation2 + $0x18] sm:$0x1]  ;;  %v598_v7 = vld [vmem:[%s1274_s3 + $0xa0] sm:$0xff] }
  0x14   : > { %v600_v8 = vld [vmem:[%s1274_s3 + $0xb0] sm:$0xff]  ;;  %v603_v10 = vld [vmem:[%s1274_s3 + $0xc8] sm:$0xff]  ;;  %v452_v18 = vmul.f32 %v443_v1, %v1044_v6  ;;  %v609_v29 = vld [vmem:[%s1274_s3 + $0xf8] sm:$0xff] }
  0x15   : > { %316 = vrot.lane.b32.xlu1 %v313_v13, %s880_s6  ;;  %813 = vmatpush1.bf16.msra.mxu0 %v812_v44  ;;  %v824_v9 = vpack.c.bf16 %v600_v8, %v598_v7  ;;  %v447_v13 = vrot.slane %v794_v56, %v928_v5  ;;  %v604_v21 = vld [vmem:[%s1274_s3 + $0xd0] sm:$0xff]  ;;  %v607_v28 = vld [vmem:[%s1274_s3 + $0xe8] sm:$0xff]  ;;  %v606_v35 = vld [vmem:[%s1274_s3 + $0xe0] sm:$0xff] }
  0x16   : > { %815 = vmatprep.subr.bf16.mxu0 %v814_v48  ;;  %v460_v27 = vrot.slane %v452_v18, 2  ;;  %v830_v34 = vpack.c.bf16 %v609_v29, %v607_v28  ;;  %v608_v36 = vld [vmem:[%s1274_s3 + $0xf0] sm:$0xff]  ;;  %v611_v41 = vld [vmem:[%s1274_s3 + $0x108] sm:$0xff]  ;;  %v613_v42 = vld [vmem:[%s1274_s3 + $0x118] sm:$0xff] }
  0x17   : > { %241 = vrot.lane.b32.xlu0 %v238_v11, %s879_s26  ;;  %v605_v11 = vld [vmem:[%s1274_s3 + $0xd8] sm:$0xff]  ;;  %v832_v40 = vpack.c.bf16 %v608_v36, %v606_v35  ;;  %v834_v47 = vpack.c.bf16 %v613_v42, %v611_v41  ;;  %v610_v50 = vld [vmem:[%s1274_s3 + $0x100] sm:$0xff]  ;;  %v612_v51 = vld [vmem:[%s1274_s3 + $0x110] sm:$0xff] }
  0x18   : > { %v615_v61 = vld [vmem:[%s1274_s3 + $0x128] sm:$0xff]  ;;  %v617_v62 = vld [vmem:[%s1274_s3 + $0x138] sm:$0xff] }
  0x19   : > { %377 = vrot.lane.b32.xlu1 %v374_v16, %s879_s26  ;;  %817 = vmatpush1.bf16.msra.mxu0 %v816_v52  ;;  %v254_v8 = vld [vmem:[#allocation2 + $0x28] sm:$0x1]  ;;  %v621_v18 = vld [vmem:[%s1274_s3 + $0x158] sm:$0xff] }
  0x1a   : > { %819 = vmatprep.subr.bf16.mxu0 %v818_v53 }
  0x1b   : > { %314 = vrot.lane.b32.xlu0 %v309_v14, %s880_s6  ;;  %v826_v14 = vpack.c.bf16 %v605_v11, %v603_v10 }
  0x1d   : > { %410 = vrot.lane.b32.xlu1 %v407_v19, %s880_s6  ;;  %821 = vmatpush1.bf16.msra.mxu0 %v820_v59 }
  0x1e   : > { %823 = vmatprep.subr.bf16.mxu0 %v822_v2  ;;  %v614_v2 = vld [vmem:[%s1274_s3 + $0x120] sm:$0xff] }
  0x1f   : > { %375 = vrot.lane.b32.xlu0 %v370_v17, %s879_s26  ;;  %v1065_v17 = vld [vmem:[#allocation2 + $0x20] sm:$0x1] }
  0x21   : > { %482 = vrot.lane.b32.xlu1 %v479_v22, %s879_s26  ;;  %825 = vmatpush1.bf16.msra.mxu0 %v824_v9 }
  0x22   : > { %827 = vmatprep.subr.bf16.mxu0 %v826_v14 }
  0x23   : > { %408 = vrot.lane.b32.xlu0 %v403_v20, %s880_s6  ;;  %v602_v20 = vld [vmem:[%s1274_s3 + $0xc0] sm:$0xff] }
  0x24   : > { %v828_v22 = vpack.c.bf16 %v604_v21, %v602_v20  ;;  %v618_v21 = vld [vmem:[%s1274_s3 + $0x140] sm:$0xff] }
  0x25   : > { %523 = vrot.lane.b32.xlu1 %v520_v25, %s880_s6  ;;  %v453_v25 = vmul.f32 %v447_v13, %v1065_v17 }
  0x26   : > { %829 = vmatpush1.bf16.msra.mxu0 %v828_v22  ;;  %v620_v22 = vld [vmem:[%s1274_s3 + $0x150] sm:$0xff] }
  0x27   : > { %480 = vrot.lane.b32.xlu0 %v475_v23, %s879_s26  ;;  %v463_v39 = vrot.slane %v453_v25, 2  ;;  %831 = vmatprep.subr.bf16.mxu0 %v830_v34 }
  0x2a   : > { %833 = vmatpush1.bf16.msra.mxu0 %v832_v40 }
  0x2b   : > { %521 = vrot.lane.b32.xlu0 %v516_v26, %s880_s6  ;;  %835 = vmatprep.subr.bf16.mxu0 %v834_v47 }
  0x7f   : > { %v1023_v54 = vpop.permute.xlu1 %282 }
  0x83   : > { %v285_v60 = vpop.permute.xlu1 %284 }
  0x84   : > { %v286_v31 = vsel %vm227_vm1, %v1023_v54, %v285_v60 }
  0x85   : > { %v240_v55 = vpop.permute.xlu0 %239 }
  0x86   : > { %247 = vst.msk [vmem:[#allocation2] sm:$0xfe] %vm246_vm2, %v240_v55 }
  0x87   : > { %v1058_v12 = vpop.permute.xlu1 %316 }
  0x88   : > { %v325_v15 = vmul.f32 %v1058_v12, %v1040_v0 }
  0x89   : > { %v242_v63 = vpop.permute.xlu0 %241 }
  0x8a   : > { %v243_v3 = vsel %vm227_vm1, %v240_v55, %v242_v63  ;;  %333 = vrot.lane.b32.xlu1 %v325_v15, %s880_s6  ;;  %v836_v55 = vpack.c.bf16 %v612_v51, %v610_v50  ;;  %v619_v15 = vld [vmem:[%s1274_s3 + $0x148] sm:$0xff]  ;;  %v628_v50 = vld [vmem:[%s1274_s3 + $0x190] sm:$0xff] }
  0x8b   : > { %248 = vst [vmem:[#allocation2 + $0x8] sm:$0xfe] %v243_v3  ;;  %v1078_v24 = vpop.permute.xlu1 %377  ;;  %v616_v3 = vld [vmem:[%s1274_s3 + $0x130] sm:$0xff]  ;;  %v842_v29 = vpack.c.bf16 %v621_v18, %v619_v15 }
  0x8c   : > { %837 = vmatpush1.bf16.msra.mxu0 %v836_v55  ;;  %v840_v10 = vpack.c.bf16 %v616_v3, %v614_v2 }
  0x8d   : > { %v1063_v16 = vpop.permute.xlu0 %314  ;;  %v1068_v19 = vld [vmem:[#allocation2] sm:$0xff] }
  0x8e   : > { %v450_v23 = vmul.f32 %v443_v1, %v1068_v19  ;;  %v838_v1 = vpack.c.bf16 %v617_v62, %v615_v61  ;;  %v289_v9 = vmul.f32 %v1023_v54, %v1068_v19  ;;  %v630_v62 = vld [vmem:[%s1274_s3 + $0x1a0] sm:$0xff] }
  0x8f   : > { %v411_v38 = vpop.permute.xlu1 %410 }
  0x90   : > { %v459_v30 = vrot.slane %v450_v23, 2  ;;  %v418_v45 = vmul.f32 %v411_v38, %v1040_v0  ;;  %839 = vmatprep.subr.bf16.mxu0 %v838_v1  ;;  %v323_v23 = vmul.f32 %v1063_v16, %v1068_v19 }
  0x91   : > { %v1081_v26 = vpop.permute.xlu0 %375  ;;  %841 = vmatpush1.bf16.msra.mxu0 %v840_v10 }
  0x92   : > { %v1091_v32 = vld [vmem:[#allocation2 + $0x8] sm:$0xff]  ;;  %v382_v33 = vmul.f32 %v1081_v26, %v1068_v19  ;;  %v1112_v48 = vsel %vm458_vm3, %v459_v30, %v460_v27  ;;  %v424_v53 = vrot.slane %v418_v45, 1  ;;  %v379_v27 = vsel %vm227_vm1, %v1081_v26, %v1078_v24  ;;  %843 = vmatprep.subr.bf16.mxu0 %v842_v29  ;;  %v629_v45 = vld [vmem:[%s1274_s3 + $0x198] sm:$0xff] }
  0x93   : > { %v290_v37 = vmul.f32 %v286_v31, %v1091_v32  ;;  %v451_v43 = vmul.f32 %v447_v13, %v1091_v32  ;;  %v483_v57 = vpop.permute.xlu1 %482  ;;  %v844_v30 = vpack.c.bf16 %v620_v22, %v618_v21  ;;  %v623_v31 = vld [vmem:[%s1274_s3 + $0x168] sm:$0xff]  ;;  %v319_v24 = vsel %vm318_vm4, %v1063_v16, %v1058_v12 }
  0x94   : > { %v386_v44 = vrot.slane %v382_v33, 1  ;;  %429 = vrot.lane.b32.xlu0 %v424_v53, %s880_s6  ;;  %v625_v33 = vld [vmem:[%s1274_s3 + $0x178] sm:$0xff]  ;;  %v383_v40 = vmul.f32 %v379_v27, %v1091_v32 }
  0x95   : > { %295 = vrot.lane.b32.xlu1 %v290_v37, %s881_s23  ;;  %v409_v46 = vpop.permute.xlu0 %408  ;;  %v462_v52 = vrot.slane %v451_v43, 2  ;;  %v846_v36 = vpack.c.bf16 %v625_v33, %v623_v31  ;;  %v622_v37 = vld [vmem:[%s1274_s3 + $0x160] sm:$0xff]  ;;  %845 = vmatpush1.bf16.msra.mxu0 %v844_v30 }
  0x96   : > { %v416_v49 = vmul.f32 %v409_v46, %v1068_v19  ;;  %v412_v56 = vsel %vm318_vm4, %v409_v46, %v411_v38  ;;  %v624_v38 = vld [vmem:[%s1274_s3 + $0x170] sm:$0xff]  ;;  %v387_v51 = vrot.slane %v383_v40, 1 }
  0x97   : > { %v1123_v58 = vsel %vm458_vm3, %v462_v52, %v463_v39  ;;  %v417_v7 = vmul.f32 %v412_v56, %v1091_v32  ;;  %v524_v14 = vpop.permute.xlu1 %523  ;;  %v324_v39 = vmul.f32 %v319_v24, %v1091_v32  ;;  %v848_v41 = vpack.c.bf16 %v624_v38, %v622_v37  ;;  %847 = vmatprep.subr.bf16.mxu0 %v846_v36 }
  0x98   : > { %v422_v59 = vrot.slane %v416_v49, 1  ;;  %293 = vrot.lane.b32.xlu0 %v289_v9, %s881_s23  ;;  %v531_v54 = vmul.f32 %v524_v14, %v1040_v0  ;;  %v534_v20 = vmul.f32 %v524_v14, %v254_v8  ;;  %v626_v49 = vld [vmem:[%s1274_s3 + $0x180] sm:$0xff] }
  0x99   : > { %388 = vrot.lane.b32.xlu1 %v386_v44, %s881_s23  ;;  %v481_v60 = vpop.permute.xlu0 %480  ;;  %v423_v25 = vrot.slane %v417_v7, 1  ;;  %v627_v44 = vld [vmem:[%s1274_s3 + $0x188] sm:$0xff]  ;;  %849 = vmatpush1.bf16.msra.mxu0 %v848_v41  ;;  %v852_v52 = vpack.c.bf16 %v628_v50, %v626_v49 }
  0x9a   : > { %v484_v63 = vsel %vm227_vm1, %v481_v60, %v483_v57  ;;  %v547_v26 = vrot.slane %v531_v54, 2  ;;  %v548_v34 = vrot.slane %v534_v20, 2  ;;  %v487_v12 = vmul.f32 %v481_v60, %v1068_v19  ;;  %v255_v54 = vld [vmem:[%s1272_s1] ss:$8 sm:$0x3] }
  0x9b   : > { %v488_v11 = vmul.f32 %v484_v63, %v1091_v32  ;;  %v490_v13 = vmul.f32 %v484_v63, %v1065_v17  ;;  %v489_v16 = vmul.f32 %v481_v60, %v1044_v6  ;;  %v850_v47 = vpack.c.bf16 %v629_v45, %v627_v44  ;;  %v633_v60 = vld [vmem:[%s1274_s3 + $0x1b8] sm:$0xff]  ;;  %v791_v20 = vld [vmem:[%s1272_s1 + $0x3] ss:$8 sm:$0x3] }
  0x9c   : > { %329 = vrot.lane.b32.xlu0 %v323_v23, %s880_s6  ;;  %v549_v46 = vsel %vm458_vm3, %v547_v26, %v548_v34  ;;  %v495_v53 = vrot.slane %v487_v12, 2  ;;  %v260_v22 = vrot.slane %v255_v54, %v926_v4  ;;  %v264_v23 = vrot.slane %v255_v54, %v928_v5 }
  0x9d   : > { %425 = vrot.lane.b32.xlu1 %v422_v59, %s880_s6  ;;  %v498_v28 = vrot.slane %v488_v11, 2  ;;  %v499_v0 = vrot.slane %v490_v13, 2  ;;  %v522_v35 = vpop.permute.xlu0 %521  ;;  %v496_v55 = vrot.slane %v489_v16, 2  ;;  %851 = vmatprep.subr.bf16.mxu0 %v850_v47  ;;  %v631_v59 = vld [vmem:[%s1274_s3 + $0x1a8] sm:$0xff]  ;;  %v347_v27 = vrot.slane %v791_v20, %v926_v4 }
  0x9e   : > { %v525_v43 = vsel %vm318_vm4, %v522_v35, %v524_v14  ;;  %v854_v61 = vpack.c.bf16 %v633_v60, %v631_v59  ;;  %v529_v63 = vmul.f32 %v522_v35, %v1068_v19  ;;  %853 = vmatpush1.bf16.msra.mxu0 %v852_v52  ;;  %v532_v2 = vmul.f32 %v522_v35, %v1044_v6  ;;  %v562_v52 = vld [vmem:[%s1273_s2] sm:$0x3] }
  0x9f   : > { %v500_v42 = vsel %vm458_vm3, %v498_v28, %v499_v0  ;;  %v530_v56 = vmul.f32 %v525_v43, %v1091_v32  ;;  %v533_v57 = vmul.f32 %v525_v43, %v1065_v17  ;;  %v632_v17 = vld [vmem:[%s1274_s3 + $0x1b0] sm:$0xff]  ;;  %v497_v8 = vsel %vm458_vm3, %v495_v53, %v496_v55 }
  0xa0   : > { %331 = vrot.lane.b32.xlu0 %v324_v39, %s880_s6  ;;  %v856_v1 = vpack.c.bf16 %v632_v17, %v630_v62  ;;  %855 = vmatprep.subr.bf16.mxu0 %v854_v61  ;;  %v541_v9 = vrot.slane %v529_v63, 2  ;;  %v542_v10 = vrot.slane %v532_v2, 2  ;;  %v351_v28 = vrot.slane %v791_v20, %v928_v5 }
  0xa1   : > { %427 = vrot.lane.b32.xlu1 %v423_v25, %s880_s6  ;;  %v544_v3 = vrot.slane %v530_v56, 2  ;;  %v545_v7 = vrot.slane %v533_v57, 2  ;;  %v268_v30 = vmul.f32 %v264_v23, %v1091_v32  ;;  %v267_v31 = vmul.f32 %v260_v22, %v1068_v19 }
  0xa2   : > { %857 = vmatpush1.bf16.msra.mxu0 %v856_v1  ;;  %v543_v13 = vsel %vm458_vm3, %v541_v9, %v542_v10  ;;  %v354_v33 = vmul.f32 %v347_v27, %v1068_v19  ;;  %v355_v24 = vmul.f32 %v351_v28, %v1091_v32  ;;  %v571_v60 = vrot.slane %v562_v52, %v928_v5  ;;  %v634_v10 = vld [vmem:[%s1275_s4] sm:$0x3] }
  0xa3   : > { %v546_v11 = vsel %vm458_vm3, %v544_v3, %v545_v7  ;;  %v567_v2 = vrot.slane %v562_v52, %v926_v4 }
  0xa4   : > { %390 = vrot.lane.b32.xlu0 %v387_v51, %s881_s23  ;;  %v358_v41 = vrot.slane %v354_v33, 1  ;;  %v359_v12 = vrot.slane %v355_v24, 1 }
  0xa5   : > { %503 = vrot.lane.b32.xlu1 %v500_v42, %s881_s23 }
  0xa8   : > { %501 = vrot.lane.b32.xlu0 %v497_v8, %s881_s23 }
  0xa9   : > { %554 = vrot.lane.b32.xlu1 %v549_v46, %s880_s6 }
  0xac   : > { %552 = vrot.lane.b32.xlu0 %v546_v11, %s880_s6  ;;  %v639_v11 = vrot.slane %v634_v10, %v926_v4 }
  0xb0   : > { %550 = vrot.lane.b32.xlu0 %v543_v13, %s880_s6  ;;  %v643_v13 = vrot.slane %v634_v10, %v928_v5 }
  0xfc   : > { %v334_v14 = vpop.permute.xlu1 %333 }
 0x106   : > { %v430_v18 = vpop.permute.xlu0 %429 }
 0x107   : > { %v296_v6 = vpop.permute.xlu1 %295 }
 0x108   : > { %v302_v26 = vadd.f32 %v296_v6, %v268_v30 }
 0x10a   : > { %v294_v21 = vpop.permute.xlu0 %293 }
 0x10b   : > { %v389_v15 = vpop.permute.xlu1 %388  ;;  %v298_v29 = vsel %vm297_vm5, %v294_v21, %v296_v6 }
 0x10c   : > { %v301_v34 = vadd.f32 %v298_v29, %v267_v31 }
 0x10e   : > { %v330_v0 = vpop.permute.xlu0 %329 }
 0x10f   : > { %v426_v25 = vpop.permute.xlu1 %425 }
 0x112   : > { %v332_v36 = vpop.permute.xlu0 %331 }
 0x113   : > { %v428_v35 = vpop.permute.xlu1 %427  ;;  %v335_v37 = vsel %vm318_vm4, %v330_v0, %v332_v36  ;;  %v336_v38 = vsel %vm318_vm4, %v332_v36, %v334_v14 }
 0x114   : > { %v339_v39 = vadd.f32 %v335_v37, %v301_v34  ;;  %v340_v40 = vadd.f32 %v336_v38, %v302_v26  ;;  %v431_v46 = vsel %vm318_vm4, %v426_v25, %v428_v35  ;;  %v432_v47 = vsel %vm318_vm4, %v428_v35, %v430_v18 }
 0x116   : > { %v362_v16 = vadd.f32 %v358_v41, %v339_v39  ;;  %v363_v42 = vadd.f32 %v359_v12, %v340_v40  ;;  %v391_v43 = vpop.permute.xlu0 %390 }
 0x117   : > { %v392_v44 = vsel %vm297_vm5, %v389_v15, %v391_v43  ;;  %v504_v19 = vpop.permute.xlu1 %503 }
 0x118   : > { %v395_v45 = vadd.f32 %v392_v44, %v362_v16  ;;  %v396_v32 = vadd.f32 %v391_v43, %v363_v42 }
 0x11a   : > { %v435_v49 = vadd.f32 %v431_v46, %v395_v45  ;;  %v436_v50 = vadd.f32 %v432_v47, %v396_v32  ;;  %v502_v51 = vpop.permute.xlu0 %501 }
 0x11b   : > { %v555_v56 = vpop.permute.xlu1 %554  ;;  %v505_v17 = vsel %vm297_vm5, %v502_v51, %v504_v19 }
 0x11c   : > { %v468_v53 = vadd.f32 %v1123_v58, %v436_v50  ;;  %v467_v55 = vadd.f32 %v1112_v48, %v435_v49 }
 0x11e   : > { %v509_v57 = vadd.f32 %v504_v19, %v468_v53  ;;  %v553_v59 = vpop.permute.xlu0 %552  ;;  %v508_v63 = vadd.f32 %v505_v17, %v467_v55 }
 0x11f   : > { %v557_v61 = vsel %vm318_vm4, %v553_v59, %v555_v56 }
 0x120   : > { %v561_v62 = vadd.f32 %v557_v61, %v509_v57 }
 0x122   : > { %v551_v1 = vpop.permute.xlu0 %550  ;;  %v575_v3 = vadd.f32 %v571_v60, %v561_v62 }
 0x123   : > { %v556_v58 = vsel %vm318_vm4, %v551_v1, %v553_v59 }
 0x124   : > { %v560_v7 = vadd.f32 %v556_v58, %v508_v63  ;;  %v577_v48 = vmax.f32 %v575_v3, 0.0 }
 0x126   : > { %797 = vmatprep.mubr.msk.f32.mxu0 %vm297_vm5, %v577_v48  ;;  %v574_v8 = vadd.f32 %v567_v2, %v560_v7 }
 0x128   : > { %v576_v9 = vmax.f32 %v574_v8, 0.0 }
 0x12a   : > { %714 = vmatmul.mubr.f32.vlgmr.msra.gmra.mrb[0].mxu0 %v576_v9 }
 0x1fd   : > { %v715_v14 = vpop.f32.mrb[0].mxu0 }
 0x1fe   : > { %v716_v6 = vadd.f32 %v715_v14, %v639_v11  ;;  %v717_v15 = vpop.f32.mrb[1].mxu0 }
 0x1ff   : > { %v718_v18 = vadd.f32 %v717_v15, %v643_v13 }
 0x200   : > { %v720_v54 = vmax.f32 %v716_v6, 0.0 }
 0x201   : > { %v721_v20 = vmax.f32 %v718_v18, 0.0 }
 0x202   : > { %722 = vst [vmem:[%s224_s12] sm:$0x7f] %v720_v54 }
 0x203   : > { %724 = vst.msk [vmem:[%s224_s12 + $0x8] sm:$0x7f] %vm723_vm6, %v721_v20 }
 0x204 PF: > { %s15_s18 = sadd.s32 1, %s876_s18  }
 0x205   : > { %p12_p4 = scmp.ge.s32.totalorder %s15_s18, 4  }
 0x207   :  { %14 = sbr.rel (!%p12_p4) target bundleno = 1 (0x1), region = 78 }

// kernel: _lambda_.9
= control target key start
LH: loop header
LB: loop body
LE: loop exit
PB: predicated region body
PF: predicated region fallthrough
CT: control target
= control target key end

     0   :  { %8 = vsyncpa [#allocation3], 0  ;;  %s812_s0 = inlined_call_operand.vmem [shape: f32[2,7,224], index: 0, kind: input, shape index: {}]   ;;  %s813_s1 = inlined_call_operand.vmem [shape: f32[224,16], index: 1, kind: input, shape index: {}]   ;;  %s814_s2 = inlined_call_operand.vmem [shape: f32[1,16], index: 2, kind: input, shape index: {}]   ;;  %s815_s3 = inlined_call_operand.hbm [shape: f32[2,1,16], index: 3, kind: output, shape index: {}]  }
   0x1   :  { %10 = vsyncpa [#allocation3 + $0x1], 0  ;;  %s611_s12 = smov 0   ;;  %s613_s13 = smov 0  }
   0x2   :  { %s615_s14 = smov 0   ;;  %s617_s15 = smov 0  }
   0x3 LB: > { %s632_s16 = sadd.s32 4294967295, %s585_s15   ;;  %s425_s17 = sadd.s32 4294967294, %s585_s15   ;;  %s585_s15 = sphi %s617_s15, %s821_s15   ;;  %s581_s14 = sphi %s615_s14, %s820_s14   ;;  %s577_s13 = sphi %s613_s13, %s819_s13   ;;  %s573_s12 = sphi %s611_s12, %s818_s12  }
   0x4   : > { %s636_s18 = sadd.s32 1, %s585_s15   ;;  %s91_s19 = sadd.s32 1, %s581_s14 }
   0x5   : > { %s88_s20 = ssub.s32 %s585_s15, %s636_s18  ;;  %p101_p0 = scmp.ne.s32.totalorder %s581_s14, %s577_s13 }
   0x6   : > { %p89_p1 = scmp.eq.s32.totalorder %s88_s20, 0  ;;  %p102_p2 = scmp.eq.s32.totalorder %s632_s16, 1 }
   0x7   : > { %p107_p3 = scmp.ne.s32.totalorder %s577_s13, %s573_s12  ;;  %p108_p4 = scmp.eq.s32.totalorder %s425_s17, 1 }
   0x8   : > { %s647_s21 = scalar_select %p89_p1, %s581_s14, %s91_s19  }
   0x9   : > { %p649_p5 = por %p102_p2, %p101_p0  ;;  %p653_p6 = por %p108_p4, %p107_p3 }
   0xa   : > { %p428_p7 = scmp.ge.s32.totalorder %s585_s15, 1  ;;  %p140_p8 = scmp.lt.s32.totalorder %s585_s15, 3 }
   0xc   : > { %p141_p9 = pnand %p428_p7, %p140_p8 }
   0xd   : > { %p163_p10 = scmp.lt.s32.totalorder (!%p141_p9), %s632_s16, 1  ;;  %v252_v0 = vld [vmem:[%s813_s1] sm:$0xff] (!%p141_p9)  ;;  %v587_v1 = vmov (!%p141_p9), 0.0   ;;  %v253_v2 = vld [vmem:[%s813_s1 + $0x8] sm:$0xff] (!%p141_p9)  ;;  %v254_v3 = vld [vmem:[%s813_s1 + $0x10] sm:$0xff] (!%p141_p9)  ;;  %v588_v5 = vmov (!%p141_p9), 0.0|0.0  }
   0xe   : > { %144 = sbr.rel (%p141_p9) target bundleno = 470 (0x1d6), region = 32  ;;  %245 = vmatprep.mubr.f32.mxu0 (!%p141_p9), %v587_v1  ;;  %v255_v4 = vld [vmem:[%s813_s1 + $0x18] sm:$0xff] (!%p141_p9)  ;;  %439 = vmatprep.subr.bf16.mxu1 (!%p141_p9), %v588_v5  ;;  %v440_v6 = vpack.c.bf16 (!%p141_p9), %v253_v2, %v252_v0  ;;  %vm174_vm0 = vcmask (!%p141_p9), 1046528   ;;  %v256_v8 = vld [vmem:[%s813_s1 + $0x20] sm:$0xff] (!%p141_p9)  ;;  %v257_v9 = vld [vmem:[%s813_s1 + $0x28] sm:$0xff] (!%p141_p9)  ;;  %vm170_vm1 = vcmask (!%p141_p9), 56320  }
   0xf   : > { %v443_v7 = vpack.c.bf16 (!%p141_p9), %v255_v4, %v254_v3  ;;  %v446_v12 = vpack.c.bf16 (!%p141_p9), %v257_v9, %v256_v8  ;;  %v589_v13 = vmov (!%p141_p9), 1.0   ;;  %v258_v14 = vld [vmem:[%s813_s1 + $0x30] sm:$0xff] (!%p141_p9)  ;;  %v259_v15 = vld [vmem:[%s813_s1 + $0x38] sm:$0xff] (!%p141_p9)  ;;  %v260_v17 = vld [vmem:[%s813_s1 + $0x40] sm:$0xff] (!%p141_p9)  ;;  %vm281_vm2 = vcmask (!%p141_p9), 785408   ;;  %s161_s4 = sand.u32 (!%p141_p9), 1, %s577_s13  }
  0x10   : > { %441 = vmatpush1.bf16.msra.mxu1 (!%p141_p9), %v440_v6  ;;  %v449_v16 = vpack.c.bf16 (!%p141_p9), %v259_v15, %v258_v14  ;;  %v261_v18 = vld [vmem:[%s813_s1 + $0x48] sm:$0xff] (!%p141_p9)  ;;  %v262_v20 = vld [vmem:[%s813_s1 + $0x50] sm:$0xff] (!%p141_p9)  ;;  %v263_v21 = vld [vmem:[%s813_s1 + $0x58] sm:$0xff] (!%p141_p9)  ;;  %s435_s7 = sshll.u32 (!%p141_p9), %s632_s16, 4  ;;  %s162_s8 = scalar_lea.vmem (!%p141_p9), [#allocation2], %s161_s4  ;;  %vm355_vm3 = vcmask (!%p141_p9), 122880  }
  0x11   : > { %442 = vmatprep.subr.bf16.mxu1 (!%p141_p9), %v588_v5  ;;  %v452_v19 = vpack.c.bf16 (!%p141_p9), %v261_v18, %v260_v17  ;;  %v455_v22 = vpack.c.bf16 (!%p141_p9), %v263_v21, %v262_v20  ;;  %v264_v23 = vld [vmem:[%s813_s1 + $0x60] sm:$0xff] (!%p141_p9)  ;;  %v265_v24 = vld [vmem:[%s813_s1 + $0x68] sm:$0xff] (!%p141_p9)  ;;  %v266_v26 = vld [vmem:[%s813_s1 + $0x70] sm:$0xff] (!%p141_p9)  ;;  %s770_s17 = scalar_lea.hbm (!%p141_p9), %s815_s3, %s435_s7  ;;  %s358_s19 = scalar_lea.sflag (!%p141_p9), [#allocation3], %s161_s4 }
  0x12   : > { %v458_v25 = vpack.c.bf16 (!%p141_p9), %v265_v24, %v264_v23  ;;  %v267_v27 = vld [vmem:[%s813_s1 + $0x78] sm:$0xff] (!%p141_p9)  ;;  %v268_v29 = vld [vmem:[%s813_s1 + $0x80] sm:$0xff] (!%p141_p9)  ;;  %v269_v30 = vld [vmem:[%s813_s1 + $0x88] sm:$0xff] (!%p141_p9) }
  0x13   : > { %v461_v28 = vpack.c.bf16 (!%p141_p9), %v267_v27, %v266_v26  ;;  %v464_v31 = vpack.c.bf16 (!%p141_p9), %v269_v30, %v268_v29  ;;  %v270_v32 = vld [vmem:[%s813_s1 + $0x90] sm:$0xff] (!%p141_p9)  ;;  %v271_v33 = vld [vmem:[%s813_s1 + $0x98] sm:$0xff] (!%p141_p9)  ;;  %v272_v35 = vld [vmem:[%s813_s1 + $0xa0] sm:$0xff] (!%p141_p9) }
  0x14   : > { %444 = vmatpush1.bf16.msra.mxu1 (!%p141_p9), %v443_v7  ;;  %v467_v34 = vpack.c.bf16 (!%p141_p9), %v271_v33, %v270_v32  ;;  %v273_v36 = vld [vmem:[%s813_s1 + $0xa8] sm:$0xff] (!%p141_p9)  ;;  %v274_v38 = vld [vmem:[%s813_s1 + $0xb0] sm:$0xff] (!%p141_p9)  ;;  %v275_v39 = vld [vmem:[%s813_s1 + $0xb8] sm:$0xff] (!%p141_p9) }
  0x15   : > { %s164_s5 = scalar_select %p163_p10, %s632_s16, 1  ;;  %445 = vmatprep.subr.bf16.mxu1 %v588_v5  ;;  %v470_v37 = vpack.c.bf16 %v273_v36, %v272_v35  ;;  %v473_v40 = vpack.c.bf16 %v275_v39, %v274_v38  ;;  %v276_v41 = vld [vmem:[%s813_s1 + $0xc0] sm:$0xff]  ;;  %v277_v42 = vld [vmem:[%s813_s1 + $0xc8] sm:$0xff]  ;;  %v278_v44 = vld [vmem:[%s813_s1 + $0xd0] sm:$0xff] }
  0x16   : > { %v476_v43 = vpack.c.bf16 %v277_v42, %v276_v41  ;;  %v279_v45 = vld [vmem:[%s813_s1 + $0xd8] sm:$0xff]  ;;  %v280_v49 = vld [vmem:[%s814_s2] sm:$0x1]  ;;  %s590_s16 = smov [#allocation2]  }
  0x17   : > { %s438_s6 = sshll.u32 %s164_s5, 4  ;;  %v479_v46 = vpack.c.bf16 %v279_v45, %v278_v44  ;;  %s527_s24 = sshll.u32 %s590_s16, 4  ;;  %s528_s24 = int_to_ptr.vmem [resolvable:$false] %s527_s24 }
  0x18   : > { %s167_s9 = scalar_lea.vmem %s812_s0, %s438_s6  ;;  %447 = vmatpush1.bf16.msra.mxu1 %v446_v12  ;;  %s529_s25 = scalar_lea.vmem %s528_s24, 32 }
  0x19   : > { %v169_v10 = vld [vmem:[%s167_s9 + $0x8] sm:$0x7f]  ;;  %v168_v11 = vld [vmem:[%s167_s9] sm:$0x7f]  ;;  %448 = vmatprep.subr.bf16.mxu1 %v588_v5  ;;  %s370_s9 = sshll.u32 %s162_s8, 4  ;;  %s772_s9 = int_to_ptr.vmem [resolvable:$true] %s370_s9 }
  0x1a   : > { %431 = vmatprep.subr.msk.mxu0 %vm174_vm0, %v169_v10  ;;  %s523_s20 = scalar_lea.vmem %s772_s9, 16  ;;  %p530_p0 = scmp.lt.s32.totalorder %s772_s9, %s528_s24 }
  0x1b   : > { %432 = vmatpush1.msk.msra.mxu0 %vm174_vm0, %v168_v11  ;;  %p524_p11 = scmp.ne.s32.totalorder %s772_s9, %s523_s20  ;;  %p531_p1 = scmp.lt.s32.totalorder %s529_s25, %s523_s20 }
  0x1c   : > { %433 = vmatmul.mubr.msk.f32.vlgmr.msra.gmra.mrb[0].mxu0 %vm170_vm1, %v589_v13  ;;  %450 = vmatpush1.bf16.msra.mxu1 %v449_v16 }
  0x1d   : > { %451 = vmatprep.subr.bf16.mxu1 %v588_v5  ;;  %p525_p12 = pnand %p524_p11, %p649_p5  ;;  %p532_p2 = por %p531_p1, %p530_p0 }
  0x1f   : > { %p526_p13 = pneg %p525_p12 }
  0x20   : > { %453 = vmatpush1.bf16.msra.mxu1 %v452_v19 }
  0x21   : > { %454 = vmatprep.subr.bf16.mxu1 %v588_v5  ;;  %p533_p3 = pnand %p532_p2, %p526_p13 }
  0x24   : > { %456 = vmatpush1.bf16.msra.mxu1 %v455_v22 }
  0x25   : > { %457 = vmatprep.subr.bf16.mxu1 %v588_v5 }
  0x28   : > { %459 = vmatpush1.bf16.msra.mxu1 %v458_v25 }
  0x29   : > { %460 = vmatprep.subr.bf16.mxu1 %v588_v5 }
  0x2c   : > { %462 = vmatpush1.bf16.msra.mxu1 %v461_v28 }
  0x2d   : > { %463 = vmatprep.subr.bf16.mxu1 %v588_v5 }
  0x30   : > { %465 = vmatpush1.bf16.msra.mxu1 %v464_v31 }
  0x31   : > { %466 = vmatprep.subr.bf16.mxu1 %v588_v5 }
  0x34   : > { %468 = vmatpush1.bf16.msra.mxu1 %v467_v34 }
  0x35   : > { %469 = vmatprep.subr.bf16.mxu1 %v588_v5 }
  0x38   : > { %471 = vmatpush1.bf16.msra.mxu1 %v470_v37 }
  0x39   : > { %472 = vmatprep.subr.bf16.mxu1 %v588_v5 }
  0x3c   : > { %474 = vmatpush1.bf16.msra.mxu1 %v473_v40 }
  0x3d   : > { %475 = vmatprep.subr.bf16.mxu1 %v588_v5 }
  0x40   : > { %477 = vmatpush1.bf16.msra.mxu1 %v476_v43 }
  0x41   : > { %478 = vmatprep.subr.bf16.mxu1 %v588_v5 }
  0x44   : > { %480 = vmatpush1.bf16.msra.mxu1 %v479_v46 }
  0xef   : > { %v247_v47 = vpop.f32.mrb[0].mxu0 }
  0xf0   : > { %v249_v48 = vpop.f32.mrb[1].mxu0 }
  0xf1   : > { %434 = vmatprep.mubr.msk.f32.mxu1 %vm281_vm2, %v249_v48 }
  0xf2   : > { %350 = vmatmul.mubr.f32.vlgmr.msra.gmra.mrb[0].mxu1 %v247_v47 }
 0x1c5   : > { %v351_v50 = vpop.f32.mrb[0].mxu1 }
 0x1c6   : > { %v352_v51 = vadd.f32 %v351_v50, %v280_v49  ;;  %v353_v52 = vpop.f32.mrb[1].mxu1 }
 0x1c8   : > { %356 = vst.msk [vmem:[%s162_s8] sm:$0x1] %vm355_vm3, %v352_v51 }
 0x1c9   : > { %536 = shalt.err (!%p533_p3)
}
 0x1ca   : > { %s537_s26 = scalar_lea.hbm %s770_s17, 16  ;;  %s541_s29 = scalar_lea.hbm %s815_s3, 32 }
 0x1cb   : > { %p538_p4 = scmp.ne.s32.totalorder %s770_s17, %s537_s26  ;;  %p542_p9 = scmp.lt.u32.totalorder %s770_s17, %s815_s3 }
 0x1cc   : > { %p543_p10 = scmp.lt.u32.totalorder %s541_s29, %s537_s26  ;;  %p545_p12 = scmp.lt.u32.totalorder %s537_s26, %s770_s17 }
 0x1cd   : > { %p539_p7 = pnand %p538_p4, %p649_p5 }
 0x1ce   : > { %p544_p11 = por %p543_p10, %p542_p9 }
 0x1cf   : > { %p540_p8 = pneg %p539_p7 }
 0x1d0   : > { %p546_p13 = por %p545_p12, %p544_p11 }
 0x1d2   : > { %p547_p0 = pnand %p546_p13, %p540_p8 }
 0x1d4   : > { %550 = shalt.err (!%p547_p0)
}
 0x1d5   : > { %481 = dma.vmem_to_hbm [thread:$0]  (%p649_p5), %s772_s9, 16, %s770_s17, %s358_s19  }
 0x1d6 PF: > { %p487_p1 = scmp.ge.s32.totalorder %s585_s15, 2  ;;  %s382_s5 = sand.u32 1, %s573_s12  }
 0x1d7   : > { %s383_s6 = scalar_lea.sflag [#allocation3], %s382_s5 }
 0x1d8   : > { %p484_p2 = pnand %p487_p1, %p653_p6 }
 0x1da   : > { %568 = dma.done.wait (!%p484_p2), %s383_s6, 16  }
 0x1db   : > { %570 = vsyncadd (!%p484_p2), %s383_s6, 4294967280  ;;  %p13_p3 = scmp.ge.s32.totalorder %s636_s18, 4   ;;  %s818_s12 = smov %s577_s13 }
 0x1dc   : > { %s819_s13 = smov %s581_s14  ;;  %s820_s14 = smov %s647_s21 }
 0x1dd   : > { %s821_s15 = smov %s636_s18  ;;  %15 = sbr.rel (!%p13_p3) target bundleno = 3 (0x3), region = 67 }
 0x1e4   :  { %387 = vsyncpa [#allocation3], 1 }
 0x1e5   :  { %389 = vsyncpa [#allocation3 + $0x1], 1 }

</bundles_post_ra>
